<compile_context>
chip_gen: v7x
topology: tpu7x:2x2x1
jax: 0.10.0
libtpu: 0.0.40
codegen_flags: <defaults>
</compile_context>

<pallas_src>
import functools

import jax
import jax.numpy as jnp
import numpy as np
from jax import lax
from jax.experimental import pallas as pl
from jax.experimental.pallas import tpu as pltpu

_BN_EPS = 1e-5


def _sigmoid(x):
    # Logistic sigmoid via tanh: runs on the EUP slot, avoids the VPU divide and the
    # inf intermediate of 1/(1+exp(-x)).
    return 0.5 * jnp.tanh(0.5 * x) + 0.5


def _zero_pad_hw(x):
    """Zero-pad a (H, W, K) value to (H+2, W+2, K) using concatenates only."""
    H, W, K = x.shape
    zw = jnp.zeros((H, 1, K), x.dtype)
    x = jnp.concatenate([zw, x, zw], axis=1)
    zh = jnp.zeros((1, W + 2, K), x.dtype)
    return jnp.concatenate([zh, x, zh], axis=0)


def _bifusion_kernel(H, W, C,
                     ti_ref, ci_ref,
                     wca1_ref, bca1_ref, wca2_ref, bca2_ref, wca3_ref, bca3_ref,
                     wsa_ref, bsa_ref, wres1_ref, wres2_ref, wfold_ref,
                     rscale_ref, rbias_ref,
                     o_ref):
    """One grid step == one batch sample.

    ti_ref / ci_ref : (1, H, W, C) unpadded NHWC inputs (compute dtype).
    wca*/bca*       : channel-attention 1x1 convs, (C, C) / (1, C) f32.
    wsa / bsa       : spatial-attention 3x3 conv(2->1) as (18, 1) / (1, 1) f32.
    wres1 / wres2   : residual 1x1 weight slices for the t3 / c5 branches, (C, C) each.
    wfold           : fusion-conv weights per ky, kx-blocks along K, pre-multiplied by
                      the residual 1x1 slice of the fi branch, (3, 3C, C).
    rscale / rbias  : folded BatchNorm (+ residual & fusion biases), (1, C) f32.
    """
    f32 = jnp.float32
    HW = H * W
    dt = ti_ref.dtype

    ti = ti_ref[0]                                   # (H, W, C)
    ci = ci_ref[0]
    ti_flat = ti.reshape(HW, C)
    ci_flat = ci.reshape(HW, C)

    # ---- Channel attention on ti: global avg pool + TripleConv (1x1, no BN since the
    #      pooled map is 1x1) + sigmoid ----
    g = jnp.mean(ti_flat.astype(f32), axis=0, keepdims=True)                      # (1, C)
    h = jnp.maximum(jnp.dot(g, wca1_ref[...], preferred_element_type=f32) + bca1_ref[...], 0.0) + g
    h = jnp.maximum(jnp.dot(h, wca2_ref[...], preferred_element_type=f32) + bca2_ref[...], 0.0) + g
    h = jnp.maximum(jnp.dot(h, wca3_ref[...], preferred_element_type=f32) + bca3_ref[...], 0.0)
    att = _sigmoid(h)                                                              # (1, C) f32

    # ---- Residual branch 1 (accumulated immediately): t3 = att * ti ----
    t3 = (ti_flat * att).astype(dt)
    y = jnp.dot(t3, wres1_ref[...], preferred_element_type=f32)                    # (HW, C) f32

    # ---- Spatial attention on ci: channel max/mean pools packed along the lane dim,
    #      3x3 conv(2->1) as one (HW, 18) @ (18, 1) matmul, then sigmoid ----
    pool = jnp.concatenate(
        [jnp.max(ci, axis=-1, keepdims=True).astype(f32),
         jnp.mean(ci.astype(f32), axis=-1, keepdims=True)], axis=-1)               # (H, W, 2)
    pool_pad = _zero_pad_hw(pool)                                                  # (H+2, W+2, 2)
    taps = jnp.concatenate(
        [pool_pad[ky:ky + H, kx:kx + W, :] for ky in range(3) for kx in range(3)],
        axis=-1).reshape(HW, 18)                                                   # (HW, 18)
    sig = _sigmoid(jnp.dot(taps, wsa_ref[...], preferred_element_type=f32)
                   + bsa_ref[...])                                                 # (HW, 1)

    # ---- Residual branch 2: c5 = sig * ci ----
    c5 = (ci_flat * sig).astype(dt)
    y = y + jnp.dot(c5, wres2_ref[...], preferred_element_type=f32)

    # ---- Residual branch 3: 3x3 fusion conv on ti*ci with the fi residual slice folded
    #      into the weights; 3 MXU matmuls with K = 3C (kx-shifts concatenated). ----
    prod_pad = _zero_pad_hw(ti * ci)                                               # (H+2, W+2, C)
    big = jnp.concatenate(
        [prod_pad[:, 0:W, :], prod_pad[:, 1:W + 1, :], prod_pad[:, 2:W + 2, :]],
        axis=-1)                                                                   # (H+2, W, 3C)
    for ky in range(3):
        patch = big[ky:ky + H].reshape(HW, 3 * C)
        y = y + jnp.dot(patch, wfold_ref[ky], preferred_element_type=f32)

    # ---- Folded BatchNorm (eval mode) + conv/fusion biases + ReLU ----
    out = jnp.maximum(y * rscale_ref[...] + rbias_ref[...], 0.0)
    o_ref[0] = out.reshape(H, W, C).astype(o_ref.dtype)


def bifusion_forward(ti_nchw, ci_nchw, kparams, compute_dtype=jnp.float32):
    """Wrapper: NCHW in, NCHW out (matches the PyTorch module)."""
    N, C, H, W = ti_nchw.shape
    (wca1, bca1, wca2, bca2, wca3, bca3,
     wsa, bsa, wres1, wres2, wfold, rscale, rbias) = kparams

    dt = compute_dtype
    # NCHW -> NHWC; no HBM-side zero-padding pass (halo is built inside the kernel).
    ti = jnp.transpose(ti_nchw, (0, 2, 3, 1)).astype(dt)
    ci = jnp.transpose(ci_nchw, (0, 2, 3, 1)).astype(dt)
    wres1 = wres1.astype(dt)
    wres2 = wres2.astype(dt)
    wfold = wfold.astype(dt)

    img_spec = pl.BlockSpec((1, H, W, C), lambda n: (n, 0, 0, 0))

    def full_spec(shape):
        nd = len(shape)
        return pl.BlockSpec(shape, lambda n, _nd=nd: (0,) * _nd)

    kernel = functools.partial(_bifusion_kernel, H, W, C)
    out_nhwc = pl.pallas_call(
        kernel,
        out_shape=jax.ShapeDtypeStruct((N, H, W, C), dt),
        grid=(N,),
        in_specs=[
            img_spec, img_spec,
            full_spec((C, C)), full_spec((1, C)),
            full_spec((C, C)), full_spec((1, C)),
            full_spec((C, C)), full_spec((1, C)),
            full_spec((18, 1)), full_spec((1, 1)),
            full_spec((C, C)), full_spec((C, C)),
            full_spec((3, 3 * C, C)),
            full_spec((1, C)), full_spec((1, C)),
        ],
        out_specs=pl.BlockSpec((1, H, W, C), lambda n: (n, 0, 0, 0)),
        compiler_params=pltpu.CompilerParams(
            dimension_semantics=("parallel",),
            vmem_limit_bytes=48 * 1024 * 1024,
        ),
    )(ti, ci, wca1, bca1, wca2, bca2, wca3, bca3,
      wsa, bsa, wres1, wres2, wfold, rscale, rbias)
    return jnp.transpose(out_nhwc, (0, 3, 1, 2)).astype(ti_nchw.dtype)


def init_params(key, C):
    """Deterministic parameters in PyTorch layouts (OIHW conv weights, etc.)."""
    ks = jax.random.split(key, 16)
    nrm = lambda k, shape, s=0.1: jax.random.normal(k, shape, dtype=jnp.float32) * s
    p = {}
    p["ca_w1"] = nrm(ks[0], (C, C, 1, 1));  p["ca_b1"] = nrm(ks[1], (C,))
    p["ca_w2"] = nrm(ks[2], (C, C, 1, 1));  p["ca_b2"] = nrm(ks[3], (C,))
    p["ca_w3"] = nrm(ks[4], (C, C, 1, 1));  p["ca_b3"] = nrm(ks[5], (C,))
    p["sa_w"] = nrm(ks[6], (1, 2, 3, 3));   p["sa_b"] = nrm(ks[7], (1,))
    p["fu_w"] = nrm(ks[8], (C, C, 3, 3));   p["fu_b"] = nrm(ks[9], (C,))
    p["re_w"] = nrm(ks[10], (C, 3 * C, 1, 1)); p["re_b"] = nrm(ks[11], (C,))
    p["bn_g"] = 1.0 + nrm(ks[12], (C,))
    p["bn_b"] = nrm(ks[13], (C,))
    p["bn_m"] = nrm(ks[14], (C,))
    p["bn_v"] = jnp.abs(nrm(ks[15], (C,))) + 1.0
    return p


def pack_kernel_params(p, C, eps=_BN_EPS):
    """Convert PyTorch-layout params to the folded layouts the kernel consumes."""
    f32 = jnp.float32
    # channel-attention 1x1 convs as (Cin, Cout) matrices + (1, C) biases
    wca1 = p["ca_w1"][:, :, 0, 0].T.astype(f32)
    wca2 = p["ca_w2"][:, :, 0, 0].T.astype(f32)
    wca3 = p["ca_w3"][:, :, 0, 0].T.astype(f32)
    bca1 = p["ca_b1"].reshape(1, C).astype(f32)
    bca2 = p["ca_b2"].reshape(1, C).astype(f32)
    bca3 = p["ca_b3"].reshape(1, C).astype(f32)
    # spatial-attention conv (1, 2, 3, 3): rows ordered (ky, kx, channel[max, mean])
    wsa = jnp.transpose(p["sa_w"][0], (1, 2, 0)).reshape(18, 1).astype(f32)
    bsa = p["sa_b"].reshape(1, 1).astype(f32)
    # residual 1x1 conv, input-major (3C, C); split t3 / c5 slices vs fi slice
    wres_full = p["re_w"][:, :, 0, 0].T                      # (3C, C)
    wres1 = wres_full[:C]                                    # (C, C) -> t3 branch
    wres2 = wres_full[C:2 * C]                               # (C, C) -> c5 branch
    wres3 = wres_full[2 * C:]                                # (C, C) -> fi branch (folded)
    # fusion 3x3 conv folded with the fi residual slice; per ky, kx-blocks along K
    wfold = jnp.stack([
        jnp.concatenate([p["fu_w"][:, :, ky, kx].T @ wres3 for kx in range(3)], axis=0)
        for ky in range(3)], axis=0)                         # (3, 3C, C)
    # BatchNorm (eval mode) folded with the residual conv bias and the fusion bias
    scale = p["bn_g"] / jnp.sqrt(p["bn_v"] + eps)
    b_eff = p["re_b"] + (p["fu_b"].reshape(1, C) @ wres3).reshape(C)
    rscale = scale.reshape(1, C).astype(f32)
    rbias = (p["bn_b"] + (b_eff - p["bn_m"]) * scale).reshape(1, C).astype(f32)
    return (wca1, bca1, wca2, bca2, wca3, bca3, wsa, bsa,
            wres1, wres2, wfold, rscale, rbias)


def reference_forward(ti, ci, p, eps=_BN_EPS):
    """Pure-JAX NCHW reference mirroring the PyTorch forward (BN in eval mode)."""
    N, C, H, W = ti.shape
    sigmoid, relu = jax.nn.sigmoid, jax.nn.relu
    dn = ("NCHW", "OIHW", "NCHW")

    def lin1x1(x, w, b):                     # x: (N,C,1,1), w: (Cout,Cin,1,1)
        xf = x[:, :, 0, 0]
        return (xf @ w[:, :, 0, 0].T + b)[:, :, None, None]

    # channel attention (TripleConv skips its BNs because the pooled map is 1x1)
    g = jnp.mean(ti, axis=(2, 3), keepdims=True)
    h = relu(lin1x1(g, p["ca_w1"], p["ca_b1"])); h = h + g
    h = relu(lin1x1(h, p["ca_w2"], p["ca_b2"])); h = h + g
    h = relu(lin1x1(h, p["ca_w3"], p["ca_b3"]))
    t3 = sigmoid(h) * ti
    # spatial attention
    c1 = jnp.max(ci, axis=1, keepdims=True)
    c2 = jnp.mean(ci, axis=1, keepdims=True)
    c3 = jnp.concatenate([c1, c2], axis=1)
    c4 = lax.conv_general_dilated(c3, p["sa_w"], (1, 1), "SAME", dimension_numbers=dn)
    c4 = c4 + p["sa_b"].reshape(1, 1, 1, 1)
    c5 = sigmoid(c4) * ci
    # fusion
    fi = lax.conv_general_dilated(ti * ci, p["fu_w"], (1, 1), "SAME", dimension_numbers=dn)
    fi = fi + p["fu_b"].reshape(1, C, 1, 1)
    # residual head
    cat = jnp.concatenate([t3, c5, fi], axis=1)
    y = lax.conv_general_dilated(cat, p["re_w"], (1, 1), "SAME", dimension_numbers=dn)
    y = y + p["re_b"].reshape(1, C, 1, 1)
    y = (y - p["bn_m"].reshape(1, C, 1, 1)) / jnp.sqrt(p["bn_v"].reshape(1, C, 1, 1) + eps)
    y = y * p["bn_g"].reshape(1, C, 1, 1) + p["bn_b"].reshape(1, C, 1, 1)
    return relu(y)


if __name__ == "__main__":
    key = jax.random.PRNGKey(0)
    kti, kci, kp = jax.random.split(key, 3)
    N, C, H, W = 2, 4, 16, 16
    ti = jax.random.normal(kti, (N, C, H, W), dtype=jnp.float32)
    ci = jax.random.normal(kci, (N, C, H, W), dtype=jnp.float32)

    params = init_params(kp, C)
    kparams = pack_kernel_params(params, C)

    fwd = jax.jit(functools.partial(bifusion_forward, compute_dtype=jnp.float32))
    out = jax.block_until_ready(fwd(ti, ci, kparams))

    ref = jax.block_until_ready(reference_forward(ti, ci, params))
    # Both sides run f32 matmuls/convs at TPU default MXU precision (bf16 passes, f32
    # accumulation) with different summation groupings (kernel folds fi into the
    # residual weights), so allow ~1e-3-scale slack; structural errors would be O(0.1+).
    np.testing.assert_allclose(np.asarray(out), np.asarray(ref), rtol=1e-2, atol=1e-2)

    print("KERNEL_OK")
</pallas_src>

<mosaic_0001>
module attributes {stable_mosaic.version = 11 : i64} {
  func.func @_bifusion_kernel(%arg0: i32, %arg1: memref<1x16x16x4xf32, #tpu.memory_space<vmem>>, %arg2: memref<1x16x16x4xf32, #tpu.memory_space<vmem>>, %arg3: memref<4x4xf32, #tpu.memory_space<vmem>>, %arg4: memref<1x4xf32, #tpu.memory_space<vmem>>, %arg5: memref<4x4xf32, #tpu.memory_space<vmem>>, %arg6: memref<1x4xf32, #tpu.memory_space<vmem>>, %arg7: memref<4x4xf32, #tpu.memory_space<vmem>>, %arg8: memref<1x4xf32, #tpu.memory_space<vmem>>, %arg9: memref<18x1xf32, #tpu.memory_space<vmem>>, %arg10: memref<1x1xf32, #tpu.memory_space<vmem>>, %arg11: memref<4x4xf32, #tpu.memory_space<vmem>>, %arg12: memref<4x4xf32, #tpu.memory_space<vmem>>, %arg13: memref<3x12x4xf32, #tpu.memory_space<vmem>>, %arg14: memref<1x4xf32, #tpu.memory_space<vmem>>, %arg15: memref<1x4xf32, #tpu.memory_space<vmem>>, %arg16: memref<1x16x16x4xf32, #tpu.memory_space<vmem>>) attributes {dimension_semantics = [#tpu.dimension_semantics<parallel>], iteration_bounds = array<i64: 2>, scalar_prefetch = 0 : i64, scratch_operands = 0 : i64, tpu.core_type = #tpu.core_type<tc>, window_params = [{transform_indices = @transform_0, window_bounds = array<i64: 1, 16, 16, 4>}, {transform_indices = @transform_1, window_bounds = array<i64: 1, 16, 16, 4>}, {pipeline_mode = #tpu.pipeline_mode<synchronous>, transform_indices = @transform_2, window_bounds = array<i64: 4, 4>}, {pipeline_mode = #tpu.pipeline_mode<synchronous>, transform_indices = @transform_3, window_bounds = array<i64: 1, 4>}, {pipeline_mode = #tpu.pipeline_mode<synchronous>, transform_indices = @transform_4, window_bounds = array<i64: 4, 4>}, {pipeline_mode = #tpu.pipeline_mode<synchronous>, transform_indices = @transform_5, window_bounds = array<i64: 1, 4>}, {pipeline_mode = #tpu.pipeline_mode<synchronous>, transform_indices = @transform_6, window_bounds = array<i64: 4, 4>}, {pipeline_mode = #tpu.pipeline_mode<synchronous>, transform_indices = @transform_7, window_bounds = array<i64: 1, 4>}, {pipeline_mode = #tpu.pipeline_mode<synchronous>, transform_indices = @transform_8, window_bounds = array<i64: 18, 1>}, {pipeline_mode = #tpu.pipeline_mode<synchronous>, transform_indices = @transform_9, window_bounds = array<i64: 1, 1>}, {pipeline_mode = #tpu.pipeline_mode<synchronous>, transform_indices = @transform_10, window_bounds = array<i64: 4, 4>}, {pipeline_mode = #tpu.pipeline_mode<synchronous>, transform_indices = @transform_11, window_bounds = array<i64: 4, 4>}, {pipeline_mode = #tpu.pipeline_mode<synchronous>, transform_indices = @transform_12, window_bounds = array<i64: 3, 12, 4>}, {pipeline_mode = #tpu.pipeline_mode<synchronous>, transform_indices = @transform_13, window_bounds = array<i64: 1, 4>}, {pipeline_mode = #tpu.pipeline_mode<synchronous>, transform_indices = @transform_14, window_bounds = array<i64: 1, 4>}, {transform_indices = @transform_15, window_bounds = array<i64: 1, 16, 16, 4>}]} {
    %c0 = arith.constant 0 : index
    %c0_0 = arith.constant 0 : index
    %c0_1 = arith.constant 0 : index
    %c0_2 = arith.constant 0 : index
    %0 = vector.load %arg1[%c0, %c0_0, %c0_1, %c0_2] : memref<1x16x16x4xf32, #tpu.memory_space<vmem>>, vector<1x16x16x4xf32>
    %1 = vector.shape_cast %0 : vector<1x16x16x4xf32> to vector<16x16x4xf32>
    %c0_3 = arith.constant 0 : index
    %c0_4 = arith.constant 0 : index
    %c0_5 = arith.constant 0 : index
    %c0_6 = arith.constant 0 : index
    %2 = vector.load %arg2[%c0_3, %c0_4, %c0_5, %c0_6] : memref<1x16x16x4xf32, #tpu.memory_space<vmem>>, vector<1x16x16x4xf32>
    %3 = vector.shape_cast %2 : vector<1x16x16x4xf32> to vector<16x16x4xf32>
    %4 = vector.shape_cast %1 : vector<16x16x4xf32> to vector<256x4xf32>
    %5 = vector.shape_cast %3 : vector<16x16x4xf32> to vector<256x4xf32>
    %cst = arith.constant dense<0.000000e+00> : vector<4xf32>
    %6 = vector.multi_reduction <add>, %4, %cst [0] : vector<256x4xf32> to vector<4xf32>
    %7 = vector.shape_cast %6 : vector<4xf32> to vector<1x4xf32>
    %cst_7 = arith.constant 2.560000e+02 : f32
    %8 = vector.broadcast %cst_7 : f32 to vector<1x4xf32>
    %9 = arith.divf %7, %8 : vector<1x4xf32>
    %c0_8 = arith.constant 0 : index
    %c0_9 = arith.constant 0 : index
    %10 = vector.load %arg3[%c0_8, %c0_9] : memref<4x4xf32, #tpu.memory_space<vmem>>, vector<4x4xf32>
    %cst_10 = arith.constant dense<0.000000e+00> : vector<1x4xf32>
    %11 = tpu.matmul %9, %10, %cst_10 {dimension_numbers = #tpu.dot_dimension_numbers<[1], [0], [0], [1], [0, 0, 1, 1], [], []>} : vector<1x4xf32>, vector<4x4xf32>, vector<1x4xf32> -> vector<1x4xf32>
    %c0_11 = arith.constant 0 : index
    %c0_12 = arith.constant 0 : index
    %12 = vector.load %arg4[%c0_11, %c0_12] : memref<1x4xf32, #tpu.memory_space<vmem>>, vector<1x4xf32>
    %13 = arith.addf %11, %12 : vector<1x4xf32>
    %cst_13 = arith.constant 0.000000e+00 : f32
    %14 = vector.broadcast %cst_13 : f32 to vector<1x4xf32>
    %15 = arith.maximumf %13, %14 : vector<1x4xf32>
    %16 = arith.addf %15, %9 : vector<1x4xf32>
    %c0_14 = arith.constant 0 : index
    %c0_15 = arith.constant 0 : index
    %17 = vector.load %arg5[%c0_14, %c0_15] : memref<4x4xf32, #tpu.memory_space<vmem>>, vector<4x4xf32>
    %cst_16 = arith.constant dense<0.000000e+00> : vector<1x4xf32>
    %18 = tpu.matmul %16, %17, %cst_16 {dimension_numbers = #tpu.dot_dimension_numbers<[1], [0], [0], [1], [0, 0, 1, 1], [], []>} : vector<1x4xf32>, vector<4x4xf32>, vector<1x4xf32> -> vector<1x4xf32>
    %c0_17 = arith.constant 0 : index
    %c0_18 = arith.constant 0 : index
    %19 = vector.load %arg6[%c0_17, %c0_18] : memref<1x4xf32, #tpu.memory_space<vmem>>, vector<1x4xf32>
    %20 = arith.addf %18, %19 : vector<1x4xf32>
    %cst_19 = arith.constant 0.000000e+00 : f32
    %21 = vector.broadcast %cst_19 : f32 to vector<1x4xf32>
    %22 = arith.maximumf %20, %21 : vector<1x4xf32>
    %23 = arith.addf %22, %9 : vector<1x4xf32>
    %c0_20 = arith.constant 0 : index
    %c0_21 = arith.constant 0 : index
    %24 = vector.load %arg7[%c0_20, %c0_21] : memref<4x4xf32, #tpu.memory_space<vmem>>, vector<4x4xf32>
    %cst_22 = arith.constant dense<0.000000e+00> : vector<1x4xf32>
    %25 = tpu.matmul %23, %24, %cst_22 {dimension_numbers = #tpu.dot_dimension_numbers<[1], [0], [0], [1], [0, 0, 1, 1], [], []>} : vector<1x4xf32>, vector<4x4xf32>, vector<1x4xf32> -> vector<1x4xf32>
    %c0_23 = arith.constant 0 : index
    %c0_24 = arith.constant 0 : index
    %26 = vector.load %arg8[%c0_23, %c0_24] : memref<1x4xf32, #tpu.memory_space<vmem>>, vector<1x4xf32>
    %27 = arith.addf %25, %26 : vector<1x4xf32>
    %cst_25 = arith.constant 0.000000e+00 : f32
    %28 = vector.broadcast %cst_25 : f32 to vector<1x4xf32>
    %29 = arith.maximumf %27, %28 : vector<1x4xf32>
    %cst_26 = arith.constant 5.000000e-01 : f32
    %30 = vector.broadcast %cst_26 : f32 to vector<1x4xf32>
    %31 = arith.mulf %30, %29 : vector<1x4xf32>
    %32 = math.tanh %31 : vector<1x4xf32>
    %cst_27 = arith.constant 5.000000e-01 : f32
    %33 = vector.broadcast %cst_27 : f32 to vector<1x4xf32>
    %34 = arith.mulf %33, %32 : vector<1x4xf32>
    %cst_28 = arith.constant 5.000000e-01 : f32
    %35 = vector.broadcast %cst_28 : f32 to vector<1x4xf32>
    %36 = arith.addf %34, %35 : vector<1x4xf32>
    %37 = vector.broadcast %36 : vector<1x4xf32> to vector<256x4xf32>
    %38 = arith.mulf %4, %37 : vector<256x4xf32>
    %c0_29 = arith.constant 0 : index
    %c0_30 = arith.constant 0 : index
    %39 = vector.load %arg11[%c0_29, %c0_30] : memref<4x4xf32, #tpu.memory_space<vmem>>, vector<4x4xf32>
    %cst_31 = arith.constant dense<0.000000e+00> : vector<256x4xf32>
    %40 = tpu.matmul %38, %39, %cst_31 {dimension_numbers = #tpu.dot_dimension_numbers<[1], [0], [0], [1], [0, 0, 1, 1], [], []>} : vector<256x4xf32>, vector<4x4xf32>, vector<256x4xf32> -> vector<256x4xf32>
    %cst_32 = arith.constant dense<0xFF800000> : vector<16x16xf32>
    %41 = vector.multi_reduction <maximumf>, %3, %cst_32 [2] : vector<16x16x4xf32> to vector<16x16xf32>
    %42 = vector.shape_cast %41 : vector<16x16xf32> to vector<16x16x1xf32>
    %cst_33 = arith.constant dense<0.000000e+00> : vector<16x16xf32>
    %43 = vector.multi_reduction <add>, %3, %cst_33 [2] : vector<16x16x4xf32> to vector<16x16xf32>
    %44 = vector.shape_cast %43 : vector<16x16xf32> to vector<16x16x1xf32>
    %cst_34 = arith.constant 4.000000e+00 : f32
    %45 = vector.broadcast %cst_34 : f32 to vector<16x16x1xf32>
    %46 = arith.divf %44, %45 : vector<16x16x1xf32>
    %47 = tpu.concatenate %42, %46 in 2 : vector<16x16x1xf32>, vector<16x16x1xf32> -> vector<16x16x2xf32>
    %cst_35 = arith.constant 0.000000e+00 : f32
    %48 = vector.broadcast %cst_35 : f32 to vector<16x1x2xf32>
    %49 = tpu.concatenate %48, %47, %48 in 1 : vector<16x1x2xf32>, vector<16x16x2xf32>, vector<16x1x2xf32> -> vector<16x18x2xf32>
    %cst_36 = arith.constant 0.000000e+00 : f32
    %50 = vector.broadcast %cst_36 : f32 to vector<1x18x2xf32>
    %51 = tpu.concatenate %50, %49, %50 in 0 : vector<1x18x2xf32>, vector<16x18x2xf32>, vector<1x18x2xf32> -> vector<18x18x2xf32>
    %52 = vector.extract_strided_slice %51 {offsets = [0, 0, 0], sizes = [16, 16, 2], strides = [1, 1, 1]} : vector<18x18x2xf32> to vector<16x16x2xf32>
    %53 = vector.extract_strided_slice %51 {offsets = [0, 1, 0], sizes = [16, 16, 2], strides = [1, 1, 1]} : vector<18x18x2xf32> to vector<16x16x2xf32>
    %54 = vector.extract_strided_slice %51 {offsets = [0, 2, 0], sizes = [16, 16, 2], strides = [1, 1, 1]} : vector<18x18x2xf32> to vector<16x16x2xf32>
    %55 = vector.extract_strided_slice %51 {offsets = [1, 0, 0], sizes = [16, 16, 2], strides = [1, 1, 1]} : vector<18x18x2xf32> to vector<16x16x2xf32>
    %56 = vector.extract_strided_slice %51 {offsets = [1, 1, 0], sizes = [16, 16, 2], strides = [1, 1, 1]} : vector<18x18x2xf32> to vector<16x16x2xf32>
    %57 = vector.extract_strided_slice %51 {offsets = [1, 2, 0], sizes = [16, 16, 2], strides = [1, 1, 1]} : vector<18x18x2xf32> to vector<16x16x2xf32>
    %58 = vector.extract_strided_slice %51 {offsets = [2, 0, 0], sizes = [16, 16, 2], strides = [1, 1, 1]} : vector<18x18x2xf32> to vector<16x16x2xf32>
    %59 = vector.extract_strided_slice %51 {offsets = [2, 1, 0], sizes = [16, 16, 2], strides = [1, 1, 1]} : vector<18x18x2xf32> to vector<16x16x2xf32>
    %60 = vector.extract_strided_slice %51 {offsets = [2, 2, 0], sizes = [16, 16, 2], strides = [1, 1, 1]} : vector<18x18x2xf32> to vector<16x16x2xf32>
    %61 = tpu.concatenate %52, %53, %54, %55, %56, %57, %58, %59, %60 in 2 : vector<16x16x2xf32>, vector<16x16x2xf32>, vector<16x16x2xf32>, vector<16x16x2xf32>, vector<16x16x2xf32>, vector<16x16x2xf32>, vector<16x16x2xf32>, vector<16x16x2xf32>, vector<16x16x2xf32> -> vector<16x16x18xf32>
    %62 = vector.shape_cast %61 : vector<16x16x18xf32> to vector<256x18xf32>
    %c0_37 = arith.constant 0 : index
    %c0_38 = arith.constant 0 : index
    %63 = vector.load %arg9[%c0_37, %c0_38] : memref<18x1xf32, #tpu.memory_space<vmem>>, vector<18x1xf32>
    %cst_39 = arith.constant dense<0.000000e+00> : vector<256x1xf32>
    %64 = tpu.matmul %62, %63, %cst_39 {dimension_numbers = #tpu.dot_dimension_numbers<[1], [0], [0], [1], [0, 0, 1, 1], [], []>} : vector<256x18xf32>, vector<18x1xf32>, vector<256x1xf32> -> vector<256x1xf32>
    %c0_40 = arith.constant 0 : index
    %c0_41 = arith.constant 0 : index
    %65 = vector.load %arg10[%c0_40, %c0_41] : memref<1x1xf32, #tpu.memory_space<vmem>>, vector<1x1xf32>
    %66 = vector.broadcast %65 : vector<1x1xf32> to vector<256x1xf32>
    %67 = arith.addf %64, %66 : vector<256x1xf32>
    %cst_42 = arith.constant 5.000000e-01 : f32
    %68 = vector.broadcast %cst_42 : f32 to vector<256x1xf32>
    %69 = arith.mulf %68, %67 : vector<256x1xf32>
    %70 = math.tanh %69 : vector<256x1xf32>
    %cst_43 = arith.constant 5.000000e-01 : f32
    %71 = vector.broadcast %cst_43 : f32 to vector<256x1xf32>
    %72 = arith.mulf %71, %70 : vector<256x1xf32>
    %cst_44 = arith.constant 5.000000e-01 : f32
    %73 = vector.broadcast %cst_44 : f32 to vector<256x1xf32>
    %74 = arith.addf %72, %73 : vector<256x1xf32>
    %75 = vector.broadcast %74 : vector<256x1xf32> to vector<256x4xf32>
    %76 = arith.mulf %5, %75 : vector<256x4xf32>
    %c0_45 = arith.constant 0 : index
    %c0_46 = arith.constant 0 : index
    %77 = vector.load %arg12[%c0_45, %c0_46] : memref<4x4xf32, #tpu.memory_space<vmem>>, vector<4x4xf32>
    %cst_47 = arith.constant dense<0.000000e+00> : vector<256x4xf32>
    %78 = tpu.matmul %76, %77, %cst_47 {dimension_numbers = #tpu.dot_dimension_numbers<[1], [0], [0], [1], [0, 0, 1, 1], [], []>} : vector<256x4xf32>, vector<4x4xf32>, vector<256x4xf32> -> vector<256x4xf32>
    %79 = arith.addf %40, %78 : vector<256x4xf32>
    %80 = arith.mulf %1, %3 : vector<16x16x4xf32>
    %cst_48 = arith.constant 0.000000e+00 : f32
    %81 = vector.broadcast %cst_48 : f32 to vector<16x1x4xf32>
    %82 = tpu.concatenate %81, %80, %81 in 1 : vector<16x1x4xf32>, vector<16x16x4xf32>, vector<16x1x4xf32> -> vector<16x18x4xf32>
    %cst_49 = arith.constant 0.000000e+00 : f32
    %83 = vector.broadcast %cst_49 : f32 to vector<1x18x4xf32>
    %84 = tpu.concatenate %83, %82, %83 in 0 : vector<1x18x4xf32>, vector<16x18x4xf32>, vector<1x18x4xf32> -> vector<18x18x4xf32>
    %85 = vector.extract_strided_slice %84 {offsets = [0, 0, 0], sizes = [18, 16, 4], strides = [1, 1, 1]} : vector<18x18x4xf32> to vector<18x16x4xf32>
    %86 = vector.extract_strided_slice %84 {offsets = [0, 1, 0], sizes = [18, 16, 4], strides = [1, 1, 1]} : vector<18x18x4xf32> to vector<18x16x4xf32>
    %87 = vector.extract_strided_slice %84 {offsets = [0, 2, 0], sizes = [18, 16, 4], strides = [1, 1, 1]} : vector<18x18x4xf32> to vector<18x16x4xf32>
    %88 = tpu.concatenate %85, %86, %87 in 2 : vector<18x16x4xf32>, vector<18x16x4xf32>, vector<18x16x4xf32> -> vector<18x16x12xf32>
    %89 = vector.extract_strided_slice %88 {offsets = [0, 0, 0], sizes = [16, 16, 12], strides = [1, 1, 1]} : vector<18x16x12xf32> to vector<16x16x12xf32>
    %90 = vector.shape_cast %89 : vector<16x16x12xf32> to vector<256x12xf32>
    %c0_50 = arith.constant 0 : index
    %c0_51 = arith.constant 0 : index
    %c0_52 = arith.constant 0 : index
    %91 = vector.load %arg13[%c0_50, %c0_51, %c0_52] : memref<3x12x4xf32, #tpu.memory_space<vmem>>, vector<1x12x4xf32>
    %92 = vector.shape_cast %91 : vector<1x12x4xf32> to vector<12x4xf32>
    %cst_53 = arith.constant dense<0.000000e+00> : vector<256x4xf32>
    %93 = tpu.matmul %90, %92, %cst_53 {dimension_numbers = #tpu.dot_dimension_numbers<[1], [0], [0], [1], [0, 0, 1, 1], [], []>} : vector<256x12xf32>, vector<12x4xf32>, vector<256x4xf32> -> vector<256x4xf32>
    %94 = arith.addf %79, %93 : vector<256x4xf32>
    %95 = vector.extract_strided_slice %88 {offsets = [1, 0, 0], sizes = [16, 16, 12], strides = [1, 1, 1]} : vector<18x16x12xf32> to vector<16x16x12xf32>
    %96 = vector.shape_cast %95 : vector<16x16x12xf32> to vector<256x12xf32>
    %c1 = arith.constant 1 : index
    %c0_54 = arith.constant 0 : index
    %c0_55 = arith.constant 0 : index
    %97 = vector.load %arg13[%c1, %c0_54, %c0_55] : memref<3x12x4xf32, #tpu.memory_space<vmem>>, vector<1x12x4xf32>
    %98 = vector.shape_cast %97 : vector<1x12x4xf32> to vector<12x4xf32>
    %cst_56 = arith.constant dense<0.000000e+00> : vector<256x4xf32>
    %99 = tpu.matmul %96, %98, %cst_56 {dimension_numbers = #tpu.dot_dimension_numbers<[1], [0], [0], [1], [0, 0, 1, 1], [], []>} : vector<256x12xf32>, vector<12x4xf32>, vector<256x4xf32> -> vector<256x4xf32>
    %100 = arith.addf %94, %99 : vector<256x4xf32>
    %101 = vector.extract_strided_slice %88 {offsets = [2, 0, 0], sizes = [16, 16, 12], strides = [1, 1, 1]} : vector<18x16x12xf32> to vector<16x16x12xf32>
    %102 = vector.shape_cast %101 : vector<16x16x12xf32> to vector<256x12xf32>
    %c2 = arith.constant 2 : index
    %c0_57 = arith.constant 0 : index
    %c0_58 = arith.constant 0 : index
    %103 = vector.load %arg13[%c2, %c0_57, %c0_58] : memref<3x12x4xf32, #tpu.memory_space<vmem>>, vector<1x12x4xf32>
    %104 = vector.shape_cast %103 : vector<1x12x4xf32> to vector<12x4xf32>
    %cst_59 = arith.constant dense<0.000000e+00> : vector<256x4xf32>
    %105 = tpu.matmul %102, %104, %cst_59 {dimension_numbers = #tpu.dot_dimension_numbers<[1], [0], [0], [1], [0, 0, 1, 1], [], []>} : vector<256x12xf32>, vector<12x4xf32>, vector<256x4xf32> -> vector<256x4xf32>
    %106 = arith.addf %100, %105 : vector<256x4xf32>
    %c0_60 = arith.constant 0 : index
    %c0_61 = arith.constant 0 : index
    %107 = vector.load %arg14[%c0_60, %c0_61] : memref<1x4xf32, #tpu.memory_space<vmem>>, vector<1x4xf32>
    %108 = vector.broadcast %107 : vector<1x4xf32> to vector<256x4xf32>
    %109 = arith.mulf %106, %108 : vector<256x4xf32>
    %c0_62 = arith.constant 0 : index
    %c0_63 = arith.constant 0 : index
    %110 = vector.load %arg15[%c0_62, %c0_63] : memref<1x4xf32, #tpu.memory_space<vmem>>, vector<1x4xf32>
    %111 = vector.broadcast %110 : vector<1x4xf32> to vector<256x4xf32>
    %112 = arith.addf %109, %111 : vector<256x4xf32>
    %cst_64 = arith.constant 0.000000e+00 : f32
    %113 = vector.broadcast %cst_64 : f32 to vector<256x4xf32>
    %114 = arith.maximumf %112, %113 : vector<256x4xf32>
    %115 = vector.shape_cast %114 : vector<256x4xf32> to vector<16x16x4xf32>
    %c0_65 = arith.constant 0 : index
    %c0_66 = arith.constant 0 : index
    %c0_67 = arith.constant 0 : index
    %c0_68 = arith.constant 0 : index
    %116 = vector.load %arg16[%c0_65, %c0_66, %c0_67, %c0_68] : memref<1x16x16x4xf32, #tpu.memory_space<vmem>>, vector<1x16x16x4xf32>
    %117 = vector.shape_cast %116 : vector<1x16x16x4xf32> to vector<16x16x4xf32>
    %118 = vector.shape_cast %115 : vector<16x16x4xf32> to vector<1x16x16x4xf32>
    tpu.vector_store %arg16[%c0_65, %c0_66, %c0_67, %c0_68], %118 {strides = array<i32>} : memref<1x16x16x4xf32, #tpu.memory_space<vmem>>, vector<1x16x16x4xf32>,
    return
  }
  func.func @transform_0(%arg0: i32) -> (i32, i32, i32, i32) {
    %c0_i32 = arith.constant 0 : i32
    %c0_i32_0 = arith.constant 0 : i32
    %c0_i32_1 = arith.constant 0 : i32
    %c0_i32_2 = arith.constant 0 : i32
    return %arg0, %c0_i32, %c0_i32_0, %c0_i32_1 : i32, i32, i32, i32
  }
  func.func @transform_1(%arg0: i32) -> (i32, i32, i32, i32) {
    %c0_i32 = arith.constant 0 : i32
    %c0_i32_0 = arith.constant 0 : i32
    %c0_i32_1 = arith.constant 0 : i32
    %c0_i32_2 = arith.constant 0 : i32
    return %arg0, %c0_i32, %c0_i32_0, %c0_i32_1 : i32, i32, i32, i32
  }
  func.func @transform_2(%arg0: i32) -> (i32, i32) {
    %c0_i32 = arith.constant 0 : i32
    %c0_i32_0 = arith.constant 0 : i32
    %c0_i32_1 = arith.constant 0 : i32
    return %c0_i32, %c0_i32_0 : i32, i32
  }
  func.func @transform_3(%arg0: i32) -> (i32, i32) {
    %c0_i32 = arith.constant 0 : i32
    %c0_i32_0 = arith.constant 0 : i32
    %c0_i32_1 = arith.constant 0 : i32
    return %c0_i32, %c0_i32_0 : i32, i32
  }
  func.func @transform_4(%arg0: i32) -> (i32, i32) {
    %c0_i32 = arith.constant 0 : i32
    %c0_i32_0 = arith.constant 0 : i32
    %c0_i32_1 = arith.constant 0 : i32
    return %c0_i32, %c0_i32_0 : i32, i32
  }
  func.func @transform_5(%arg0: i32) -> (i32, i32) {
    %c0_i32 = arith.constant 0 : i32
    %c0_i32_0 = arith.constant 0 : i32
    %c0_i32_1 = arith.constant 0 : i32
    return %c0_i32, %c0_i32_0 : i32, i32
  }
  func.func @transform_6(%arg0: i32) -> (i32, i32) {
    %c0_i32 = arith.constant 0 : i32
    %c0_i32_0 = arith.constant 0 : i32
    %c0_i32_1 = arith.constant 0 : i32
    return %c0_i32, %c0_i32_0 : i32, i32
  }
  func.func @transform_7(%arg0: i32) -> (i32, i32) {
    %c0_i32 = arith.constant 0 : i32
    %c0_i32_0 = arith.constant 0 : i32
    %c0_i32_1 = arith.constant 0 : i32
    return %c0_i32, %c0_i32_0 : i32, i32
  }
  func.func @transform_8(%arg0: i32) -> (i32, i32) {
    %c0_i32 = arith.constant 0 : i32
    %c0_i32_0 = arith.constant 0 : i32
    %c0_i32_1 = arith.constant 0 : i32
    return %c0_i32, %c0_i32_0 : i32, i32
  }
  func.func @transform_9(%arg0: i32) -> (i32, i32) {
    %c0_i32 = arith.constant 0 : i32
    %c0_i32_0 = arith.constant 0 : i32
    %c0_i32_1 = arith.constant 0 : i32
    return %c0_i32, %c0_i32_0 : i32, i32
  }
  func.func @transform_10(%arg0: i32) -> (i32, i32) {
    %c0_i32 = arith.constant 0 : i32
    %c0_i32_0 = arith.constant 0 : i32
    %c0_i32_1 = arith.constant 0 : i32
    return %c0_i32, %c0_i32_0 : i32, i32
  }
  func.func @transform_11(%arg0: i32) -> (i32, i32) {
    %c0_i32 = arith.constant 0 : i32
    %c0_i32_0 = arith.constant 0 : i32
    %c0_i32_1 = arith.constant 0 : i32
    return %c0_i32, %c0_i32_0 : i32, i32
  }
  func.func @transform_12(%arg0: i32) -> (i32, i32, i32) {
    %c0_i32 = arith.constant 0 : i32
    %c0_i32_0 = arith.constant 0 : i32
    %c0_i32_1 = arith.constant 0 : i32
    %c0_i32_2 = arith.constant 0 : i32
    return %c0_i32, %c0_i32_0, %c0_i32_1 : i32, i32, i32
  }
  func.func @transform_13(%arg0: i32) -> (i32, i32) {
    %c0_i32 = arith.constant 0 : i32
    %c0_i32_0 = arith.constant 0 : i32
    %c0_i32_1 = arith.constant 0 : i32
    return %c0_i32, %c0_i32_0 : i32, i32
  }
  func.func @transform_14(%arg0: i32) -> (i32, i32) {
    %c0_i32 = arith.constant 0 : i32
    %c0_i32_0 = arith.constant 0 : i32
    %c0_i32_1 = arith.constant 0 : i32
    return %c0_i32, %c0_i32_0 : i32, i32
  }
  func.func @transform_15(%arg0: i32) -> (i32, i32, i32, i32) {
    %c0_i32 = arith.constant 0 : i32
    %c0_i32_0 = arith.constant 0 : i32
    %c0_i32_1 = arith.constant 0 : i32
    %c0_i32_2 = arith.constant 0 : i32
    return %arg0, %c0_i32, %c0_i32_0, %c0_i32_1 : i32, i32, i32, i32
  }
}

</mosaic_0001>

<bundles_post_ra>
// kernel: bifusion_forward.1
= control target key start
LH: loop header
LB: loop body
LE: loop exit
PB: predicated region body
PF: predicated region fallthrough
CT: control target
= control target key end

     0   :  { %s6841_s20 = smov 0   ;;  %s9957_s0 = inlined_call_operand.vmem [shape: f32[2,16,16,4], index: 0, kind: input, shape index: {}]   ;;  %s9958_s1 = inlined_call_operand.vmem [shape: f32[2,16,16,4], index: 1, kind: input, shape index: {}]   ;;  %s9959_s2 = inlined_call_operand.vmem [shape: f32[4,4], index: 2, kind: input, shape index: {}]   ;;  %s9960_s3 = inlined_call_operand.vmem [shape: f32[1,4], index: 3, kind: input, shape index: {}]   ;;  %s9961_s4 = inlined_call_operand.vmem [shape: f32[4,4], index: 4, kind: input, shape index: {}]   ;;  %s9962_s5 = inlined_call_operand.vmem [shape: f32[1,4], index: 5, kind: input, shape index: {}]   ;;  %s9963_s6 = inlined_call_operand.vmem [shape: f32[4,4], index: 6, kind: input, shape index: {}]   ;;  %s9964_s7 = inlined_call_operand.vmem [shape: f32[1,4], index: 7, kind: input, shape index: {}]   ;;  %s9965_s8 = inlined_call_operand.vmem [shape: f32[18,1], index: 8, kind: input, shape index: {}]   ;;  %s9966_s9 = inlined_call_operand.<no memory space> [shape: f32[1,1], index: 9, kind: input, shape index: {}]   ;;  %s9967_s10 = inlined_call_operand.vmem [shape: f32[4,4], index: 10, kind: input, shape index: {}]   ;;  %s9968_s11 = inlined_call_operand.vmem [shape: f32[4,4], index: 11, kind: input, shape index: {}]   ;;  %s9969_s12 = inlined_call_operand.vmem [shape: f32[3,12,4], index: 12, kind: input, shape index: {}]   ;;  %s9970_s13 = inlined_call_operand.vmem [shape: f32[1,4], index: 13, kind: input, shape index: {}]   ;;  %s9971_s14 = inlined_call_operand.vmem [shape: f32[1,4], index: 14, kind: input, shape index: {}]   ;;  %s9972_s15 = inlined_call_operand.vmem [shape: f32[2,16,16,4], index: 15, kind: output, shape index: {}]  }
   0x1   :  { %v20_v0 = vstv %s9966_s9 }
   0x2   :  { %21 = vst [vmem:[#allocation2] sm:$0x1] %v20_v0 }
   0x3 LB: > { %s5614_s21 = sadd.s32 4294967295, %s6744_s20   ;;  %p5618_p0 = scmp.ge.s32.totalorder %s6744_s20, 1  ;;  %s6744_s20 = sphi %s6841_s20, %s27_s20  }
   0x4   : > { %p449_p1 = scmp.lt.s32.totalorder %s6744_s20, 3 }
   0x6   : > { %p450_p2 = pnand %p5618_p0, %p449_p1 }
   0x8   : > { %453 = sbr.rel (%p450_p2) target bundleno = 1511 (0x5e7), region = 80 }
   0xf   : > { %p502_p3 = scmp.lt.s32.totalorder %s5614_s21, 1  ;;  %vm581_vm0 = vcmask 31744   ;;  %vm658_vm1 = vcmask 1043456   ;;  %vm6747_vm2 = vmmov 0   ;;  %s9993_s30 = smov 2   ;;  %vm1159_vm3 = vcmask 7168  }
  0x10   : > { %vm1224_vm4 = vcmask 1040384   ;;  %vm1383_vm5 = vcmask 1046528   ;;  %s6749_s16 = smov 4   ;;  %s6750_s17 = smov 6   ;;  %vm1554_vm6 = vcmask 1045504   ;;  %vm2672_vm7 = vcmask 1041408  }
  0x11   : > { %s10169_s21 = smov (!%p502_p3, %s5614_s21), 1  ;;  %s6751_s18 = smov 8   ;;  %vm2304_vm8 = vcmask 15360   ;;  %vm2367_vm9 = vcmask 48128   ;;  %vm2433_vm10 = vcmask 80896   ;;  %vm2400_vm11 = vcmask 64512  }
  0x12   : > { %s6849_s22 = sshll.u32 %s10169_s21, 8  ;;  %s6752_s19 = smov 12   ;;  %vm2466_vm12 = vcmask 97280   ;;  %vm2499_vm13 = vcmask 113664   ;;  %vm2532_vm14 = vcmask 130048   ;;  %vm2575_vm15 = vcmask 146432  }
  0x13   : > { %s6855_s24 = scalar_lea.vmem %s9958_s1, %s6849_s22  ;;  %s6864_s27 = scalar_lea.vmem %s9957_s0, %s6849_s22 }
  0x14   : > { %v6858_v1 = vld [vmem:[%s6855_s24 + $0x10] sm:$0xff]  ;;  %v6867_v2 = vld [vmem:[%s6855_s24] sm:$0xff]  ;;  %v6870_v3 = vld [vmem:[%s6855_s24 + $0x18] sm:$0xff]  ;;  %s6753_s21 = smov 10   ;;  %s6754_s28 = smov 14  }
  0x15   : > { %v940_v4 = vsel %vm581_vm0, %v6858_v1, -inf  ;;  %v519_v5 = vld [vmem:[%s6864_s27 + $0x10] sm:$0xff]  ;;  %v934_v6 = vsel %vm581_vm0, %v6867_v2, -inf  ;;  %v517_v7 = vld [vmem:[%s6864_s27] sm:$0xff]  ;;  %v520_v9 = vld [vmem:[%s6864_s27 + $0x18] sm:$0xff]  ;;  %v943_v13 = vsel %vm581_vm0, %v6870_v3, -inf  ;;  %s9827_s9 = scalar_lea.vmem %s9972_s15, %s6849_s22 }
  0x16   : > { %941 = vmax.xlane.f32.xlu1 %v940_v4  ;;  %935 = vmax.xlane.f32.xlu0 %v934_v6  ;;  %v582_v8 = vsel %vm581_vm0, %v517_v7, 0.0  ;;  %v6881_v10 = vld [vmem:[%s6855_s24 + $0x8] sm:$0xff]  ;;  %v585_v12 = vsel %vm581_vm0, %v519_v5, 0.0  ;;  %v6894_v18 = vld [vmem:[%s6855_s24 + $0x20] sm:$0xff]  ;;  %v587_v20 = vsel %vm581_vm0, %v520_v9, 0.0  ;;  %v6905_v27 = vld [vmem:[%s6855_s24 + $0x38] sm:$0xff] }
  0x17   : > { %v518_v11 = vld [vmem:[%s6864_s27 + $0x8] sm:$0xff]  ;;  %v937_v14 = vsel %vm581_vm0, %v6881_v10, -inf  ;;  %v521_v19 = vld [vmem:[%s6864_s27 + $0x20] sm:$0xff]  ;;  %v946_v24 = vsel %vm581_vm0, %v6894_v18, -inf  ;;  %v6908_v28 = vld [vmem:[%s6855_s24 + $0x30] sm:$0xff]  ;;  %v955_v33 = vsel %vm581_vm0, %v6905_v27, -inf }
  0x18   : > { %v583_v15 = vsel %vm581_vm0, %v518_v11, 0.0  ;;  %v6891_v17 = vld [vmem:[%s6855_s24 + $0x28] sm:$0xff]  ;;  %v589_v25 = vsel %vm581_vm0, %v521_v19, 0.0  ;;  %v523_v29 = vld [vmem:[%s6864_s27 + $0x30] sm:$0xff]  ;;  %v524_v32 = vld [vmem:[%s6864_s27 + $0x38] sm:$0xff]  ;;  %v952_v34 = vsel %vm581_vm0, %v6908_v28, -inf }
  0x19   : > { %v584_v16 = vadd.f32 %v583_v15, %v582_v8  ;;  %v522_v22 = vld [vmem:[%s6864_s27 + $0x28] sm:$0xff]  ;;  %v949_v23 = vsel %vm581_vm0, %v6891_v17, -inf  ;;  %v593_v35 = vsel %vm581_vm0, %v523_v29, 0.0  ;;  %v6922_v38 = vld [vmem:[%s6855_s24 + $0x40] sm:$0xff]  ;;  %v595_v40 = vsel %vm581_vm0, %v524_v32, 0.0  ;;  %v6933_v47 = vld [vmem:[%s6855_s24 + $0x58] sm:$0xff] }
  0x1a   : > { %944 = vmax.xlane.f32.xlu1 %v943_v13  ;;  %938 = vmax.xlane.f32.xlu0 %v937_v14  ;;  %v591_v30 = vsel %vm581_vm0, %v522_v22, 0.0  ;;  %v6919_v37 = vld [vmem:[%s6855_s24 + $0x48] sm:$0xff]  ;;  %v525_v39 = vld [vmem:[%s6864_s27 + $0x40] sm:$0xff]  ;;  %v958_v44 = vsel %vm581_vm0, %v6922_v38, -inf  ;;  %v6936_v48 = vld [vmem:[%s6855_s24 + $0x50] sm:$0xff]  ;;  %v967_v53 = vsel %vm581_vm0, %v6933_v47, -inf }
  0x1b   : > { %v586_v21 = vadd.f32 %v585_v12, %v584_v16  ;;  %v526_v42 = vld [vmem:[%s6864_s27 + $0x48] sm:$0xff]  ;;  %v961_v43 = vsel %vm581_vm0, %v6919_v37, -inf  ;;  %v597_v45 = vsel %vm581_vm0, %v525_v39, 0.0  ;;  %v527_v49 = vld [vmem:[%s6864_s27 + $0x50] sm:$0xff]  ;;  %v528_v52 = vld [vmem:[%s6864_s27 + $0x58] sm:$0xff]  ;;  %v964_v54 = vsel %vm581_vm0, %v6936_v48, -inf }
  0x1c   : > { %v599_v50 = vsel %vm581_vm0, %v526_v42, 0.0  ;;  %v601_v55 = vsel %vm581_vm0, %v527_v49, 0.0  ;;  %v6947_v57 = vld [vmem:[%s6855_s24 + $0x68] sm:$0xff]  ;;  %v6950_v58 = vld [vmem:[%s6855_s24 + $0x60] sm:$0xff]  ;;  %v603_v60 = vsel %vm581_vm0, %v528_v52, 0.0  ;;  %v6961_v6 = vld [vmem:[%s6855_s24 + $0x78] sm:$0xff] }
  0x1d   : > { %v588_v26 = vadd.f32 %v587_v20, %v586_v21  ;;  %v529_v59 = vld [vmem:[%s6864_s27 + $0x60] sm:$0xff]  ;;  %v530_v62 = vld [vmem:[%s6864_s27 + $0x68] sm:$0xff]  ;;  %v973_v63 = vsel %vm581_vm0, %v6947_v57, -inf  ;;  %v970_v0 = vsel %vm581_vm0, %v6950_v58, -inf  ;;  %v6964_v7 = vld [vmem:[%s6855_s24 + $0x70] sm:$0xff]  ;;  %v979_v13 = vsel %vm581_vm0, %v6961_v6, -inf }
  0x1e   : > { %950 = vmax.xlane.f32.xlu1 %v949_v23  ;;  %947 = vmax.xlane.f32.xlu0 %v946_v24  ;;  %v605_v4 = vsel %vm581_vm0, %v529_v59, 0.0  ;;  %v531_v8 = vld [vmem:[%s6864_s27 + $0x70] sm:$0xff]  ;;  %v607_v9 = vsel %vm581_vm0, %v530_v62, 0.0  ;;  %v532_v12 = vld [vmem:[%s6864_s27 + $0x78] sm:$0xff]  ;;  %v976_v14 = vsel %vm581_vm0, %v6964_v7, -inf  ;;  %v6975_v19 = vld [vmem:[%s6855_s24 + $0x88] sm:$0xff] }
  0x1f   : > { %v590_v31 = vadd.f32 %v589_v25, %v588_v26  ;;  %v609_v15 = vsel %vm581_vm0, %v531_v8, 0.0  ;;  %v6978_v20 = vld [vmem:[%s6855_s24 + $0x80] sm:$0xff]  ;;  %v611_v22 = vsel %vm581_vm0, %v532_v12, 0.0  ;;  %v534_v24 = vld [vmem:[%s6864_s27 + $0x88] sm:$0xff]  ;;  %v985_v25 = vsel %vm581_vm0, %v6975_v19, -inf  ;;  %v6992_v32 = vld [vmem:[%s6855_s24 + $0x90] sm:$0xff] }
  0x20   : > { %v533_v21 = vld [vmem:[%s6864_s27 + $0x80] sm:$0xff]  ;;  %v982_v26 = vsel %vm581_vm0, %v6978_v20, -inf  ;;  %v539_v59 = vld [vmem:[%s6864_s27 + $0xb0] sm:$0xff]  ;;  %v540_v62 = vld [vmem:[%s6864_s27 + $0xb8] sm:$0xff]  ;;  %s10100_s29 = smov 2  }
  0x21   : > { %v592_v36 = vadd.f32 %v591_v30, %v590_v31  ;;  %v613_v29 = vsel %vm581_vm0, %v533_v21, 0.0  ;;  %v6989_v31 = vld [vmem:[%s6855_s24 + $0x98] sm:$0xff]  ;;  %v7031_v8 = vld [vmem:[%s6855_s24 + $0xc8] sm:$0xff]  ;;  %v627_v12 = vsel %vm581_vm0, %v540_v62, 0.0 }
  0x22   : > { %956 = vmax.xlane.f32.xlu1 %v955_v33  ;;  %953 = vmax.xlane.f32.xlu0 %v952_v34  ;;  %v535_v33 = vld [vmem:[%s6864_s27 + $0x90] sm:$0xff]  ;;  %v615_v34 = vsel %vm581_vm0, %v534_v24, 0.0  ;;  %v991_v39 = vsel %vm581_vm0, %v6989_v31, -inf  ;;  %v548_v62 = vld [vmem:[%s6864_s27 + $0xf8] sm:$0xff] }
  0x23   : > { %v594_v41 = vadd.f32 %v593_v35, %v592_v36  ;;  %v536_v36 = vld [vmem:[%s6864_s27 + $0x98] sm:$0xff]  ;;  %v7048_v24 = vld [vmem:[%s6855_s24 + $0xd0] sm:$0xff] }
  0x25   : > { %v596_v46 = vadd.f32 %v595_v40, %v594_v41  ;;  %v988_v40 = vsel %vm581_vm0, %v6992_v32, -inf  ;;  %v617_v41 = vsel %vm581_vm0, %v535_v33, 0.0 }
  0x26   : > { %962 = vmax.xlane.f32.xlu1 %v961_v43  ;;  %959 = vmax.xlane.f32.xlu0 %v958_v44  ;;  %v7003_v43 = vld [vmem:[%s6855_s24 + $0xa8] sm:$0xff]  ;;  %v7006_v44 = vld [vmem:[%s6855_s24 + $0xa0] sm:$0xff] }
  0x27   : > { %v598_v51 = vadd.f32 %v597_v45, %v596_v46  ;;  %v537_v45 = vld [vmem:[%s6864_s27 + $0xa0] sm:$0xff]  ;;  %v619_v46 = vsel %vm581_vm0, %v536_v36, 0.0  ;;  %v994_v52 = vsel %vm581_vm0, %v7006_v44, -inf }
  0x29   : > { %v600_v56 = vadd.f32 %v599_v50, %v598_v51  ;;  %v538_v50 = vld [vmem:[%s6864_s27 + $0xa8] sm:$0xff]  ;;  %v997_v51 = vsel %vm581_vm0, %v7003_v43, -inf }
  0x2a   : > { %968 = vmax.xlane.f32.xlu1 %v967_v53  ;;  %965 = vmax.xlane.f32.xlu0 %v964_v54  ;;  %v621_v53 = vsel %vm581_vm0, %v537_v45, 0.0 }
  0x2b   : > { %v602_v61 = vadd.f32 %v601_v55, %v600_v56  ;;  %v7017_v55 = vld [vmem:[%s6855_s24 + $0xb8] sm:$0xff]  ;;  %v7020_v56 = vld [vmem:[%s6855_s24 + $0xb0] sm:$0xff] }
  0x2d   : > { %v604_v5 = vadd.f32 %v603_v60, %v602_v61  ;;  %v623_v60 = vsel %vm581_vm0, %v538_v50, 0.0 }
  0x2e   : > { %974 = vmax.xlane.f32.xlu1 %v973_v63  ;;  %971 = vmax.xlane.f32.xlu0 %v970_v0  ;;  %v1003_v63 = vsel %vm581_vm0, %v7017_v55, -inf  ;;  %v1000_v0 = vsel %vm581_vm0, %v7020_v56, -inf }
  0x2f   : > { %v606_v11 = vadd.f32 %v605_v4, %v604_v5  ;;  %v625_v4 = vsel %vm581_vm0, %v539_v59, 0.0  ;;  %v547_v59 = vld [vmem:[%s6864_s27 + $0xf0] sm:$0xff] }
  0x31   : > { %v608_v16 = vadd.f32 %v607_v9, %v606_v11  ;;  %v7034_v9 = vld [vmem:[%s6855_s24 + $0xc0] sm:$0xff] }
  0x32   : > { %980 = vmax.xlane.f32.xlu1 %v979_v13  ;;  %977 = vmax.xlane.f32.xlu0 %v976_v14  ;;  %v541_v11 = vld [vmem:[%s6864_s27 + $0xc0] sm:$0xff]  ;;  %v542_v14 = vld [vmem:[%s6864_s27 + $0xc8] sm:$0xff] }
  0x33   : > { %v610_v23 = vadd.f32 %v609_v15, %v608_v16  ;;  %v1009_v15 = vsel %vm581_vm0, %v7031_v8, -inf  ;;  %v1006_v16 = vsel %vm581_vm0, %v7034_v9, -inf  ;;  %v629_v21 = vsel %vm581_vm0, %v541_v11, 0.0 }
  0x34   : > { %v643_v11 = vsel %vm581_vm0, %v548_v62, 0.0 }
  0x35   : > { %v612_v30 = vadd.f32 %v611_v22, %v610_v23  ;;  %v7045_v23 = vld [vmem:[%s6855_s24 + $0xd8] sm:$0xff] }
  0x36   : > { %986 = vmax.xlane.f32.xlu1 %v985_v25  ;;  %983 = vmax.xlane.f32.xlu0 %v982_v26  ;;  %v543_v25 = vld [vmem:[%s6864_s27 + $0xd0] sm:$0xff]  ;;  %v631_v26 = vsel %vm581_vm0, %v542_v14, 0.0  ;;  %v1015_v33 = vsel %vm581_vm0, %v7045_v23, -inf  ;;  %v1030_v14 = vsel %vm581_vm0, %v6867_v2, 0.0 }
  0x37   : > { %v614_v35 = vadd.f32 %v613_v29, %v612_v30  ;;  %v544_v30 = vld [vmem:[%s6864_s27 + $0xd8] sm:$0xff] }
  0x39   : > { %v616_v42 = vadd.f32 %v615_v34, %v614_v35  ;;  %v1012_v34 = vsel %vm581_vm0, %v7048_v24, -inf  ;;  %v633_v35 = vsel %vm581_vm0, %v543_v25, 0.0 }
  0x3a   : > { %992 = vmax.xlane.f32.xlu1 %v991_v39  ;;  %989 = vmax.xlane.f32.xlu0 %v988_v40  ;;  %v7059_v39 = vld [vmem:[%s6855_s24 + $0xe8] sm:$0xff]  ;;  %v7062_v40 = vld [vmem:[%s6855_s24 + $0xe0] sm:$0xff] }
  0x3b   : > { %v618_v49 = vadd.f32 %v617_v41, %v616_v42  ;;  %v545_v41 = vld [vmem:[%s6864_s27 + $0xe0] sm:$0xff]  ;;  %v635_v42 = vsel %vm581_vm0, %v544_v30, 0.0  ;;  %v1018_v50 = vsel %vm581_vm0, %v7062_v40, -inf  ;;  %v1042_v30 = vsel %vm581_vm0, %v6894_v18, 0.0 }
  0x3c   : > { %v1054_v18 = vsel %vm581_vm0, %v6922_v38, 0.0  ;;  %v1066_v38 = vsel %vm581_vm0, %v6950_v58, 0.0  ;;  %v1084_v58 = vsel %vm581_vm0, %v6992_v32, 0.0  ;;  %v1102_v32 = vsel %vm581_vm0, %v7034_v9, 0.0 }
  0x3d   : > { %v620_v54 = vadd.f32 %v619_v46, %v618_v49  ;;  %v546_v46 = vld [vmem:[%s6864_s27 + $0xe8] sm:$0xff]  ;;  %v1021_v49 = vsel %vm581_vm0, %v7059_v39, -inf }
  0x3e   : > { %998 = vmax.xlane.f32.xlu1 %v997_v51  ;;  %995 = vmax.xlane.f32.xlu0 %v994_v52  ;;  %v637_v51 = vsel %vm581_vm0, %v545_v41, 0.0  ;;  %v1075_v41 = vsel %vm581_vm0, %v6961_v6, 0.0  ;;  %v1093_v6 = vsel %vm581_vm0, %v7003_v43, 0.0  ;;  %v1111_v43 = vsel %vm581_vm0, %v7045_v23, 0.0 }
  0x3f   : > { %v622_v61 = vadd.f32 %v621_v53, %v620_v54  ;;  %v7073_v53 = vld [vmem:[%s6855_s24 + $0xf8] sm:$0xff]  ;;  %v7076_v54 = vld [vmem:[%s6855_s24 + $0xf0] sm:$0xff] }
  0x40   : > { %v1120_v9 = vsel %vm581_vm0, %v7076_v54, 0.0 }
  0x41   : > { %v624_v5 = vadd.f32 %v623_v60, %v622_v61  ;;  %v639_v60 = vsel %vm581_vm0, %v546_v46, 0.0 }
  0x42   : > { %1004 = vmax.xlane.f32.xlu1 %v1003_v63  ;;  %1001 = vmax.xlane.f32.xlu0 %v1000_v0  ;;  %v1027_v63 = vsel %vm581_vm0, %v7073_v53, -inf  ;;  %v1024_v0 = vsel %vm581_vm0, %v7076_v54, -inf }
  0x43   : > { %v626_v13 = vadd.f32 %v625_v4, %v624_v5  ;;  %v641_v4 = vsel %vm581_vm0, %v547_v59, 0.0 }
  0x45   : > { %v628_v22 = vadd.f32 %v627_v12, %v626_v13  ;;  %v1033_v13 = vsel %vm581_vm0, %v6881_v10, 0.0  ;;  %v1039_v10 = vsel %vm581_vm0, %v6870_v3, 0.0 }
  0x46   : > { %1010 = vmax.xlane.f32.xlu1 %v1009_v15  ;;  %1007 = vmax.xlane.f32.xlu0 %v1006_v16  ;;  %v653_v15 = vld [vmem:[%s9959_s2] sm:$0xf]  ;;  %v9973_v16 = vmov 0.0  }
  0x47   : > { %v630_v29 = vadd.f32 %v629_v21, %v628_v22  ;;  %6050 = vmatprep.subr.mxu0 %v9973_v16  ;;  %6052 = vmatprep.mubr.msk.f32.mxu0 %vm6747_vm2, %v9973_v16  ;;  %v1036_v22 = vsel %vm581_vm0, %v6858_v1, 0.0  ;;  %v1051_v1 = vsel %vm581_vm0, %v6905_v27, 0.0  ;;  %v1063_v27 = vsel %vm581_vm0, %v6933_v47, 0.0 }
  0x48   : > { %6051 = vmatpush3.msk.msra.mxu0 %vm658_vm1, %v653_v15  ;;  %6055 = vmatprep.subr.mxu1 %v9973_v16  ;;  %v1081_v47 = vsel %vm581_vm0, %v6975_v19, 0.0  ;;  %v1099_v19 = vsel %vm581_vm0, %v7017_v55, 0.0  ;;  %v1117_v55 = vsel %vm581_vm0, %v7059_v39, 0.0 }
  0x49   : > { %v632_v36 = vadd.f32 %v631_v26, %v630_v29  ;;  %6057 = vmatprep.mubr.msk.f32.mxu1 %vm6747_vm2, %v9973_v16  ;;  %6060 = vmatprep.subr.mxu0 %v9973_v16  ;;  %v1045_v29 = vsel %vm581_vm0, %v6891_v17, 0.0  ;;  %v1057_v17 = vsel %vm581_vm0, %v6919_v37, 0.0  ;;  %v1069_v37 = vsel %vm581_vm0, %v6947_v57, 0.0 }
  0x4a   : > { %1016 = vmax.xlane.f32.xlu1 %v1015_v33  ;;  %1013 = vmax.xlane.f32.xlu0 %v1012_v34  ;;  %v1048_v34 = vsel %vm581_vm0, %v6908_v28, 0.0  ;;  %v1060_v28 = vsel %vm581_vm0, %v6936_v48, 0.0  ;;  %v1078_v48 = vsel %vm581_vm0, %v6978_v20, 0.0  ;;  %v1087_v57 = vsel %vm581_vm0, %v6989_v31, 0.0 }
  0x4b   : > { %v634_v45 = vadd.f32 %v633_v35, %v632_v36  ;;  %v1096_v20 = vsel %vm581_vm0, %v7020_v56, 0.0  ;;  %v1105_v31 = vsel %vm581_vm0, %v7031_v8, 0.0  ;;  %v1114_v56 = vsel %vm581_vm0, %v7062_v40, 0.0 }
  0x4c   : > { %v1123_v8 = vsel %vm581_vm0, %v7073_v53, 0.0 }
  0x4d   : > { %v636_v52 = vadd.f32 %v635_v42, %v634_v45  ;;  %v1072_v42 = vsel %vm581_vm0, %v6964_v7, 0.0  ;;  %v1090_v7 = vsel %vm581_vm0, %v7006_v44, 0.0  ;;  %v1108_v44 = vsel %vm581_vm0, %v7048_v24, 0.0 }
  0x4e   : > { %1022 = vmax.xlane.f32.xlu1 %v1021_v49  ;;  %1019 = vmax.xlane.f32.xlu0 %v1018_v50  ;;  %v7169_v45 = vrot.slane %v9973_v16, 1 }
  0x4f   : > { %v638_v61 = vadd.f32 %v637_v51, %v636_v52 }
  0x50   : > { %10030 = vst [vmem:[#allocation4_spill] sm:$0xff] %v7169_v45 }
  0x51   : > { %v640_v5 = vadd.f32 %v639_v60, %v638_v61 }
  0x52   : > { %1028 = vmax.xlane.f32.xlu1 %v1027_v63  ;;  %1025 = vmax.xlane.f32.xlu0 %v1024_v0 }
  0x53   : > { %v642_v12 = vadd.f32 %v641_v4, %v640_v5 }
  0x55   : > { %v644_v21 = vadd.f32 %v643_v11, %v642_v12 }
  0x56   : > { %1034 = vadd.xlane.f32.xlu1 %v1033_v13  ;;  %1031 = vadd.xlane.f32.xlu0 %v1030_v14 }
  0x57   : > { %v645_v2 = vrot.slane %v644_v21, 4 }
  0x59   : > { %v646_v25 = vadd.f32 %v645_v2, %v644_v21 }
  0x5a   : > { %1040 = vadd.xlane.f32.xlu1 %v1039_v10  ;;  %1037 = vadd.xlane.f32.xlu0 %v1036_v22 }
  0x5b   : > { %v647_v26 = vrot.slane %v646_v25, 2 }
  0x5d   : > { %v648_v33 = vadd.f32 %v647_v26, %v646_v25 }
  0x5e   : > { %1046 = vadd.xlane.f32.xlu1 %v1045_v29  ;;  %1043 = vadd.xlane.f32.xlu0 %v1042_v30 }
  0x5f   : > { %v649_v3 = vrot.slane %v648_v33, 1 }
  0x61   : > { %v650_v35 = vadd.f32 %v649_v3, %v648_v33 }
  0x62   : > { %1052 = vadd.xlane.f32.xlu1 %v1051_v1  ;;  %1049 = vadd.xlane.f32.xlu0 %v1048_v34 }
  0x63   : > { %v7114_v36 = vmul.f32 0.00390625, %v650_v35 }
  0x65   : > { %10029 = vst [vmem:[#allocation3_spill] sm:$0xff] %v7114_v36  ;;  %6053 = vmatmul.mubr.msk.f32.vlgmr.msra.gmra.mrb[0].mxu0 %vm581_vm0, %v7114_v36 }
  0x66   : > { %6062 = vmatprep.mubr.msk.f32.mxu0 %vm6747_vm2, %v9973_v16  ;;  %1058 = vadd.xlane.f32.xlu1 %v1057_v17  ;;  %vm6757_vm2 = vmmov 1  }
  0x67   : > { %1055 = vadd.xlane.f32.xlu0 %v1054_v18 }
  0x6a   : > { %1064 = vadd.xlane.f32.xlu1 %v1063_v27 }
  0x6b   : > { %1061 = vadd.xlane.f32.xlu0 %v1060_v28 }
  0x6e   : > { %1070 = vadd.xlane.f32.xlu1 %v1069_v37 }
  0x6f   : > { %1067 = vadd.xlane.f32.xlu0 %v1066_v38 }
  0x72   : > { %1076 = vadd.xlane.f32.xlu1 %v1075_v41 }
  0x73   : > { %1073 = vadd.xlane.f32.xlu0 %v1072_v42 }
  0x76   : > { %1082 = vadd.xlane.f32.xlu1 %v1081_v47 }
  0x77   : > { %1079 = vadd.xlane.f32.xlu0 %v1078_v48 }
  0x7a   : > { %1088 = vadd.xlane.f32.xlu1 %v1087_v57 }
  0x7b   : > { %1085 = vadd.xlane.f32.xlu0 %v1084_v58 }
  0x7e   : > { %1094 = vadd.xlane.f32.xlu1 %v1093_v6 }
  0x7f   : > { %1091 = vadd.xlane.f32.xlu0 %v1090_v7 }
  0x82   : > { %1100 = vadd.xlane.f32.xlu1 %v1099_v19 }
  0x83   : > { %1097 = vadd.xlane.f32.xlu0 %v1096_v20 }
  0x86   : > { %1106 = vadd.xlane.f32.xlu1 %v1105_v31 }
  0x87   : > { %1103 = vadd.xlane.f32.xlu0 %v1102_v32 }
  0x8a   : > { %1112 = vadd.xlane.f32.xlu1 %v1111_v43 }
  0x8b   : > { %1109 = vadd.xlane.f32.xlu0 %v1108_v44 }
  0x8e   : > { %1118 = vadd.xlane.f32.xlu1 %v1117_v55 }
  0x8f   : > { %1115 = vadd.xlane.f32.xlu0 %v1114_v56 }
  0x92   : > { %1124 = vadd.xlane.f32.xlu1 %v1123_v8 }
  0x93   : > { %1121 = vadd.xlane.f32.xlu0 %v1120_v9 }
  0xa3   : > { %v942_v23 = vpop.xlane.xlu1 %941  ;;  %v936_v24 = vpop.xlane.xlu0 %935 }
  0xa7   : > { %v945_v46 = vpop.xlane.xlu1 %944  ;;  %v939_v39 = vpop.xlane.xlu0 %938 }
  0xa9   : > { %1461 = vrot.lane.b32.xlu0 %v7169_v45, %s9993_s30 }
  0xab   : > { %v7173_v40 = vpop.xlane.xlu1 %950  ;;  %v7175_v49 = vpop.xlane.xlu0 %947 }
  0xaf   : > { %v7177_v50 = vpop.xlane.xlu1 %956  ;;  %v7179_v51 = vpop.xlane.xlu0 %953 }
  0xb3   : > { %v7181_v52 = vpop.xlane.xlu1 %962  ;;  %v7183_v53 = vpop.xlane.xlu0 %959 }
  0xb7   : > { %v7185_v54 = vpop.xlane.xlu1 %968  ;;  %v7187_v59 = vpop.xlane.xlu0 %965 }
  0xbb   : > { %v7189_v60 = vpop.xlane.xlu1 %974  ;;  %v7191_v61 = vpop.xlane.xlu0 %971 }
  0xbf   : > { %v7193_v62 = vpop.xlane.xlu1 %980  ;;  %v7195_v63 = vpop.xlane.xlu0 %977 }
  0xc3   : > { %v7197_v0 = vpop.xlane.xlu1 %986  ;;  %v7199_v4 = vpop.xlane.xlu0 %983 }
  0xc7   : > { %v7201_v5 = vpop.xlane.xlu1 %992  ;;  %v7203_v11 = vpop.xlane.xlu0 %989 }
  0xcb   : > { %v7205_v12 = vpop.xlane.xlu1 %998  ;;  %v7207_v13 = vpop.xlane.xlu0 %995 }
  0xcf   : > { %v7209_v14 = vpop.xlane.xlu1 %1004  ;;  %v7211_v15 = vpop.xlane.xlu0 %1001 }
  0xd3   : > { %v7213_v21 = vpop.xlane.xlu1 %1010  ;;  %v7215_v2 = vpop.xlane.xlu0 %1007 }
  0xd7   : > { %v7217_v10 = vpop.xlane.xlu1 %1016  ;;  %v7219_v22 = vpop.xlane.xlu0 %1013 }
  0xd8   : > { %10031 = vst [vmem:[#allocation5_spill] sm:$0xff] %v7217_v10  ;;  %10032 = vst [vmem:[#allocation6_spill] sm:$0xff] %v7219_v22 }
  0xdb   : > { %v7221_v25 = vpop.xlane.xlu1 %1022  ;;  %v7223_v26 = vpop.xlane.xlu0 %1019 }
  0xdc   : > { %10033 = vst [vmem:[#allocation7_spill] sm:$0xff] %v7221_v25  ;;  %10034 = vst [vmem:[#allocation8_spill] sm:$0xff] %v7223_v26 }
  0xdf   : > { %v7225_v29 = vpop.xlane.xlu1 %1028  ;;  %v7227_v30 = vpop.xlane.xlu0 %1025 }
  0xe0   : > { %10035 = vst [vmem:[#allocation9_spill] sm:$0xff] %v7225_v29  ;;  %10036 = vst [vmem:[#allocation10_spill] sm:$0xff] %v7227_v30 }
  0xe3   : > { %v1035_v33 = vpop.xlane.xlu1 %1034  ;;  %v1032_v3 = vpop.xlane.xlu0 %1031 }
  0xe4   : > { %v1128_v1 = vmul.f32 0.25, %v1035_v33  ;;  %v1127_v34 = vmul.f32 0.25, %v1032_v3 }
  0xe6   : > { %v1161_v35 = vsel %vm1159_vm3, %v939_v39, %v1128_v1  ;;  %v1160_v17 = vsel %vm1159_vm3, %v936_v24, %v1127_v34 }
  0xe7   : > { %v1226_v18 = vrot.slane %v1161_v35, 7  ;;  %v1225_v27 = vrot.slane %v1160_v17, 7  ;;  %v1041_v28 = vpop.xlane.xlu1 %1040  ;;  %v1038_v37 = vpop.xlane.xlu0 %1037 }
  0xe8   : > { %v1130_v38 = vmul.f32 0.25, %v1041_v28  ;;  %v1129_v41 = vmul.f32 0.25, %v1038_v37 }
  0xe9   : > { %v7232_v42 = vsel %vm1224_vm4, 0.0, %v1225_v27  ;;  %v7235_v47 = vsel %vm1224_vm4, %v1225_v27, %v1226_v18  ;;  %v7238_v48 = vsel %vm1224_vm4, %v1226_v18, 0.0 }
  0xea   : > { %v1163_v57 = vsel %vm1159_vm3, %v945_v46, %v1130_v38  ;;  %v1162_v58 = vsel %vm1159_vm3, %v942_v23, %v1129_v41  ;;  %v1386_v6 = vrot.slane %v7232_v42, 1  ;;  %v1387_v7 = vrot.slane %v7235_v47, 1 }
  0xeb   : > { %v1229_v19 = vrot.slane %v1163_v57, 7  ;;  %v1228_v20 = vrot.slane %v1162_v58, 7  ;;  %v1047_v31 = vpop.xlane.xlu1 %1046  ;;  %v1044_v32 = vpop.xlane.xlu0 %1043  ;;  %v1389_v56 = vrot.slane %v7238_v48, 1 }
  0xec   : > { %v1132_v43 = vmul.f32 0.25, %v1047_v31  ;;  %v1131_v44 = vmul.f32 0.25, %v1044_v32  ;;  %v7245_v55 = vsel %vm1383_vm5, %v1386_v6, %v1387_v7 }
  0xed   : > { %v7249_v8 = vsel %vm1224_vm4, %v1228_v20, %v1229_v19  ;;  %v7252_v9 = vsel %vm1224_vm4, 0.0, %v1228_v20  ;;  %1463 = vrot.lane.b32.xlu1 %v7245_v55, %s9993_s30  ;;  %v7257_v23 = vsel %vm1224_vm4, %v1229_v19, 0.0  ;;  %v7267_v28 = vsel %vm1383_vm5, %v1387_v7, %v1389_v56 }
  0xee   : > { %v1165_v24 = vsel %vm1159_vm3, %v7173_v40, %v1132_v43  ;;  %v1164_v46 = vsel %vm1159_vm3, %v7175_v49, %v1131_v44  ;;  %v1392_v39 = vrot.slane %v7249_v8, 1  ;;  %v1394_v33 = vrot.slane %v7257_v23, 1 }
  0xef   : > { %v1232_v3 = vrot.slane %v1165_v24, 7  ;;  %v1231_v1 = vrot.slane %v1164_v46, 7  ;;  %v1053_v34 = vpop.xlane.xlu1 %1052  ;;  %v1050_v35 = vpop.xlane.xlu0 %1049  ;;  %v1391_v17 = vrot.slane %v7252_v9, 1 }
  0xf0   : > { %v1134_v18 = vmul.f32 0.25, %v1053_v34  ;;  %v1133_v27 = vmul.f32 0.25, %v1050_v35  ;;  %v7270_v40 = vsel %vm1383_vm5, %v1392_v39, %v1394_v33 }
  0xf1   : > { %v7273_v49 = vsel %vm1224_vm4, %v1231_v1, %v1232_v3  ;;  %v7276_v37 = vsel %vm1224_vm4, 0.0, %v1231_v1  ;;  %1465 = vrot.lane.b32.xlu1 %v7267_v28, %s9993_s30  ;;  %1469 = vrot.lane.b32.xlu0 %v7270_v40, %s9993_s30  ;;  %v7283_v38 = vsel %vm1224_vm4, %v1232_v3, 0.0  ;;  %v7292_v32 = vsel %vm1383_vm5, %v1391_v17, %v1392_v39 }
  0xf2   : > { %v1167_v41 = vsel %vm1159_vm3, %v7177_v50, %v1134_v18  ;;  %v1166_v57 = vsel %vm1159_vm3, %v7179_v51, %v1133_v27  ;;  %v1397_v58 = vrot.slane %v7273_v49, 1  ;;  %v1399_v6 = vrot.slane %v7283_v38, 1 }
  0xf3   : > { %v1235_v7 = vrot.slane %v1167_v41, 7  ;;  %v1234_v19 = vrot.slane %v1166_v57, 7  ;;  %v1059_v20 = vpop.xlane.xlu1 %1058  ;;  %v1396_v50 = vrot.slane %v7276_v37, 1 }
  0xf4   : > { %v1056_v31 = vpop.xlane.xlu0 %1055  ;;  %v1136_v43 = vmul.f32 0.25, %v1059_v20  ;;  %v7295_v56 = vsel %vm1383_vm5, %v1397_v58, %v1399_v6 }
  0xf5   : > { %v1135_v44 = vmul.f32 0.25, %v1056_v31  ;;  %v7299_v51 = vsel %vm1224_vm4, %v1234_v19, %v1235_v7  ;;  %v7302_v24 = vsel %vm1224_vm4, 0.0, %v1234_v19  ;;  %1467 = vrot.lane.b32.xlu1 %v7292_v32, %s9993_s30  ;;  %1473 = vrot.lane.b32.xlu0 %v7295_v56, %s9993_s30  ;;  %v7309_v46 = vsel %vm1224_vm4, %v1235_v7, 0.0 }
  0xf6   : > { %v1169_v39 = vsel %vm1159_vm3, %v7181_v52, %v1136_v43  ;;  %v1402_v3 = vrot.slane %v7299_v51, 1  ;;  %v1404_v1 = vrot.slane %v7309_v46, 1  ;;  %v1401_v27 = vrot.slane %v7302_v24, 1 }
  0xf7   : > { %v1168_v33 = vsel %vm1159_vm3, %v7183_v53, %v1135_v44  ;;  %v1238_v34 = vrot.slane %v1169_v39, 7  ;;  %v1065_v17 = vpop.xlane.xlu1 %1064  ;;  %v7319_v6 = vsel %vm1383_vm5, %v1396_v50, %v1397_v58 }
  0xf8   : > { %v1237_v35 = vrot.slane %v1168_v33, 7  ;;  %v1062_v18 = vpop.xlane.xlu0 %1061  ;;  %v1138_v41 = vmul.f32 0.25, %v1065_v17  ;;  %v7322_v52 = vsel %vm1383_vm5, %v1402_v3, %v1404_v1  ;;  %v7344_v1 = vsel %vm1383_vm5, %v1401_v27, %v1402_v3 }
  0xf9   : > { %v1137_v57 = vmul.f32 0.25, %v1062_v18  ;;  %1471 = vrot.lane.b32.xlu1 %v7319_v6, %s9993_s30  ;;  %1477 = vrot.lane.b32.xlu0 %v7322_v52, %s9993_s30  ;;  %v7335_v19 = vsel %vm1224_vm4, %v1238_v34, 0.0 }
  0xfa   : > { %v7325_v53 = vsel %vm1224_vm4, %v1237_v35, %v1238_v34  ;;  %v7328_v7 = vsel %vm1224_vm4, 0.0, %v1237_v35  ;;  %v1171_v58 = vsel %vm1159_vm3, %v7185_v54, %v1138_v41  ;;  %v1409_v43 = vrot.slane %v7335_v19, 1 }
  0xfb   : > { %v1170_v20 = vsel %vm1159_vm3, %v7187_v59, %v1137_v57  ;;  %v1407_v31 = vrot.slane %v7325_v53, 1  ;;  %v1241_v44 = vrot.slane %v1171_v58, 7  ;;  %v1071_v39 = vpop.xlane.xlu1 %1070  ;;  %v1406_v54 = vrot.slane %v7328_v7, 1 }
  0xfc   : > { %v1240_v50 = vrot.slane %v1170_v20, 7  ;;  %v1068_v33 = vpop.xlane.xlu0 %1067  ;;  %v1140_v35 = vmul.f32 0.25, %v1071_v39 }
  0xfd   : > { %v1139_v34 = vmul.f32 0.25, %v1068_v33  ;;  %v7347_v17 = vsel %vm1383_vm5, %v1407_v31, %v1409_v43  ;;  %1475 = vrot.lane.b32.xlu1 %v7344_v1, %s9993_s30  ;;  %v7361_v3 = vsel %vm1224_vm4, %v1241_v44, 0.0 }
  0xfe   : > { %v7351_v59 = vsel %vm1224_vm4, %v1240_v50, %v1241_v44  ;;  %v7354_v18 = vsel %vm1224_vm4, 0.0, %v1240_v50  ;;  %1481 = vrot.lane.b32.xlu0 %v7347_v17, %s9993_s30  ;;  %v1173_v27 = vsel %vm1159_vm3, %v7189_v60, %v1140_v35  ;;  %v1414_v58 = vrot.slane %v7361_v3, 1 }
  0xff   : > { %10037 = vst [vmem:[#allocation11_spill] sm:$0xff] %v7354_v18  ;;  %v1172_v41 = vsel %vm1159_vm3, %v7191_v61, %v1139_v34  ;;  %v1412_v57 = vrot.slane %v7351_v59, 1  ;;  %v1244_v20 = vrot.slane %v1173_v27, 7  ;;  %v1077_v50 = vpop.xlane.xlu1 %1076  ;;  %v1411_v33 = vrot.slane %v7354_v18, 1 }
 0x100   : > { %v1243_v43 = vrot.slane %v1172_v41, 7  ;;  %v1074_v39 = vpop.xlane.xlu0 %1073  ;;  %v1142_v16 = vmul.f32 0.25, %v1077_v50  ;;  %v7371_v44 = vsel %vm1383_vm5, %v1406_v54, %v1407_v31 }
 0x101   : > { %v1141_v45 = vmul.f32 0.25, %v1074_v39  ;;  %v7374_v60 = vsel %vm1383_vm5, %v1412_v57, %v1414_v58  ;;  %1479 = vrot.lane.b32.xlu1 %v7371_v44, %s9993_s30  ;;  %v7387_v34 = vsel %vm1224_vm4, %v1244_v20, 0.0  ;;  %v7396_v30 = vsel %vm1383_vm5, %v1411_v33, %v1412_v57 }
 0x102   : > { %v7377_v61 = vsel %vm1224_vm4, %v1243_v43, %v1244_v20  ;;  %v7380_v35 = vsel %vm1224_vm4, 0.0, %v1243_v43  ;;  %1485 = vrot.lane.b32.xlu0 %v7374_v60, %s9993_s30  ;;  %v1175_v31 = vsel %vm1159_vm3, %v7193_v62, %v1142_v16  ;;  %v1419_v41 = vrot.slane %v7387_v34, 1 }
 0x103   : > { %v1174_v54 = vsel %vm1159_vm3, %v7195_v63, %v1141_v45  ;;  %v1417_v27 = vrot.slane %v7377_v61, 1  ;;  %v1247_v58 = vrot.slane %v1175_v31, 7  ;;  %v1083_v50 = vpop.xlane.xlu1 %1082  ;;  %v1416_v16 = vrot.slane %v7380_v35, 1 }
 0x104   : > { %v1246_v43 = vrot.slane %v1174_v54, 7  ;;  %v1080_v39 = vpop.xlane.xlu0 %1079  ;;  %v1144_v29 = vmul.f32 0.25, %v1083_v50 }
 0x105   : > { %v1143_v20 = vmul.f32 0.25, %v1080_v39  ;;  %v7399_v26 = vsel %vm1383_vm5, %v1417_v27, %v1419_v41  ;;  %1483 = vrot.lane.b32.xlu1 %v7396_v30, %s9993_s30  ;;  %v7413_v63 = vsel %vm1224_vm4, %v1247_v58, 0.0 }
 0x106   : > { %v7403_v45 = vsel %vm1224_vm4, %v1246_v43, %v1247_v58  ;;  %v7406_v62 = vsel %vm1224_vm4, 0.0, %v1246_v43  ;;  %1489 = vrot.lane.b32.xlu0 %v7399_v26, %s9993_s30  ;;  %10039 = vst [vmem:[#allocation13_spill] sm:$0xff] %v7413_v63  ;;  %v1177_v57 = vsel %vm1159_vm3, %v7197_v0, %v1144_v29  ;;  %v1424_v54 = vrot.slane %v7413_v63, 1 }
 0x107   : > { %10038 = vst [vmem:[#allocation12_spill] sm:$0xff] %v7403_v45  ;;  %v1176_v33 = vsel %vm1159_vm3, %v7199_v4, %v1143_v20  ;;  %v1422_v31 = vrot.slane %v7403_v45, 1  ;;  %v1250_v41 = vrot.slane %v1177_v57, 7  ;;  %v1089_v50 = vpop.xlane.xlu1 %1088  ;;  %v1421_v25 = vrot.slane %v7406_v62, 1 }
 0x108   : > { %v1249_v43 = vrot.slane %v1176_v33, 7  ;;  %v1086_v39 = vpop.xlane.xlu0 %1085  ;;  %v1146_v22 = vmul.f32 0.25, %v1089_v50  ;;  %v7423_v58 = vsel %vm1383_vm5, %v1416_v16, %v1417_v27 }
 0x109   : > { %v1145_v10 = vmul.f32 0.25, %v1086_v39  ;;  %v7426_v0 = vsel %vm1383_vm5, %v1422_v31, %v1424_v54  ;;  %1487 = vrot.lane.b32.xlu1 %v7423_v58, %s9993_s30  ;;  %v7439_v20 = vsel %vm1224_vm4, %v1250_v41, 0.0  ;;  %v7448_v63 = vsel %vm1383_vm5, %v1421_v25, %v1422_v31 }
 0x10a   : > { %10040 = vst [vmem:[#allocation14_spill] sm:$0xff] %v7426_v0  ;;  %v7429_v4 = vsel %vm1224_vm4, %v1249_v43, %v1250_v41  ;;  %v7432_v29 = vsel %vm1224_vm4, 0.0, %v1249_v43  ;;  %1493 = vrot.lane.b32.xlu0 %v7426_v0, %s9993_s30  ;;  %10042 = vst [vmem:[#allocation16_spill] sm:$0xff] %v7439_v20  ;;  %v1179_v27 = vsel %vm1159_vm3, %v7201_v5, %v1146_v22  ;;  %v1429_v33 = vrot.slane %v7439_v20, 1 }
 0x10b   : > { %10041 = vst [vmem:[#allocation15_spill] sm:$0xff] %v7429_v4  ;;  %v1178_v16 = vsel %vm1159_vm3, %v7203_v11, %v1145_v10  ;;  %v1427_v57 = vrot.slane %v7429_v4, 1  ;;  %v1253_v54 = vrot.slane %v1179_v27, 7  ;;  %v1095_v50 = vpop.xlane.xlu1 %1094  ;;  %v1426_v5 = vrot.slane %v7432_v29, 1 }
 0x10c   : > { %v1252_v43 = vrot.slane %v1178_v16, 7  ;;  %v1092_v39 = vpop.xlane.xlu0 %1091  ;;  %v1148_v0 = vmul.f32 0.25, %v1095_v50 }
 0x10d   : > { %v1147_v41 = vmul.f32 0.25, %v1092_v39  ;;  %v7451_v45 = vsel %vm1383_vm5, %v1427_v57, %v1429_v33  ;;  %1491 = vrot.lane.b32.xlu1 %v7448_v63, %s9993_s30  ;;  %v7465_v22 = vsel %vm1224_vm4, %v1253_v54, 0.0 }
 0x10e   : > { %10043 = vst [vmem:[#allocation17_spill] sm:$0xff] %v7451_v45  ;;  %v7455_v11 = vsel %vm1224_vm4, %v1252_v43, %v1253_v54  ;;  %v7458_v10 = vsel %vm1224_vm4, 0.0, %v1252_v43  ;;  %1497 = vrot.lane.b32.xlu0 %v7451_v45, %s9993_s30  ;;  %10045 = vst [vmem:[#allocation19_spill] sm:$0xff] %v7465_v22  ;;  %v1181_v25 = vsel %vm1159_vm3, %v7205_v12, %v1148_v0  ;;  %v1434_v16 = vrot.slane %v7465_v22, 1 }
 0x10f   : > { %10044 = vst [vmem:[#allocation18_spill] sm:$0xff] %v7455_v11  ;;  %v1180_v31 = vsel %vm1159_vm3, %v7207_v13, %v1147_v41  ;;  %v1432_v27 = vrot.slane %v7455_v11, 1  ;;  %v1256_v33 = vrot.slane %v1181_v25, 7  ;;  %v1101_v50 = vpop.xlane.xlu1 %1100  ;;  %v1431_v20 = vrot.slane %v7458_v10, 1 }
 0x110   : > { %v1255_v43 = vrot.slane %v1180_v31, 7  ;;  %v1098_v39 = vpop.xlane.xlu0 %1097  ;;  %v1150_v45 = vmul.f32 0.25, %v1101_v50  ;;  %v7475_v54 = vsel %vm1383_vm5, %v1426_v5, %v1427_v57 }
 0x111   : > { %v1149_v4 = vmul.f32 0.25, %v1098_v39  ;;  %v7478_v12 = vsel %vm1383_vm5, %v1432_v27, %v1434_v16  ;;  %1495 = vrot.lane.b32.xlu1 %v7475_v54, %s9993_s30  ;;  %v7491_v41 = vsel %vm1224_vm4, %v1256_v33, 0.0  ;;  %v7500_v22 = vsel %vm1383_vm5, %v1431_v20, %v1432_v27 }
 0x112   : > { %10046 = vst [vmem:[#allocation20_spill] sm:$0xff] %v7478_v12  ;;  %v7481_v13 = vsel %vm1224_vm4, %v1255_v43, %v1256_v33  ;;  %v7484_v0 = vsel %vm1224_vm4, 0.0, %v1255_v43  ;;  %1501 = vrot.lane.b32.xlu0 %v7478_v12, %s9993_s30  ;;  %10047 = vst [vmem:[#allocation21_spill] sm:$0xff] %v7491_v41  ;;  %v1183_v57 = vsel %vm1159_vm3, %v7209_v14, %v1150_v45  ;;  %v1439_v31 = vrot.slane %v7491_v41, 1 }
 0x113   : > { %v1182_v5 = vsel %vm1159_vm3, %v7211_v15, %v1149_v4  ;;  %v1437_v25 = vrot.slane %v7481_v13, 1  ;;  %v1259_v16 = vrot.slane %v1183_v57, 7  ;;  %v1107_v50 = vpop.xlane.xlu1 %1106  ;;  %v1436_v14 = vrot.slane %v7484_v0, 1 }
 0x114   : > { %v1258_v43 = vrot.slane %v1182_v5, 7  ;;  %v1104_v39 = vpop.xlane.xlu0 %1103  ;;  %v1152_v12 = vmul.f32 0.25, %v1107_v50 }
 0x115   : > { %v1151_v33 = vmul.f32 0.25, %v1104_v39  ;;  %v7503_v11 = vsel %vm1383_vm5, %v1437_v25, %v1439_v31  ;;  %1499 = vrot.lane.b32.xlu1 %v7500_v22, %s9993_s30  ;;  %v7517_v4 = vsel %vm1224_vm4, %v1259_v16, 0.0  ;;  %v7526_v50 = vsel %vm1383_vm5, %v1436_v14, %v1437_v25 }
 0x116   : > { %v7507_v15 = vsel %vm1224_vm4, %v1258_v43, %v1259_v16  ;;  %v7510_v45 = vsel %vm1224_vm4, 0.0, %v1258_v43  ;;  %1505 = vrot.lane.b32.xlu0 %v7503_v11, %s9993_s30  ;;  %10048 = vst [vmem:[#allocation22_spill] sm:$0xff] %v7517_v4  ;;  %v1185_v20 = vsel %vm1159_vm3, %v7213_v21, %v1152_v12  ;;  %v1444_v5 = vrot.slane %v7517_v4, 1 }
 0x117   : > { %v1184_v27 = vsel %vm1159_vm3, %v7215_v2, %v1151_v33  ;;  %v1442_v57 = vrot.slane %v7507_v15, 1  ;;  %v1262_v31 = vrot.slane %v1185_v20, 7  ;;  %v1441_v16 = vrot.slane %v7510_v45, 1 }
 0x118   : > { %v1261_v43 = vrot.slane %v1184_v27, 7  ;;  %v10052_v2 = vmov 0.0   ;;  %v1557_v27 = vrot.slane %v7232_v42, 2 }
 0x119   : > { %v7529_v39 = vsel %vm1383_vm5, %v1442_v57, %v1444_v5  ;;  %1503 = vrot.lane.b32.xlu1 %v7526_v50, %s9993_s30  ;;  %v7543_v12 = vrot.slane %v10052_v2, 2  ;;  %v7546_v25 = vsel %vm1383_vm5, %v1441_v16, %v1442_v57  ;;  %v1558_v57 = vrot.slane %v7235_v47, 2 }
 0x11a   : > { %10049 = vst [vmem:[#allocation23_spill] sm:$0xff] %v7529_v39  ;;  %v7533_v41 = vsel %vm1224_vm4, %v1261_v43, %v1262_v31  ;;  %v7536_v21 = vsel %vm1224_vm4, 0.0, %v1261_v43  ;;  %1509 = vrot.lane.b32.xlu0 %v7529_v39, %s9993_s30  ;;  %v7568_v5 = vsel %vm1224_vm4, %v1262_v31, 0.0  ;;  %v734_v31 = vld [vmem:[%s9961_s4] sm:$0xf] }
 0x11b   : > { %10050 = vst [vmem:[#allocation24_spill] sm:$0xff] %v7533_v41  ;;  %10051 = vst [vmem:[#allocation25_spill] sm:$0xff] %v7536_v21  ;;  %v1446_v33 = vrot.slane %v7536_v21, 1  ;;  %v1447_v14 = vrot.slane %v7533_v41, 1  ;;  %v1559_v43 = vsel %vm1554_vm6, %v1557_v27, %v1558_v57  ;;  %v1449_v16 = vrot.slane %v7568_v5, 1  ;;  %6056 = vmatpush3.msk.msra.mxu1 %vm658_vm1, %v734_v31  ;;  %v2566_v27 = vld [vmem:[%s9965_s8 + $0x8] sm:$0xff] }
 0x11c   : > { %10053 = vst [vmem:[#allocation26_spill] sm:$0xff] %v7543_v12  ;;  %10055 = vst [vmem:[#allocation28_spill] sm:$0xff] %v7568_v5  ;;  %v1582_v21 = vrot.slane %v7354_v18, 2 }
 0x11d   : > { %1507 = vrot.lane.b32.xlu1 %v7546_v25, %s9993_s30  ;;  %v7555_v20 = vsel %vm1383_vm5, %v1446_v33, %v1447_v14  ;;  %v1560_v33 = vrot.slane %v7238_v48, 2  ;;  %v654_v48 = vld [vmem:[%s9960_s3] sm:$0x1] }
 0x11e   : > { %1632 = vrot.lane.b32.xlu0 %v7543_v12, %s6749_s16  ;;  %10054 = vst [vmem:[#allocation27_spill] sm:$0xff] %v7555_v20 }
 0x121   : > { %1511 = vrot.lane.b32.xlu1 %v7555_v20, %s9993_s30  ;;  %s6755_s30 = smov 16  }
 0x122   : > { %1728 = vrot.lane.b32.xlu0 %v7235_v47, %s6750_s17 }
 0x125   : > { %1726 = vrot.lane.b32.xlu1 %v7232_v42, %s6750_s17 }
 0x126   : > { %1830 = vrot.lane.b32.xlu0 %v7267_v28, %s6751_s18  ;;  %v7577_v28 = vsel %vm1383_vm5, %v1447_v14, %v1449_v16  ;;  %v2565_v14 = vld [vmem:[%s9965_s8] sm:$0xff]  ;;  %v1562_v16 = vrot.slane %v7252_v9, 2 }
 0x127   : > { %10056 = vst [vmem:[#allocation29_spill] sm:$0xff] %v7577_v28 }
 0x129   : > { %1828 = vrot.lane.b32.xlu1 %v7245_v55, %s6751_s18  ;;  %v1561_v55 = vsel %vm1554_vm6, %v1558_v57, %v1560_v33  ;;  %v6375_v57 = vpack.c.bf16 %v2566_v27, %v2565_v14  ;;  %v1563_v33 = vrot.slane %v7249_v8, 2  ;;  %v1568_v14 = vrot.slane %v7273_v49, 2 }
 0x12a   : > { %1634 = vrot.lane.b32.xlu0 %v1559_v43, %s6749_s16 }
 0x12b   : > { %6376 = vmatprep.subr.bf16.mxu1 %v6375_v57  ;;  %v1564_v2 = vsel %vm1554_vm6, %v1562_v16, %v1563_v33 }
 0x12d   : > { %1929 = vrot.lane.b32.xlu1 %v1559_v43, %s6753_s21 }
 0x12e   : > { %2025 = vrot.lane.b32.xlu0 %v7252_v9, %s6752_s19 }
 0x131   : > { %1931 = vrot.lane.b32.xlu1 %v1561_v55, %s6753_s21 }
 0x132   : > { %1730 = vrot.lane.b32.xlu0 %v7252_v9, %s6750_s17 }
 0x135   : > { %1636 = vrot.lane.b32.xlu1 %v1561_v55, %s6749_s16 }
 0x136   : > { %2118 = vrot.lane.b32.xlu0 %v7292_v32, %s6754_s28 }
 0x138   : > { %v728_v43 = vpop.f32.mrb[0].mxu0 }
 0x139   : > { %v729_v31 = vadd.f32 %v728_v43, %v654_v48  ;;  %v6054_v12 = vpop.f32.mrb[1].mxu0  ;;  %2027 = vrot.lane.b32.xlu1 %v7249_v8, %s6752_s19 }
 0x13a   : > { %1832 = vrot.lane.b32.xlu0 %v7292_v32, %s6751_s18  ;;  %v2567_v12 = vld [vmem:[%s9965_s8 + $0x10] sm:$0x3]  ;;  %v1565_v32 = vrot.slane %v7257_v23, 2  ;;  %v7633_v23 = vpop.xlane.xlu1 %1112 }
 0x13b   : > { %v732_v55 = vmax.f32 %v729_v31, 0.0  ;;  %10058 = vst [vmem:[#allocation31_spill] sm:$0xff] %v7633_v23  ;;  %v1570_v31 = vrot.slane %v7283_v38, 2 }
 0x13c   : > { %v1566_v48 = vsel %vm1554_vm6, %v1563_v33, %v1565_v32 }
 0x13d   : > { %v733_v5 = vadd.f32 %v732_v55, %v7114_v36  ;;  %1732 = vrot.lane.b32.xlu1 %v7249_v8, %s6750_s17  ;;  %v1571_v32 = vsel %vm1554_vm6, %v1568_v14, %v1570_v31  ;;  %v1572_v31 = vrot.slane %v7302_v24, 2  ;;  %v1573_v36 = vrot.slane %v7299_v51, 2 }
 0x13e   : > { %2211 = vrot.lane.b32.xlu0 %v1564_v2, %s6755_s30  ;;  %v7642_v27 = vpop.xlane.xlu1 %1118 }
 0x13f   : > { %6058 = vmatmul.mubr.msk.f32.vlgmr.msra.gmra.mrb[0].mxu1 %vm581_vm0, %v733_v5  ;;  %v7628_v5 = vpop.xlane.xlu0 %1109  ;;  %10060 = vst [vmem:[#allocation33_spill] sm:$0xff] %v7642_v27 }
 0x140   : > { %6378 = vmatpush3.bf16.msra.mxu1 %v6375_v57  ;;  %10057 = vst [vmem:[#allocation30_spill] sm:$0xff] %v7628_v5 }
 0x141   : > { %6069 = vmatprep.subr.msk.mxu1 %vm2672_vm7, %v2567_v12  ;;  %2120 = vrot.lane.b32.xlu1 %v7270_v40, %s6754_s28 }
 0x142   : > { %1933 = vrot.lane.b32.xlu0 %v1564_v2, %s6753_s21  ;;  %v7654_v16 = vpop.xlane.xlu1 %1124 }
 0x143   : > { %10062 = vst [vmem:[#allocation35_spill] sm:$0xff] %v7654_v16 }
 0x144   : > { %6070 = vmatpush3.msk.msra.mxu1 %vm2672_vm7, %v2567_v12 }
 0x145   : > { %1834 = vrot.lane.b32.xlu1 %v7270_v40, %s6751_s18  ;;  %v7638_v40 = vpop.xlane.xlu0 %1115 }
 0x146   : > { %1638 = vrot.lane.b32.xlu0 %v1564_v2, %s6749_s16  ;;  %10059 = vst [vmem:[#allocation32_spill] sm:$0xff] %v7638_v40  ;;  %v1567_v2 = vrot.slane %v7276_v37, 2 }
 0x148   : > { %v1569_v57 = vsel %vm1554_vm6, %v1567_v2, %v1568_v14 }
 0x149   : > { %2213 = vrot.lane.b32.xlu1 %v1566_v48, %s6755_s30  ;;  %v7649_v43 = vpop.xlane.xlu0 %1121 }
 0x14a   : > { %2029 = vrot.lane.b32.xlu0 %v7276_v37, %s6752_s19  ;;  %10061 = vst [vmem:[#allocation34_spill] sm:$0xff] %v7649_v43 }
 0x14d   : > { %1935 = vrot.lane.b32.xlu1 %v1566_v48, %s6753_s21 }
 0x14e   : > { %1734 = vrot.lane.b32.xlu0 %v7276_v37, %s6750_s17 }
 0x151   : > { %1640 = vrot.lane.b32.xlu1 %v1566_v48, %s6749_s16 }
 0x152   : > { %2122 = vrot.lane.b32.xlu0 %v7319_v6, %s6754_s28 }
 0x155   : > { %2031 = vrot.lane.b32.xlu1 %v7273_v49, %s6752_s19 }
 0x156   : > { %1836 = vrot.lane.b32.xlu0 %v7319_v6, %s6751_s18  ;;  %v7659_v6 = vpop.permute.xlu0 %1461 }
 0x159   : > { %1736 = vrot.lane.b32.xlu1 %v7273_v49, %s6750_s17 }
 0x15a   : > { %2215 = vrot.lane.b32.xlu0 %v1569_v57, %s6755_s30 }
 0x15d   : > { %2124 = vrot.lane.b32.xlu1 %v7295_v56, %s6754_s28 }
 0x15e   : > { %1937 = vrot.lane.b32.xlu0 %v1569_v57, %s6753_s21 }
 0x15f   : > { %v7661_v33 = vpop.permute.xlu1 %1463 }
 0x161   : > { %1838 = vrot.lane.b32.xlu1 %v7295_v56, %s6751_s18 }
 0x162   : > { %1642 = vrot.lane.b32.xlu0 %v1569_v57, %s6749_s16 }
 0x163   : > { %v7667_v55 = vpop.permute.xlu1 %1465  ;;  %v7669_v12 = vpop.permute.xlu0 %1469 }
 0x165   : > { %2217 = vrot.lane.b32.xlu1 %v1571_v32, %s6755_s30 }
 0x166   : > { %2033 = vrot.lane.b32.xlu0 %v7302_v24, %s6752_s19 }
 0x167   : > { %v7675_v48 = vpop.permute.xlu1 %1467  ;;  %v7677_v2 = vpop.permute.xlu0 %1473 }
 0x169   : > { %1939 = vrot.lane.b32.xlu1 %v1571_v32, %s6753_s21 }
 0x16a   : > { %1738 = vrot.lane.b32.xlu0 %v7302_v24, %s6750_s17 }
 0x16b   : > { %v7682_v38 = vpop.permute.xlu1 %1471  ;;  %v7684_v56 = vpop.permute.xlu0 %1477 }
 0x16d   : > { %1644 = vrot.lane.b32.xlu1 %v1571_v32, %s6749_s16  ;;  %v1574_v32 = vsel %vm1554_vm6, %v1572_v31, %v1573_v36  ;;  %v1575_v31 = vrot.slane %v7309_v46, 2 }
 0x16e   : > { %2126 = vrot.lane.b32.xlu0 %v7344_v1, %s6754_s28 }
 0x16f   : > { %v7689_v14 = vpop.permute.xlu1 %1475 }
 0x170   : > { %v7691_v57 = vpop.permute.xlu0 %1481 }
 0x171   : > { %2035 = vrot.lane.b32.xlu1 %v7299_v51, %s6752_s19 }
 0x172   : > { %1840 = vrot.lane.b32.xlu0 %v7344_v1, %s6751_s18 }
 0x173   : > { %v7699_v43 = vpop.permute.xlu1 %1479 }
 0x174   : > { %v7701_v16 = vpop.permute.xlu0 %1485 }
 0x175   : > { %10063 = vst [vmem:[#allocation36_spill] sm:$0xff] %v7701_v16  ;;  %1740 = vrot.lane.b32.xlu1 %v7299_v51, %s6750_s17  ;;  %v1583_v16 = vrot.slane %v7351_v59, 2 }
 0x176   : > { %2219 = vrot.lane.b32.xlu0 %v1574_v32, %s6755_s30 }
 0x177   : > { %v7707_v40 = vpop.permute.xlu1 %1483  ;;  %v1584_v39 = vsel %vm1554_vm6, %v1582_v21, %v1583_v16 }
 0x178   : > { %v7709_v27 = vpop.permute.xlu0 %1489 }
 0x179   : > { %10064 = vst [vmem:[#allocation37_spill] sm:$0xff] %v7709_v27  ;;  %2128 = vrot.lane.b32.xlu1 %v7322_v52, %s6754_s28  ;;  %v1576_v27 = vsel %vm1554_vm6, %v1573_v36, %v1575_v31  ;;  %v1577_v31 = vrot.slane %v7328_v7, 2 }
 0x17a   : > { %1941 = vrot.lane.b32.xlu0 %v1574_v32, %s6753_s21 }
 0x17b   : > { %v7714_v1 = vpop.permute.xlu1 %1487 }
 0x17c   : > { %10065 = vst [vmem:[#allocation38_spill] sm:$0xff] %v7714_v1  ;;  %v7716_v5 = vpop.permute.xlu0 %1493 }
 0x17d   : > { %10066 = vst [vmem:[#allocation39_spill] sm:$0xff] %v7716_v5  ;;  %1842 = vrot.lane.b32.xlu1 %v7322_v52, %s6751_s18 }
 0x17e   : > { %1646 = vrot.lane.b32.xlu0 %v1574_v32, %s6749_s16 }
 0x17f   : > { %v7722_v23 = vpop.permute.xlu1 %1491 }
 0x180   : > { %10067 = vst [vmem:[#allocation40_spill] sm:$0xff] %v7722_v23  ;;  %v7724_v28 = vpop.permute.xlu0 %1497 }
 0x181   : > { %10068 = vst [vmem:[#allocation41_spill] sm:$0xff] %v7724_v28  ;;  %2221 = vrot.lane.b32.xlu1 %v1576_v27, %s6755_s30 }
 0x182   : > { %2037 = vrot.lane.b32.xlu0 %v7328_v7, %s6752_s19 }
 0x183   : > { %v7730_v1 = vpop.permute.xlu1 %1495 }
 0x184   : > { %10069 = vst [vmem:[#allocation42_spill] sm:$0xff] %v7730_v1  ;;  %v7732_v5 = vpop.permute.xlu0 %1501 }
 0x185   : > { %10070 = vst [vmem:[#allocation43_spill] sm:$0xff] %v7732_v5  ;;  %1943 = vrot.lane.b32.xlu1 %v1576_v27, %s6753_s21  ;;  %v1578_v5 = vrot.slane %v7325_v53, 2 }
 0x186   : > { %1742 = vrot.lane.b32.xlu0 %v7328_v7, %s6750_s17 }
 0x187   : > { %v7737_v46 = vpop.permute.xlu1 %1499  ;;  %v1579_v28 = vsel %vm1554_vm6, %v1577_v31, %v1578_v5 }
 0x188   : > { %10071 = vst [vmem:[#allocation44_spill] sm:$0xff] %v7737_v46  ;;  %v7739_v52 = vpop.permute.xlu0 %1505 }
 0x189   : > { %10072 = vst [vmem:[#allocation45_spill] sm:$0xff] %v7739_v52  ;;  %1648 = vrot.lane.b32.xlu1 %v1576_v27, %s6749_s16 }
 0x18a   : > { %2130 = vrot.lane.b32.xlu0 %v7371_v44, %s6754_s28 }
 0x18b   : > { %v7744_v36 = vpop.permute.xlu1 %1503 }
 0x18c   : > { %10073 = vst [vmem:[#allocation46_spill] sm:$0xff] %v7744_v36  ;;  %v7746_v32 = vpop.permute.xlu0 %1509 }
 0x18d   : > { %10074 = vst [vmem:[#allocation47_spill] sm:$0xff] %v7746_v32  ;;  %2039 = vrot.lane.b32.xlu1 %v7325_v53, %s6752_s19 }
 0x18e   : > { %1844 = vrot.lane.b32.xlu0 %v7371_v44, %s6751_s18 }
 0x18f   : > { %v7754_v52 = vpop.permute.xlu1 %1507 }
 0x190   : > { %10075 = vst [vmem:[#allocation48_spill] sm:$0xff] %v7754_v52  ;;  %v1633_v46 = vpop.permute.xlu0 %1632  ;;  %v1580_v52 = vrot.slane %v7335_v19, 2 }
 0x191   : > { %1744 = vrot.lane.b32.xlu1 %v7325_v53, %s6750_s17 }
 0x192   : > { %2223 = vrot.lane.b32.xlu0 %v1579_v28, %s6755_s30 }
 0x193   : > { %v7760_v27 = vpop.permute.xlu1 %1511 }
 0x194   : > { %10076 = vst [vmem:[#allocation49_spill] sm:$0xff] %v7760_v27  ;;  %v1729_v32 = vpop.permute.xlu0 %1728  ;;  %v1581_v27 = vsel %vm1554_vm6, %v1578_v5, %v1580_v52 }
 0x195   : > { %2132 = vrot.lane.b32.xlu1 %v7347_v17, %s6754_s28 }
 0x196   : > { %1945 = vrot.lane.b32.xlu0 %v1579_v28, %s6753_s21 }
 0x197   : > { %v1727_v44 = vpop.permute.xlu1 %1726 }
 0x198   : > { %v1831_v36 = vpop.permute.xlu0 %1830 }
 0x199   : > { %1846 = vrot.lane.b32.xlu1 %v7347_v17, %s6751_s18  ;;  %v2305_v17 = vsel %vm2304_vm8, 0.0, %v7659_v6 }
 0x19a   : > { %1650 = vrot.lane.b32.xlu0 %v1579_v28, %s6749_s16  ;;  %v2336_v20 = vsel %vm581_vm0, %v2305_v17, %v1633_v46 }
 0x19b   : > { %v1829_v31 = vpop.permute.xlu1 %1828 }
 0x19c   : > { %v7769_v1 = vpop.permute.xlu0 %1634 }
 0x19d   : > { %2225 = vrot.lane.b32.xlu1 %v1581_v27, %s6755_s30 }
 0x19e   : > { %2041 = vrot.lane.b32.xlu0 %v7354_v18, %s6752_s19 }
 0x19f   : > { %v1930_v23 = vpop.permute.xlu1 %1929 }
 0x1a0   : > { %v2026_v41 = vpop.permute.xlu0 %2025 }
 0x1a1   : > { %1947 = vrot.lane.b32.xlu1 %v1581_v27, %s6753_s21 }
 0x1a2   : > { %1746 = vrot.lane.b32.xlu0 %v7354_v18, %s6750_s17 }
 0x1a3   : > { %v1932_v19 = vpop.permute.xlu1 %1931 }
 0x1a4   : > { %v7778_v28 = vpop.permute.xlu0 %1730 }
 0x1a5   : > { %1652 = vrot.lane.b32.xlu1 %v1581_v27, %s6749_s16  ;;  %v2368_v27 = vsel %vm2367_vm9, %v2336_v20, %v1727_v44 }
 0x1a6   : > { %2134 = vrot.lane.b32.xlu0 %v7396_v30, %s6754_s28  ;;  %v2401_v6 = vsel %vm2400_vm11, %v2368_v27, %v1829_v31 }
 0x1a7   : > { %v7785_v5 = vpop.permute.xlu1 %1636  ;;  %v2434_v4 = vsel %vm2433_vm10, %v2401_v6, %v1930_v23  ;;  %v1585_v6 = vrot.slane %v7361_v3, 2 }
 0x1a8   : > { %v2119_v52 = vpop.permute.xlu0 %2118  ;;  %v2467_v44 = vsel %vm2466_vm12, %v2434_v4, %v2026_v41  ;;  %v2369_v41 = vsel %vm2367_vm9, %v2336_v20, %v1729_v32 }
 0x1a9   : > { %2043 = vrot.lane.b32.xlu1 %v7351_v59, %s6752_s19 }
 0x1aa   : > { %1848 = vrot.lane.b32.xlu0 %v7396_v30, %s6751_s18  ;;  %v2500_v30 = vsel %vm2499_vm13, %v2467_v44, %v2119_v52  ;;  %v2402_v44 = vsel %vm2400_vm11, %v2369_v41, %v1831_v36 }
 0x1ab   : > { %v2028_v46 = vpop.permute.xlu1 %2027 }
 0x1ac   : > { %v1833_v17 = vpop.permute.xlu0 %1832 }
 0x1ad   : > { %1748 = vrot.lane.b32.xlu1 %v7351_v59, %s6750_s17 }
 0x1ae   : > { %2227 = vrot.lane.b32.xlu0 %v1584_v39, %s6755_s30 }
 0x1af   : > { %v7803_v18 = vpop.permute.xlu1 %1732 }
 0x1b0   : > { %v2212_v31 = vpop.permute.xlu0 %2211 }
 0x1b1   : > { %v2533_v23 = vsel %vm2532_vm14, %v2500_v30, %v2212_v31  ;;  %2136 = vrot.lane.b32.xlu1 %v7374_v60, %s6754_s28  ;;  %v1586_v30 = vsel %vm1554_vm6, %v1583_v16, %v1585_v6  ;;  %v2435_v31 = vsel %vm2433_vm10, %v2402_v44, %v1932_v19  ;;  %v2306_v6 = vsel %vm2304_vm8, %v7232_v42, %v7661_v33 }
 0x1b2   : > { %1949 = vrot.lane.b32.xlu0 %v1584_v39, %s6753_s21  ;;  %6071 = vmatprep.mubr.msk.f32.mxu1 %vm2575_vm15, %v2533_v23  ;;  %v2468_v3 = vsel %vm2466_vm12, %v2435_v31, %v2028_v46  ;;  %v1587_v23 = vrot.slane %v7380_v35, 2  ;;  %v2337_v41 = vsel %vm581_vm0, %v2306_v6, %v7769_v1 }
 0x1b3   : > { %v2121_v21 = vpop.permute.xlu1 %2120  ;;  %v2370_v44 = vsel %vm2367_vm9, %v2337_v41, %v7778_v28 }
 0x1b4   : > { %v1934_v27 = vpop.permute.xlu0 %1933 }
 0x1b5   : > { %1850 = vrot.lane.b32.xlu1 %v7374_v60, %s6751_s18  ;;  %v2501_v60 = vsel %vm2499_vm13, %v2468_v3, %v2121_v21  ;;  %v1588_v21 = vrot.slane %v7377_v61, 2  ;;  %v2403_v3 = vsel %vm2400_vm11, %v2370_v44, %v1833_v17 }
 0x1b6   : > { %1654 = vrot.lane.b32.xlu0 %v1584_v39, %s6749_s16  ;;  %v2436_v42 = vsel %vm2433_vm10, %v2403_v3, %v1934_v27 }
 0x1b7   : > { %v1835_v4 = vpop.permute.xlu1 %1834 }
 0x1b8   : > { %v7815_v52 = vpop.permute.xlu0 %1638 }
 0x1b9   : > { %2229 = vrot.lane.b32.xlu1 %v1586_v30, %s6755_s30 }
 0x1ba   : > { %2045 = vrot.lane.b32.xlu0 %v7380_v35, %s6752_s19 }
 0x1bb   : > { %v2214_v39 = vpop.permute.xlu1 %2213 }
 0x1bc   : > { %v2030_v20 = vpop.permute.xlu0 %2029  ;;  %v2534_v32 = vsel %vm2532_vm14, %v2501_v60, %v2214_v39  ;;  %v1589_v60 = vsel %vm1554_vm6, %v1587_v23, %v1588_v21 }
 0x1bd   : > { %1951 = vrot.lane.b32.xlu1 %v1586_v30, %s6753_s21  ;;  %6072 = vmatmul.mubr.msk.f32.vlgmr.msra.gmra.mrb[2].mxu1 %vm2575_vm15, %v2534_v32  ;;  %v1590_v32 = vrot.slane %v7387_v34, 2 }
 0x1be   : > { %1750 = vrot.lane.b32.xlu0 %v7380_v35, %s6750_s17 }
 0x1bf   : > { %v1936_v16 = vpop.permute.xlu1 %1935  ;;  %v1591_v44 = vsel %vm1554_vm6, %v1588_v21, %v1590_v32 }
 0x1c0   : > { %v7830_v36 = vpop.permute.xlu0 %1734 }
 0x1c1   : > { %1656 = vrot.lane.b32.xlu1 %v1586_v30, %s6749_s16 }
 0x1c2   : > { %2138 = vrot.lane.b32.xlu0 %v7423_v58, %s6754_s28 }
 0x1c3   : > { %v7835_v19 = vpop.permute.xlu1 %1640 }
 0x1c4   : > { %v2123_v46 = vpop.permute.xlu0 %2122 }
 0x1c5   : > { %2047 = vrot.lane.b32.xlu1 %v7377_v61, %s6752_s19 }
 0x1c6   : > { %1852 = vrot.lane.b32.xlu0 %v7423_v58, %s6751_s18  ;;  %v2469_v58 = vsel %vm2466_vm12, %v2436_v42, %v2030_v20  ;;  %v2307_v20 = vsel %vm2304_vm8, %v7235_v47, %v7667_v55  ;;  %v10077_v42 = vld [vmem:[#allocation12_spill] sm:$0xff] }
 0x1c7   : > { %v2032_v30 = vpop.permute.xlu1 %2031  ;;  %v2502_v33 = vsel %vm2499_vm13, %v2469_v58, %v2123_v46  ;;  %v2338_v46 = vsel %vm581_vm0, %v2307_v20, %v7785_v5  ;;  %v1593_v58 = vrot.slane %v10077_v42, 2 }
 0x1c8   : > { %v1837_v31 = vpop.permute.xlu0 %1836  ;;  %v2371_v23 = vsel %vm2367_vm9, %v2338_v46, %v7803_v18 }
 0x1c9   : > { %1752 = vrot.lane.b32.xlu1 %v7377_v61, %s6750_s17  ;;  %v2404_v34 = vsel %vm2400_vm11, %v2371_v23, %v1835_v4 }
 0x1ca   : > { %2231 = vrot.lane.b32.xlu0 %v1589_v60, %s6755_s30  ;;  %v2437_v47 = vsel %vm2433_vm10, %v2404_v34, %v1936_v16 }
 0x1cb   : > { %v7858_v1 = vpop.permute.xlu1 %1736 }
 0x1cc   : > { %v2216_v28 = vpop.permute.xlu0 %2215 }
 0x1cd   : > { %v2535_v39 = vsel %vm2532_vm14, %v2502_v33, %v2216_v28  ;;  %2140 = vrot.lane.b32.xlu1 %v7399_v26, %s6754_s28  ;;  %v2308_v33 = vsel %vm2304_vm8, %v7252_v9, %v7675_v48 }
 0x1ce   : > { %1953 = vrot.lane.b32.xlu0 %v1589_v60, %s6753_s21  ;;  %6074 = vmatprep.mubr.msk.f32.mxu1 %vm2575_vm15, %v2535_v39  ;;  %v2339_v28 = vsel %vm581_vm0, %v2308_v33, %v7815_v52 }
 0x1cf   : > { %v2125_v17 = vpop.permute.xlu1 %2124  ;;  %v2372_v39 = vsel %vm2367_vm9, %v2339_v28, %v7830_v36 }
 0x1d0   : > { %v1938_v27 = vpop.permute.xlu0 %1937  ;;  %v2405_v20 = vsel %vm2400_vm11, %v2372_v39, %v1837_v31  ;;  %v10078_v31 = vld [vmem:[#allocation14_spill] sm:$0xff] }
 0x1d1   : > { %1854 = vrot.lane.b32.xlu1 %v7399_v26, %s6751_s18  ;;  %v2470_v26 = vsel %vm2466_vm12, %v2437_v47, %v2032_v30  ;;  %v2438_v9 = vsel %vm2433_vm10, %v2405_v20, %v1938_v27  ;;  %v10080_v20 = vld [vmem:[#allocation15_spill] sm:$0xff] }
 0x1d2   : > { %1658 = vrot.lane.b32.xlu0 %v1589_v60, %s6749_s16  ;;  %v2503_v55 = vsel %vm2499_vm13, %v2470_v26, %v2125_v17  ;;  %v1592_v60 = vrot.slane %v7406_v62, 2  ;;  %v2309_v26 = vsel %vm2304_vm8, %v7249_v8, %v7669_v12 }
 0x1d3   : > { %v1839_v6 = vpop.permute.xlu1 %1838 }
 0x1d4   : > { %v7876_v41 = vpop.permute.xlu0 %1642  ;;  %v1594_v46 = vsel %vm1554_vm6, %v1592_v60, %v1593_v58 }
 0x1d5   : > { %2233 = vrot.lane.b32.xlu1 %v1591_v44, %s6755_s30 }
 0x1d6   : > { %2049 = vrot.lane.b32.xlu0 %v7406_v62, %s6752_s19 }
 0x1d7   : > { %v2218_v5 = vpop.permute.xlu1 %2217 }
 0x1d8   : > { %v2034_v18 = vpop.permute.xlu0 %2033  ;;  %v2536_v3 = vsel %vm2532_vm14, %v2503_v55, %v2218_v5  ;;  %v2340_v55 = vsel %vm581_vm0, %v2309_v26, %v7835_v19  ;;  %v10082_v26 = vld [vmem:[#allocation16_spill] sm:$0xff] }
 0x1d9   : > { %1955 = vrot.lane.b32.xlu1 %v1591_v44, %s6753_s21  ;;  %6075 = vmatmul.mubr.msk.f32.gmra.mrb[4].mxu1 %vm2575_vm15, %v2536_v3  ;;  %v2373_v5 = vsel %vm2367_vm9, %v2340_v55, %v7858_v1  ;;  %v1600_v55 = vrot.slane %v10082_v26, 2  ;;  %v10085_v26 = vld [vmem:[#allocation19_spill] sm:$0xff] }
 0x1da   : > { %1754 = vrot.lane.b32.xlu0 %v7406_v62, %s6750_s17 }
 0x1db   : > { %v1940_v4 = vpop.permute.xlu1 %1939 }
 0x1dc   : > { %v7891_v16 = vpop.permute.xlu0 %1738 }
 0x1dd   : > { %1660 = vrot.lane.b32.xlu1 %v1591_v44, %s6749_s16  ;;  %v10079_v44 = vld [vmem:[#allocation13_spill] sm:$0xff] }
 0x1de   : > { %2142 = vrot.lane.b32.xlu0 %v7448_v63, %s6754_s28  ;;  %v1595_v47 = vrot.slane %v10079_v44, 2 }
 0x1df   : > { %v7896_v21 = vpop.permute.xlu1 %1644 }
 0x1e0   : > { %v2127_v30 = vpop.permute.xlu0 %2126  ;;  %v1596_v60 = vsel %vm1554_vm6, %v1593_v58, %v1595_v47 }
 0x1e1   : > { %2051 = vrot.lane.b32.xlu1 %v10077_v42, %s6752_s19 }
 0x1e2   : > { %1856 = vrot.lane.b32.xlu0 %v7448_v63, %s6751_s18  ;;  %v2471_v63 = vsel %vm2466_vm12, %v2438_v9, %v2034_v18  ;;  %v2310_v9 = vsel %vm2304_vm8, %v7276_v37, %v7682_v38 }
 0x1e3   : > { %v2036_v17 = vpop.permute.xlu1 %2035  ;;  %v2504_v48 = vsel %vm2499_vm13, %v2471_v63, %v2127_v30  ;;  %v2406_v30 = vsel %vm2400_vm11, %v2373_v5, %v1839_v6  ;;  %v2341_v63 = vsel %vm581_vm0, %v2310_v9, %v7876_v41  ;;  %v2311_v5 = vsel %vm2304_vm8, %v7273_v49, %v7677_v2 }
 0x1e4   : > { %v1841_v32 = vpop.permute.xlu0 %1840  ;;  %v2439_v8 = vsel %vm2433_vm10, %v2406_v30, %v1940_v4  ;;  %v2342_v30 = vsel %vm581_vm0, %v2311_v5, %v7896_v21  ;;  %v2313_v5 = vsel %vm2304_vm8, %v7299_v51, %v7684_v56 }
 0x1e5   : > { %1756 = vrot.lane.b32.xlu1 %v10077_v42, %s6750_s17  ;;  %v2472_v12 = vsel %vm2466_vm12, %v2439_v8, %v2036_v17  ;;  %v1597_v17 = vrot.slane %v7432_v29, 2 }
 0x1e6   : > { %2235 = vrot.lane.b32.xlu0 %v1594_v46, %s6755_s30 }
 0x1e7   : > { %v7919_v52 = vpop.permute.xlu1 %1740 }
 0x1e8   : > { %v2220_v36 = vpop.permute.xlu0 %2219 }
 0x1e9   : > { %v2537_v23 = vsel %vm2532_vm14, %v2504_v48, %v2220_v36  ;;  %2144 = vrot.lane.b32.xlu1 %v10078_v31, %s6754_s28  ;;  %v2374_v48 = vsel %vm2367_vm9, %v2341_v63, %v7891_v16  ;;  %v1602_v63 = vrot.slane %v7458_v10, 2 }
 0x1ea   : > { %1957 = vrot.lane.b32.xlu0 %v1594_v46, %s6753_s21  ;;  %6077 = vmatprep.mubr.msk.f32.mxu1 %vm2575_vm15, %v2537_v23 }
 0x1eb   : > { %v2129_v27 = vpop.permute.xlu1 %2128 }
 0x1ec   : > { %v1942_v34 = vpop.permute.xlu0 %1941  ;;  %v2505_v19 = vsel %vm2499_vm13, %v2472_v12, %v2129_v27 }
 0x1ed   : > { %1858 = vrot.lane.b32.xlu1 %v10078_v31, %s6751_s18  ;;  %v2407_v31 = vsel %vm2400_vm11, %v2374_v48, %v1841_v32  ;;  %v10081_v32 = vld [vmem:[#allocation17_spill] sm:$0xff]  ;;  %v10083_v48 = vld [vmem:[#allocation18_spill] sm:$0xff] }
 0x1ee   : > { %1662 = vrot.lane.b32.xlu0 %v1594_v46, %s6749_s16  ;;  %v1598_v46 = vrot.slane %v10080_v20, 2  ;;  %v2440_v37 = vsel %vm2433_vm10, %v2407_v31, %v1942_v34  ;;  %v2312_v31 = vsel %vm2304_vm8, %v7302_v24, %v7689_v14 }
 0x1ef   : > { %v1843_v18 = vpop.permute.xlu1 %1842 }
 0x1f0   : > { %v7937_v3 = vpop.permute.xlu0 %1646  ;;  %v1599_v27 = vsel %vm1554_vm6, %v1597_v17, %v1598_v46 }
 0x1f1   : > { %2237 = vrot.lane.b32.xlu1 %v1596_v60, %s6755_s30 }
 0x1f2   : > { %2053 = vrot.lane.b32.xlu0 %v7432_v29, %s6752_s19 }
 0x1f3   : > { %v2222_v33 = vpop.permute.xlu1 %2221 }
 0x1f4   : > { %v2038_v1 = vpop.permute.xlu0 %2037  ;;  %v2538_v28 = vsel %vm2532_vm14, %v2505_v19, %v2222_v33  ;;  %v1601_v33 = vsel %vm1554_vm6, %v1598_v46, %v1600_v55  ;;  %v1605_v55 = vrot.slane %v10085_v26, 2 }
 0x1f5   : > { %1959 = vrot.lane.b32.xlu1 %v1596_v60, %s6753_s21  ;;  %6078 = vmatmul.mubr.msk.f32.gmra.mrb[6].mxu1 %vm2575_vm15, %v2538_v28 }
 0x1f6   : > { %1758 = vrot.lane.b32.xlu0 %v7432_v29, %s6750_s17 }
 0x1f7   : > { %v1944_v6 = vpop.permute.xlu1 %1943 }
 0x1f8   : > { %v7952_v4 = vpop.permute.xlu0 %1742 }
 0x1f9   : > { %1664 = vrot.lane.b32.xlu1 %v1596_v60, %s6749_s16  ;;  %v2375_v60 = vsel %vm2367_vm9, %v2342_v30, %v7919_v52 }
 0x1fa   : > { %2146 = vrot.lane.b32.xlu0 %v7475_v54, %s6754_s28  ;;  %v2408_v19 = vsel %vm2400_vm11, %v2375_v60, %v1843_v18 }
 0x1fb   : > { %v7957_v58 = vpop.permute.xlu1 %1648  ;;  %v2441_v49 = vsel %vm2433_vm10, %v2408_v19, %v1944_v6 }
 0x1fc   : > { %v2131_v39 = vpop.permute.xlu0 %2130  ;;  %v2344_v30 = vsel %vm581_vm0, %v2313_v5, %v7957_v58 }
 0x1fd   : > { %2055 = vrot.lane.b32.xlu1 %v10080_v20, %s6752_s19 }
 0x1fe   : > { %1860 = vrot.lane.b32.xlu0 %v7475_v54, %s6751_s18  ;;  %v2473_v54 = vsel %vm2466_vm12, %v2440_v37, %v2038_v1 }
 0x1ff   : > { %v2040_v36 = vpop.permute.xlu1 %2039  ;;  %v2506_v38 = vsel %vm2499_vm13, %v2473_v54, %v2131_v39 }
 0x200   : > { %v1845_v23 = vpop.permute.xlu0 %1844  ;;  %v2474_v2 = vsel %vm2466_vm12, %v2441_v49, %v2040_v36  ;;  %v1603_v36 = vrot.slane %v10083_v48, 2 }
 0x201   : > { %1760 = vrot.lane.b32.xlu1 %v10080_v20, %s6750_s17 }
 0x202   : > { %2239 = vrot.lane.b32.xlu0 %v1599_v27, %s6755_s30 }
 0x203   : > { %v7980_v41 = vpop.permute.xlu1 %1744 }
 0x204   : > { %v2224_v16 = vpop.permute.xlu0 %2223  ;;  %v2377_v60 = vsel %vm2367_vm9, %v2344_v30, %v7980_v41 }
 0x205   : > { %v2539_v44 = vsel %vm2532_vm14, %v2506_v38, %v2224_v16  ;;  %2148 = vrot.lane.b32.xlu1 %v10081_v32, %s6754_s28 }
 0x206   : > { %1961 = vrot.lane.b32.xlu0 %v1599_v27, %s6753_s21  ;;  %6080 = vmatprep.mubr.msk.f32.mxu1 %vm2575_vm15, %v2539_v44  ;;  %v1604_v44 = vsel %vm1554_vm6, %v1602_v63, %v1603_v36  ;;  %v2314_v63 = vsel %vm2304_vm8, %v7328_v7, %v7699_v43 }
 0x207   : > { %v2133_v34 = vpop.permute.xlu1 %2132 }
 0x208   : > { %v1946_v47 = vpop.permute.xlu0 %1945  ;;  %v2507_v21 = vsel %vm2499_vm13, %v2474_v2, %v2133_v34  ;;  %v1606_v2 = vsel %vm1554_vm6, %v1603_v36, %v1605_v55 }
 0x209   : > { %1862 = vrot.lane.b32.xlu1 %v10081_v32, %s6751_s18 }
 0x20a   : > { %1666 = vrot.lane.b32.xlu0 %v1599_v27, %s6749_s16  ;;  %v2343_v27 = vsel %vm581_vm0, %v2312_v31, %v7937_v3 }
 0x20b   : > { %v1847_v8 = vpop.permute.xlu1 %1846  ;;  %v2376_v37 = vsel %vm2367_vm9, %v2343_v27, %v7952_v4 }
 0x20c   : > { %v7998_v12 = vpop.permute.xlu0 %1650  ;;  %v2409_v16 = vsel %vm2400_vm11, %v2376_v37, %v1845_v23  ;;  %v10084_v23 = vld [vmem:[#allocation20_spill] sm:$0xff]  ;;  %v2410_v49 = vsel %vm2400_vm11, %v2377_v60, %v1847_v8 }
 0x20d   : > { %2241 = vrot.lane.b32.xlu1 %v1601_v33, %s6755_s30  ;;  %v2442_v24 = vsel %vm2433_vm10, %v2409_v16, %v1946_v47  ;;  %v2345_v36 = vsel %vm581_vm0, %v2314_v63, %v7998_v12 }
 0x20e   : > { %2057 = vrot.lane.b32.xlu0 %v7458_v10, %s6752_s19 }
 0x20f   : > { %v2226_v1 = vpop.permute.xlu1 %2225 }
 0x210   : > { %v2042_v52 = vpop.permute.xlu0 %2041  ;;  %v2540_v28 = vsel %vm2532_vm14, %v2507_v21, %v2226_v1 }
 0x211   : > { %1963 = vrot.lane.b32.xlu1 %v1601_v33, %s6753_s21  ;;  %6081 = vmatmul.mubr.msk.f32.gmra.mrb[8].mxu1 %vm2575_vm15, %v2540_v28 }
 0x212   : > { %1762 = vrot.lane.b32.xlu0 %v7458_v10, %s6750_s17  ;;  %v8012_v18 = vpop.f32.mrb[0].mxu1 }
 0x213   : > { %v6059_v6 = vpop.f32.mrb[1].mxu1  ;;  %v1948_v39 = vpop.permute.xlu1 %1947 }
 0x214   : > { %v8015_v17 = vpop.permute.xlu0 %1746  ;;  %v2443_v51 = vsel %vm2433_vm10, %v2410_v49, %v1948_v39  ;;  %v1607_v39 = vrot.slane %v7484_v0, 2 }
 0x215   : > { %1668 = vrot.lane.b32.xlu1 %v1601_v33, %s6749_s16  ;;  %v2378_v31 = vsel %vm2367_vm9, %v2345_v36, %v8015_v17  ;;  %v10088_v36 = vld [vmem:[#allocation23_spill] sm:$0xff] }
 0x216   : > { %2150 = vrot.lane.b32.xlu0 %v7500_v22, %s6754_s28 }
 0x217   : > { %v8020_v46 = vpop.permute.xlu1 %1652 }
 0x218   : > { %v2135_v9 = vpop.permute.xlu0 %2134 }
 0x219   : > { %2059 = vrot.lane.b32.xlu1 %v10083_v48, %s6752_s19 }
 0x21a   : > { %1864 = vrot.lane.b32.xlu0 %v7500_v22, %s6751_s18  ;;  %v2475_v22 = vsel %vm2466_vm12, %v2442_v24, %v2042_v52 }
 0x21b   : > { %v2044_v54 = vpop.permute.xlu1 %2043  ;;  %v2508_v14 = vsel %vm2499_vm13, %v2475_v22, %v2135_v9  ;;  %v1608_v9 = vrot.slane %v7481_v13, 2  ;;  %v10086_v22 = vld [vmem:[#allocation21_spill] sm:$0xff] }
 0x21c   : > { %v1849_v38 = vpop.permute.xlu0 %1848  ;;  %v2476_v56 = vsel %vm2466_vm12, %v2443_v51, %v2044_v54  ;;  %v1613_v51 = vrot.slane %v7507_v15, 2 }
 0x21d   : > { %1764 = vrot.lane.b32.xlu1 %v10083_v48, %s6750_s17  ;;  %v2411_v54 = vsel %vm2400_vm11, %v2378_v31, %v1849_v38  ;;  %v1609_v16 = vsel %vm1554_vm6, %v1607_v39, %v1608_v9 }
 0x21e   : > { %2243 = vrot.lane.b32.xlu0 %v1604_v44, %s6755_s30 }
 0x21f   : > { %v8043_v3 = vpop.permute.xlu1 %1748 }
 0x220   : > { %v2228_v4 = vpop.permute.xlu0 %2227 }
 0x221   : > { %v2541_v32 = vsel %vm2532_vm14, %v2508_v14, %v2228_v4  ;;  %2152 = vrot.lane.b32.xlu1 %v10084_v23, %s6754_s28  ;;  %v1610_v14 = vrot.slane %v10086_v22, 2  ;;  %v2315_v4 = vsel %vm2304_vm8, %v7325_v53, %v7691_v57  ;;  %v10091_v22 = vld [vmem:[#allocation25_spill] sm:$0xff] }
 0x222   : > { %1965 = vrot.lane.b32.xlu0 %v1604_v44, %s6753_s21  ;;  %6083 = vmatprep.mubr.msk.f32.mxu1 %vm2575_vm15, %v2541_v32  ;;  %v2346_v32 = vsel %vm581_vm0, %v2315_v4, %v8020_v46 }
 0x223   : > { %v2137_v34 = vpop.permute.xlu1 %2136  ;;  %v1611_v55 = vsel %vm1554_vm6, %v1608_v9, %v1610_v14 }
 0x224   : > { %v1950_v47 = vpop.permute.xlu0 %1949  ;;  %v2509_v58 = vsel %vm2499_vm13, %v2476_v56, %v2137_v34  ;;  %v10087_v56 = vld [vmem:[#allocation11_spill] sm:$0xff] }
 0x225   : > { %1866 = vrot.lane.b32.xlu1 %v10084_v23, %s6751_s18  ;;  %v2444_v7 = vsel %vm2433_vm10, %v2411_v54, %v1950_v47  ;;  %v2379_v23 = vsel %vm2367_vm9, %v2346_v32, %v8043_v3 }
 0x226   : > { %1670 = vrot.lane.b32.xlu0 %v1604_v44, %s6749_s16 }
 0x227   : > { %v1851_v19 = vpop.permute.xlu1 %1850 }
 0x228   : > { %v8061_v33 = vpop.permute.xlu0 %1654  ;;  %v2412_v26 = vsel %vm2400_vm11, %v2379_v23, %v1851_v19 }
 0x229   : > { %2245 = vrot.lane.b32.xlu1 %v1606_v2, %s6755_s30 }
 0x22a   : > { %2061 = vrot.lane.b32.xlu0 %v7484_v0, %s6752_s19 }
 0x22b   : > { %v2230_v21 = vpop.permute.xlu1 %2229 }
 0x22c   : > { %v2046_v41 = vpop.permute.xlu0 %2045  ;;  %v2542_v1 = vsel %vm2532_vm14, %v2509_v58, %v2230_v21  ;;  %v2316_v58 = vsel %vm2304_vm8, %v10087_v56, %v7707_v40 }
 0x22d   : > { %1967 = vrot.lane.b32.xlu1 %v1606_v2, %s6753_s21  ;;  %6084 = vmatmul.mubr.msk.f32.gmra.mrb[10].mxu1 %vm2575_vm15, %v2542_v1  ;;  %v2347_v21 = vsel %vm581_vm0, %v2316_v58, %v8061_v33 }
 0x22e   : > { %1766 = vrot.lane.b32.xlu0 %v7484_v0, %s6750_s17 }
 0x22f   : > { %v1952_v8 = vpop.permute.xlu1 %1951 }
 0x230   : > { %v8076_v52 = vpop.permute.xlu0 %1750  ;;  %v2445_v53 = vsel %vm2433_vm10, %v2412_v26, %v1952_v8  ;;  %v10092_v26 = vld [vmem:[#allocation27_spill] sm:$0xff] }
 0x231   : > { %1672 = vrot.lane.b32.xlu1 %v1606_v2, %s6749_s16  ;;  %v1612_v2 = vrot.slane %v7510_v45, 2 }
 0x232   : > { %2154 = vrot.lane.b32.xlu0 %v7526_v50, %s6754_s28 }
 0x233   : > { %v8081_v28 = vpop.permute.xlu1 %1656  ;;  %v1614_v39 = vsel %vm1554_vm6, %v1612_v2, %v1613_v51 }
 0x234   : > { %v2139_v6 = vpop.permute.xlu0 %2138 }
 0x235   : > { %2063 = vrot.lane.b32.xlu1 %v7481_v13, %s6752_s19 }
 0x236   : > { %1868 = vrot.lane.b32.xlu0 %v7526_v50, %s6751_s18  ;;  %v2477_v50 = vsel %vm2466_vm12, %v2444_v7, %v2046_v41  ;;  %v2380_v41 = vsel %vm2367_vm9, %v2347_v21, %v8076_v52 }
 0x237   : > { %v2048_v27 = vpop.permute.xlu1 %2047  ;;  %v2510_v43 = vsel %vm2499_vm13, %v2477_v50, %v2139_v6 }
 0x238   : > { %v1853_v37 = vpop.permute.xlu0 %1852 }
 0x239   : > { %1768 = vrot.lane.b32.xlu1 %v7481_v13, %s6750_s17  ;;  %v2413_v6 = vsel %vm2400_vm11, %v2380_v41, %v1853_v37  ;;  %v10089_v37 = vld [vmem:[#allocation22_spill] sm:$0xff] }
 0x23a   : > { %2247 = vrot.lane.b32.xlu0 %v1609_v16, %s6755_s30  ;;  %v1615_v54 = vrot.slane %v10089_v37, 2 }
 0x23b   : > { %v8104_v12 = vpop.permute.xlu1 %1752 }
 0x23c   : > { %v2232_v17 = vpop.permute.xlu0 %2231 }
 0x23d   : > { %v2543_v44 = vsel %vm2532_vm14, %v2510_v43, %v2232_v17  ;;  %2156 = vrot.lane.b32.xlu1 %v7503_v11, %s6754_s28 }
 0x23e   : > { %1969 = vrot.lane.b32.xlu0 %v1609_v16, %s6753_s21  ;;  %6086 = vmatprep.mubr.msk.f32.mxu1 %vm2575_vm15, %v2543_v44 }
 0x23f   : > { %v2141_v38 = vpop.permute.xlu1 %2140 }
 0x240   : > { %v1954_v24 = vpop.permute.xlu0 %1953 }
 0x241   : > { %1870 = vrot.lane.b32.xlu1 %v7503_v11, %s6751_s18  ;;  %v2478_v11 = vsel %vm2466_vm12, %v2445_v53, %v2048_v27  ;;  %v2446_v40 = vsel %vm2433_vm10, %v2413_v6, %v1954_v24  ;;  %v1616_v24 = vsel %vm1554_vm6, %v1613_v51, %v1615_v54 }
 0x242   : > { %1674 = vrot.lane.b32.xlu0 %v1609_v16, %s6749_s16  ;;  %v2511_v57 = vsel %vm2499_vm13, %v2478_v11, %v2141_v38  ;;  %v10090_v16 = vld [vmem:[#allocation36_spill] sm:$0xff]  ;;  %v1617_v11 = vrot.slane %v10091_v22, 2 }
 0x243   : > { %v1855_v34 = vpop.permute.xlu1 %1854  ;;  %v2317_v7 = vsel %vm2304_vm8, %v7351_v59, %v10090_v16 }
 0x244   : > { %v8122_v47 = vpop.permute.xlu0 %1658  ;;  %v2348_v50 = vsel %vm581_vm0, %v2317_v7, %v8081_v28 }
 0x245   : > { %2249 = vrot.lane.b32.xlu1 %v1611_v55, %s6755_s30  ;;  %v2381_v43 = vsel %vm2367_vm9, %v2348_v50, %v8104_v12 }
 0x246   : > { %2065 = vrot.lane.b32.xlu0 %v7510_v45, %s6752_s19  ;;  %v2414_v38 = vsel %vm2400_vm11, %v2381_v43, %v1855_v34  ;;  %v10101_v43 = vld [vmem:[#allocation5_spill] sm:$0xff] }
 0x247   : > { %v2234_v46 = vpop.permute.xlu1 %2233 }
 0x248   : > { %v2050_v3 = vpop.permute.xlu0 %2049  ;;  %v2544_v5 = vsel %vm2532_vm14, %v2511_v57, %v2234_v46  ;;  %v10093_v57 = vld [vmem:[#allocation24_spill] sm:$0xff] }
 0x249   : > { %1971 = vrot.lane.b32.xlu1 %v1611_v55, %s6753_s21  ;;  %6087 = vmatmul.mubr.msk.f32.gmra.mrb[12].mxu1 %vm2575_vm15, %v2544_v5  ;;  %v1618_v46 = vrot.slane %v10093_v57, 2 }
 0x24a   : > { %1770 = vrot.lane.b32.xlu0 %v7510_v45, %s6750_s17 }
 0x24b   : > { %v1956_v30 = vpop.permute.xlu1 %1955  ;;  %v1619_v58 = vsel %vm1554_vm6, %v1617_v11, %v1618_v46 }
 0x24c   : > { %v8137_v60 = vpop.permute.xlu0 %1754  ;;  %v2447_v59 = vsel %vm2433_vm10, %v2414_v38, %v1956_v30 }
 0x24d   : > { %1676 = vrot.lane.b32.xlu1 %v1611_v55, %s6749_s16 }
 0x24e   : > { %2158 = vrot.lane.b32.xlu0 %v7546_v25, %s6754_s28 }
 0x24f   : > { %v8142_v19 = vpop.permute.xlu1 %1660 }
 0x250   : > { %v2143_v49 = vpop.permute.xlu0 %2142 }
 0x251   : > { %2067 = vrot.lane.b32.xlu1 %v7507_v15, %s6752_s19 }
 0x252   : > { %1872 = vrot.lane.b32.xlu0 %v7546_v25, %s6751_s18  ;;  %v2479_v25 = vsel %vm2466_vm12, %v2446_v40, %v2050_v3  ;;  %v10094_v3 = vld [vmem:[#allocation38_spill] sm:$0xff]  ;;  %v10096_v40 = vld [vmem:[#allocation28_spill] sm:$0xff] }
 0x253   : > { %v2052_v1 = vpop.permute.xlu1 %2051  ;;  %v2512_v33 = vsel %vm2499_vm13, %v2479_v25, %v2143_v49  ;;  %v2318_v5 = vsel %vm2304_vm8, %v7380_v35, %v10094_v3  ;;  %v1620_v25 = vrot.slane %v10096_v40, 2 }
 0x254   : > { %v1857_v8 = vpop.permute.xlu0 %1856  ;;  %v2480_v14 = vsel %vm2466_vm12, %v2447_v59, %v2052_v1  ;;  %v2349_v30 = vsel %vm581_vm0, %v2318_v5, %v8122_v47 }
 0x255   : > { %1772 = vrot.lane.b32.xlu1 %v7507_v15, %s6750_s17  ;;  %v2382_v49 = vsel %vm2367_vm9, %v2349_v30, %v8137_v60 }
 0x256   : > { %2251 = vrot.lane.b32.xlu0 %v1614_v39, %s6755_s30  ;;  %v2415_v56 = vsel %vm2400_vm11, %v2382_v49, %v1857_v8  ;;  %v10095_v8 = vld [vmem:[#allocation29_spill] sm:$0xff] }
 0x257   : > { %v8165_v9 = vpop.permute.xlu1 %1756 }
 0x258   : > { %v2236_v52 = vpop.permute.xlu0 %2235 }
 0x259   : > { %v2545_v63 = vsel %vm2532_vm14, %v2512_v33, %v2236_v52  ;;  %2160 = vrot.lane.b32.xlu1 %v10088_v36, %s6754_s28  ;;  %v10097_v33 = vld [vmem:[#allocation31_spill] sm:$0xff] }
 0x25a   : > { %1973 = vrot.lane.b32.xlu0 %v1614_v39, %s6753_s21  ;;  %6089 = vmatprep.mubr.msk.f32.mxu1 %vm2575_vm15, %v2545_v63  ;;  %v1154_v52 = vmul.f32 0.25, %v10097_v33  ;;  %v10098_v63 = vld [vmem:[#allocation30_spill] sm:$0xff] }
 0x25b   : > { %v2145_v31 = vpop.permute.xlu1 %2144 }
 0x25c   : > { %v1958_v27 = vpop.permute.xlu0 %1957  ;;  %v2513_v28 = vsel %vm2499_vm13, %v2480_v14, %v2145_v31  ;;  %v10099_v31 = vld [vmem:[#allocation37_spill] sm:$0xff]  ;;  %v1187_v38 = vsel %vm1159_vm3, %v10101_v43, %v1154_v52 }
 0x25d   : > { %1874 = vrot.lane.b32.xlu1 %v10088_v36, %s6751_s18  ;;  %v2448_v35 = vsel %vm2433_vm10, %v2415_v56, %v1958_v27  ;;  %v1153_v36 = vmul.f32 0.25, %v10098_v63  ;;  %v2319_v27 = vsel %vm2304_vm8, %v7377_v61, %v10099_v31  ;;  %v1621_v61 = vsel %vm1554_vm6, %v1618_v46, %v1620_v25  ;;  %v10103_v56 = vld [vmem:[#allocation40_spill] sm:$0xff] }
 0x25e   : > { %1678 = vrot.lane.b32.xlu0 %v1614_v39, %s6749_s16  ;;  %v2350_v37 = vsel %vm581_vm0, %v2319_v27, %v8142_v19 }
 0x25f   : > { %v1859_v17 = vpop.permute.xlu1 %1858  ;;  %v2383_v54 = vsel %vm2367_vm9, %v2350_v37, %v8165_v9  ;;  %v10104_v37 = vld [vmem:[#allocation39_spill] sm:$0xff] }
 0x260   : > { %v8183_v44 = vpop.permute.xlu0 %1662  ;;  %v2416_v50 = vsel %vm2400_vm11, %v2383_v54, %v1859_v17  ;;  %v2321_v54 = vsel %vm2304_vm8, %v10077_v42, %v10104_v37 }
 0x261   : > { %2253 = vrot.lane.b32.xlu1 %v1616_v24, %s6755_s30 }
 0x262   : > { %2069 = vrot.lane.b32.xlu0 %v10091_v22, %s6752_s19 }
 0x263   : > { %v2238_v4 = vpop.permute.xlu1 %2237 }
 0x264   : > { %v2054_v12 = vpop.permute.xlu0 %2053  ;;  %v2546_v32 = vsel %vm2532_vm14, %v2513_v28, %v2238_v4  ;;  %v1265_v4 = vrot.slane %v1187_v38, 7 }
 0x265   : > { %1975 = vrot.lane.b32.xlu1 %v1616_v24, %s6753_s21  ;;  %6090 = vmatmul.mubr.msk.f32.gmra.mrb[14].mxu1 %vm2575_vm15, %v2546_v32  ;;  %v2481_v21 = vsel %vm2466_vm12, %v2448_v35, %v2054_v12 }
 0x266   : > { %1774 = vrot.lane.b32.xlu0 %v10091_v22, %s6750_s17  ;;  %v1349_v46 = vsel %vm1224_vm4, %v1265_v4, 0.0 }
 0x267   : > { %v1960_v23 = vpop.permute.xlu1 %1959 }
 0x268   : > { %v8198_v34 = vpop.permute.xlu0 %1758  ;;  %v2449_v14 = vsel %vm2433_vm10, %v2416_v50, %v1960_v23 }
 0x269   : > { %1680 = vrot.lane.b32.xlu1 %v1616_v24, %s6749_s16  ;;  %v10102_v24 = vld [vmem:[#allocation6_spill] sm:$0xff] }
 0x26a   : > { %2162 = vrot.lane.b32.xlu0 %v10092_v26, %s6754_s28  ;;  %v1186_v59 = vsel %vm1159_vm3, %v10102_v24, %v1153_v36 }
 0x26b   : > { %v8203_v55 = vpop.permute.xlu1 %1664  ;;  %v1264_v12 = vrot.slane %v1186_v59, 7  ;;  %v1625_v59 = vrot.slane %v1349_v46, 2 }
 0x26c   : > { %v2147_v53 = vpop.permute.xlu0 %2146  ;;  %v2352_v50 = vsel %vm581_vm0, %v2321_v54, %v8203_v55 }
 0x26d   : > { %2071 = vrot.lane.b32.xlu1 %v10093_v57, %s6752_s19  ;;  %v2514_v47 = vsel %vm2499_vm13, %v2481_v21, %v2147_v53  ;;  %v8271_v53 = vsel %vm1224_vm4, 0.0, %v1264_v12  ;;  %v8274_v11 = vsel %vm1224_vm4, %v1264_v12, %v1265_v4 }
 0x26e   : > { %1876 = vrot.lane.b32.xlu0 %v10092_v26, %s6751_s18  ;;  %v1451_v30 = vrot.slane %v8271_v53, 1  ;;  %v1452_v49 = vrot.slane %v8274_v11, 1  ;;  %v1623_v52 = vrot.slane %v8274_v11, 2 }
 0x26f   : > { %v2056_v2 = vpop.permute.xlu1 %2055 }
 0x270   : > { %v8218_v51 = vpop.permute.xlu0 %1860  ;;  %v2482_v19 = vsel %vm2466_vm12, %v2449_v14, %v2056_v2  ;;  %v1454_v2 = vrot.slane %v1349_v46, 1  ;;  %v10105_v14 = vld [vmem:[#allocation33_spill] sm:$0xff] }
 0x271   : > { %1776 = vrot.lane.b32.xlu1 %v10093_v57, %s6750_s17  ;;  %v1156_v42 = vmul.f32 0.25, %v10105_v14 }
 0x272   : > { %2255 = vrot.lane.b32.xlu0 %v1619_v58, %s6755_s30 }
 0x273   : > { %v8228_v41 = vpop.permute.xlu1 %1760 }
 0x274   : > { %v2240_v60 = vpop.permute.xlu0 %2239 }
 0x275   : > { %v2547_v1 = vsel %vm2532_vm14, %v2514_v47, %v2240_v60  ;;  %2164 = vrot.lane.b32.xlu1 %v10095_v8, %s6754_s28 }
 0x276   : > { %1977 = vrot.lane.b32.xlu0 %v1619_v58, %s6753_s21  ;;  %6092 = vmatprep.mubr.msk.f32.mxu1 %vm2575_vm15, %v2547_v1 }
 0x277   : > { %v2149_v6 = vpop.permute.xlu1 %2148 }
 0x278   : > { %v1962_v39 = vpop.permute.xlu0 %1961  ;;  %v2515_v9 = vsel %vm2499_vm13, %v2482_v19, %v2149_v6  ;;  %v10106_v19 = vld [vmem:[#allocation32_spill] sm:$0xff] }
 0x279   : > { %1878 = vrot.lane.b32.xlu1 %v10095_v8, %s6751_s18 }
 0x27a   : > { %1513 = vrot.lane.b32.xlu0 %v10095_v8, %s10100_s29  ;;  %v1455_v8 = vsel %vm1383_vm5, %v1452_v49, %v1454_v2 }
 0x27b   : > { %v8249_v16 = vpop.permute.xlu1 %1862 }
 0x27c   : > { %v8251_v7 = vpop.permute.xlu0 %1666 }
 0x27d   : > { %2257 = vrot.lane.b32.xlu1 %v1621_v61, %s6755_s30 }
 0x27e   : > { %1979 = vrot.lane.b32.xlu0 %v1621_v61, %s6753_s21 }
 0x27f   : > { %v2242_v28 = vpop.permute.xlu1 %2241 }
 0x280   : > { %v2058_v17 = vpop.permute.xlu0 %2057  ;;  %v2548_v32 = vsel %vm2532_vm14, %v2515_v9, %v2242_v28  ;;  %v1155_v9 = vmul.f32 0.25, %v10106_v19  ;;  %v10110_v19 = vld [vmem:[#allocation41_spill] sm:$0xff] }
 0x281   : > { %1682 = vrot.lane.b32.xlu1 %v1619_v58, %s6749_s16  ;;  %6093 = vmatmul.mubr.msk.f32.gmra.mrb[16].mxu1 %vm2575_vm15, %v2548_v32  ;;  %v2320_v58 = vsel %vm2304_vm8, %v7406_v62, %v10103_v56  ;;  %v1453_v62 = vsel %vm1383_vm5, %v1451_v30, %v1452_v49  ;;  %v10107_v32 = vld [vmem:[#allocation7_spill] sm:$0xff] }
 0x282   : > { %1684 = vrot.lane.b32.xlu0 %v1621_v61, %s6749_s16  ;;  %v2351_v35 = vsel %vm581_vm0, %v2320_v58, %v8183_v44  ;;  %v2385_v61 = vsel %vm2367_vm9, %v2352_v50, %v8228_v41  ;;  %v1189_v46 = vsel %vm1159_vm3, %v10107_v32, %v1156_v42 }
 0x283   : > { %v1964_v23 = vpop.permute.xlu1 %1963  ;;  %v2384_v21 = vsel %vm2367_vm9, %v2351_v35, %v8198_v34  ;;  %v2418_v24 = vsel %vm2400_vm11, %v2385_v61, %v8249_v16  ;;  %v1626_v16 = vsel %vm1554_vm6, %v1623_v52, %v1625_v59  ;;  %v1268_v2 = vrot.slane %v1189_v46, 7 }
 0x284   : > { %v8268_v26 = vpop.permute.xlu0 %1762  ;;  %v2417_v1 = vsel %vm2400_vm11, %v2384_v21, %v8218_v51  ;;  %v1622_v51 = vrot.slane %v8271_v53, 2  ;;  %v2451_v28 = vsel %vm2433_vm10, %v2418_v24, %v1964_v23 }
 0x285   : > { %2073 = vrot.lane.b32.xlu1 %v8271_v53, %s6752_s19  ;;  %v2450_v6 = vsel %vm2433_vm10, %v2417_v1, %v1962_v39  ;;  %v1350_v1 = vsel %vm1224_vm4, %v1268_v2, 0.0 }
 0x286   : > { %2075 = vrot.lane.b32.xlu0 %v8274_v11, %s6752_s19  ;;  %v2483_v44 = vsel %vm2466_vm12, %v2450_v6, %v2058_v17  ;;  %v1624_v27 = vsel %vm1554_vm6, %v1622_v51, %v1623_v52  ;;  %v1459_v52 = vrot.slane %v1350_v1, 1 }
 0x287   : > { %v8281_v3 = vpop.permute.xlu1 %1668 }
 0x288   : > { %v2151_v5 = vpop.permute.xlu0 %2150 }
 0x289   : > { %1778 = vrot.lane.b32.xlu1 %v8271_v53, %s6750_s17  ;;  %v2516_v34 = vsel %vm2499_vm13, %v2483_v44, %v2151_v5  ;;  %v10108_v5 = vld [vmem:[#allocation8_spill] sm:$0xff] }
 0x28a   : > { %1780 = vrot.lane.b32.xlu0 %v8274_v11, %s6750_s17  ;;  %v1188_v23 = vsel %vm1159_vm3, %v10108_v5, %v1155_v9  ;;  %v2323_v9 = vsel %vm2304_vm8, %v10080_v20, %v10110_v19  ;;  %v1630_v5 = vrot.slane %v1350_v1, 2  ;;  %v10114_v1 = vld [vmem:[#allocation10_spill] sm:$0xff] }
 0x28b   : > { %v2060_v47 = vpop.permute.xlu1 %2059  ;;  %v1267_v56 = vrot.slane %v1188_v23, 7  ;;  %v10111_v23 = vld [vmem:[#allocation35_spill] sm:$0xff] }
 0x28c   : > { %v8296_v60 = vpop.permute.xlu0 %1864  ;;  %v2484_v55 = vsel %vm2466_vm12, %v2451_v28, %v2060_v47  ;;  %v2354_v28 = vsel %vm581_vm0, %v2323_v9, %v8281_v3 }
 0x28d   : > { %2166 = vrot.lane.b32.xlu1 %v1453_v62, %s6754_s28  ;;  %v8358_v21 = vsel %vm1224_vm4, 0.0, %v1267_v56  ;;  %v8361_v47 = vsel %vm1224_vm4, %v1267_v56, %v1268_v2  ;;  %v1158_v2 = vmul.f32 0.25, %v10111_v23 }
 0x28e   : > { %2168 = vrot.lane.b32.xlu0 %v1455_v8, %s6754_s28  ;;  %v1457_v51 = vrot.slane %v8361_v47, 1  ;;  %v1627_v14 = vrot.slane %v8358_v21, 2  ;;  %v1628_v42 = vrot.slane %v8361_v47, 2 }
 0x28f   : > { %v8307_v40 = vpop.permute.xlu1 %1764 }
 0x290   : > { %v2244_v25 = vpop.permute.xlu0 %2243  ;;  %v8312_v63 = vpop.f32.mrb[2].mxu1  ;;  %v1460_v50 = vsel %vm1383_vm5, %v1457_v51, %v1459_v52  ;;  %v10115_v52 = vld [vmem:[#allocation44_spill] sm:$0xff] }
 0x291   : > { %v2549_v33 = vsel %vm2532_vm14, %v2516_v34, %v2244_v25  ;;  %1880 = vrot.lane.b32.xlu1 %v1453_v62, %s6751_s18  ;;  %v8316_v39 = vpop.f32.mrb[3].mxu1 }
 0x292   : > { %1515 = vrot.lane.b32.xlu0 %v1453_v62, %s10100_s29  ;;  %6095 = vmatprep.mubr.msk.f32.mxu1 %vm2575_vm15, %v2549_v33  ;;  %v10109_v62 = vld [vmem:[#allocation42_spill] sm:$0xff] }
 0x293   : > { %v2153_v36 = vpop.permute.xlu1 %2152 }
 0x294   : > { %v1966_v31 = vpop.permute.xlu0 %1965  ;;  %v2517_v41 = vsel %vm2499_vm13, %v2484_v55, %v2153_v36  ;;  %v2387_v55 = vsel %vm2367_vm9, %v2354_v28, %v8307_v40 }
 0x295   : > { %2259 = vrot.lane.b32.xlu1 %v1624_v27, %s6755_s30 }
 0x296   : > { %1981 = vrot.lane.b32.xlu0 %v1624_v27, %s6753_s21 }
 0x297   : > { %v8329_v43 = vpop.permute.xlu1 %1866 }
 0x298   : > { %v8331_v38 = vpop.permute.xlu0 %1670 }
 0x299   : > { %1882 = vrot.lane.b32.xlu1 %v1455_v8, %s6751_s18 }
 0x29a   : > { %1517 = vrot.lane.b32.xlu0 %v1455_v8, %s10100_s29  ;;  %v2322_v8 = vsel %vm2304_vm8, %v7432_v29, %v10109_v62  ;;  %v1456_v29 = vrot.slane %v8358_v21, 1  ;;  %v1631_v62 = vsel %vm1554_vm6, %v1628_v42, %v1630_v5 }
 0x29b   : > { %v2246_v17 = vpop.permute.xlu1 %2245  ;;  %v2353_v6 = vsel %vm581_vm0, %v2322_v8, %v8251_v7  ;;  %v10113_v8 = vld [vmem:[#allocation9_spill] sm:$0xff] }
 0x29c   : > { %v2062_v4 = vpop.permute.xlu0 %2061  ;;  %v2550_v12 = vsel %vm2532_vm14, %v2517_v41, %v2246_v17  ;;  %v2386_v44 = vsel %vm2367_vm9, %v2353_v6, %v8268_v26  ;;  %v1458_v54 = vsel %vm1383_vm5, %v1456_v29, %v1457_v51  ;;  %v1191_v6 = vsel %vm1159_vm3, %v10113_v8, %v1158_v2 }
 0x29d   : > { %2261 = vrot.lane.b32.xlu1 %v1626_v16, %s6755_s30  ;;  %6096 = vmatmul.mubr.msk.f32.gmra.mrb[18].mxu1 %vm2575_vm15, %v2550_v12  ;;  %v2419_v33 = vsel %vm2400_vm11, %v2386_v44, %v8296_v60  ;;  %v1629_v12 = vsel %vm1554_vm6, %v1627_v14, %v1628_v42  ;;  %v1271_v29 = vrot.slane %v1191_v6, 7  ;;  %v6613_v6 = vld [vmem:[%s6855_s24] sm:$0xff] }
 0x29e   : > { %1983 = vrot.lane.b32.xlu0 %v1626_v16, %s6753_s21  ;;  %v2452_v36 = vsel %vm2433_vm10, %v2419_v33, %v1966_v31 }
 0x29f   : > { %v1968_v30 = vpop.permute.xlu1 %1967  ;;  %v2485_v7 = vsel %vm2466_vm12, %v2452_v36, %v2062_v4  ;;  %v2420_v4 = vsel %vm2400_vm11, %v2387_v55, %v8329_v43  ;;  %v10112_v43 = vld [vmem:[#allocation34_spill] sm:$0xff]  ;;  %v2324_v36 = vsel %vm2304_vm8, %v7458_v10, %v10115_v52 }
 0x2a0   : > { %v8351_v49 = vpop.permute.xlu0 %1766  ;;  %v2453_v20 = vsel %vm2433_vm10, %v2420_v4, %v1968_v30  ;;  %v1157_v56 = vmul.f32 0.25, %v10112_v43 }
 0x2a1   : > { %1686 = vrot.lane.b32.xlu1 %v1624_v27, %s6749_s16 }
 0x2a2   : > { %1688 = vrot.lane.b32.xlu0 %v1626_v16, %s6749_s16  ;;  %v1190_v44 = vsel %vm1159_vm3, %v10114_v1, %v1157_v56  ;;  %vm9035_vm3 = vmpackc.low %vm658_vm1, %vm6757_vm2 }
 0x2a3   : > { %v8355_v58 = vpop.permute.xlu1 %1672  ;;  %v1270_v51 = vrot.slane %v1190_v44, 7  ;;  %v6615_v44 = vld [vmem:[%s6855_s24 + $0x8] sm:$0xff] }
 0x2a4   : > { %v2155_v35 = vpop.permute.xlu0 %2154 }
 0x2a5   : > { %2077 = vrot.lane.b32.xlu1 %v8358_v21, %s6752_s19  ;;  %v2518_v26 = vsel %vm2499_vm13, %v2485_v7, %v2155_v35  ;;  %v2355_v7 = vsel %vm581_vm0, %v2324_v36, %v8331_v38  ;;  %v1272_v10 = vsel %vm1224_vm4, %v1270_v51, %v1271_v29 }
 0x2a6   : > { %2079 = vrot.lane.b32.xlu0 %v8361_v47, %s6752_s19  ;;  %v1824_v9 = vrot.slane %v1272_v10, 1  ;;  %v1925_v56 = vrot.slane %v1272_v10, 2 }
 0x2a7   : > { %v2064_v34 = vpop.permute.xlu1 %2063 }
 0x2a8   : > { %v8375_v25 = vpop.permute.xlu0 %1868  ;;  %v2486_v3 = vsel %vm2466_vm12, %v2453_v20, %v2064_v34 }
 0x2a9   : > { %1782 = vrot.lane.b32.xlu1 %v8358_v21, %s6750_s17 }
 0x2aa   : > { %1784 = vrot.lane.b32.xlu0 %v8361_v47, %s6750_s17 }
 0x2ab   : > { %v8388_v27 = vpop.permute.xlu1 %1768 }
 0x2ac   : > { %v2248_v60 = vpop.permute.xlu0 %2247  ;;  %v8393_v31 = vpop.f32.mrb[4].mxu1 }
 0x2ad   : > { %v2551_v37 = vsel %vm2532_vm14, %v2518_v26, %v2248_v60  ;;  %2170 = vrot.lane.b32.xlu1 %v1458_v54, %s6754_s28  ;;  %v8397_v61 = vpop.f32.mrb[5].mxu1  ;;  %v2388_v26 = vsel %vm2367_vm9, %v2355_v7, %v8351_v49 }
 0x2ae   : > { %2172 = vrot.lane.b32.xlu0 %v1460_v50, %s6754_s28  ;;  %6098 = vmatprep.mubr.msk.f32.mxu1 %vm2575_vm15, %v2551_v37 }
 0x2af   : > { %v2157_v24 = vpop.permute.xlu1 %2156 }
 0x2b0   : > { %v1970_v59 = vpop.permute.xlu0 %1969  ;;  %v2519_v16 = vsel %vm2499_vm13, %v2486_v3, %v2157_v24  ;;  %v1351_v24 = vsel %vm1224_vm4, %v1271_v29, 0.0 }
 0x2b1   : > { %1884 = vrot.lane.b32.xlu1 %v1458_v54, %s6751_s18  ;;  %v1826_v55 = vrot.slane %v1351_v24, 1 }
 0x2b2   : > { %1519 = vrot.lane.b32.xlu0 %v1458_v54, %s10100_s29  ;;  %v2421_v54 = vsel %vm2400_vm11, %v2388_v26, %v8375_v25  ;;  %v6756_v26 = vmov 0  }
 0x2b3   : > { %v8411_v41 = vpop.permute.xlu1 %1870  ;;  %v2454_v14 = vsel %vm2433_vm10, %v2421_v54, %v1970_v59  ;;  %6545 = vset.pattern.permute.xlu0 %v6756_v26  ;;  %6546 = vset.pattern.permute.xlu1 %v6756_v26 }
 0x2b4   : > { %v8413_v17 = vpop.permute.xlu0 %1674 }
 0x2b5   : > { %2263 = vrot.lane.b32.xlu1 %v1629_v12, %s6755_s30 }
 0x2b6   : > { %1985 = vrot.lane.b32.xlu0 %v1629_v12, %s6753_s21 }
 0x2b7   : > { %v2250_v40 = vpop.permute.xlu1 %2249 }
 0x2b8   : > { %v2066_v32 = vpop.permute.xlu0 %2065  ;;  %v2552_v46 = vsel %vm2532_vm14, %v2519_v16, %v2250_v40  ;;  %v1827_v16 = vsel %vm1383_vm5, %v1824_v9, %v1826_v55  ;;  %v10116_v40 = vld [vmem:[#allocation43_spill] sm:$0xff] }
 0x2b9   : > { %1886 = vrot.lane.b32.xlu1 %v1460_v50, %s6751_s18  ;;  %6099 = vmatmul.mubr.msk.f32.gmra.mrb[20].mxu1 %vm2575_vm15, %v2552_v46  ;;  %v2487_v38 = vsel %vm2466_vm12, %v2454_v14, %v2066_v32  ;;  %v2325_v32 = vsel %vm2304_vm8, %v10083_v48, %v10116_v40  ;;  %v6618_v14 = vld [vmem:[%s6864_s27 + $0x10] sm:$0xff] }
 0x2ba   : > { %1521 = vrot.lane.b32.xlu0 %v1460_v50, %s10100_s29  ;;  %v1335_v50 = vsel %vm1224_vm4, 0.0, %v1270_v51  ;;  %v2356_v46 = vsel %vm581_vm0, %v2325_v32, %v8355_v58  ;;  %v10118_v32 = vld [vmem:[#allocation46_spill] sm:$0xff] }
 0x2bb   : > { %v1972_v30 = vpop.permute.xlu1 %1971  ;;  %v1823_v25 = vrot.slane %v1335_v50, 1  ;;  %v2389_v5 = vsel %vm2367_vm9, %v2356_v46, %v8388_v27  ;;  %v1924_v43 = vrot.slane %v1335_v50, 2  ;;  %v6614_v27 = vld [vmem:[%s6864_s27] sm:$0xff]  ;;  %v2326_v46 = vsel %vm2304_vm8, %v7484_v0, %v10118_v32 }
 0x2bc   : > { %v8429_v35 = vpop.permute.xlu0 %1770  ;;  %v2422_v48 = vsel %vm2400_vm11, %v2389_v5, %v8411_v41  ;;  %v3870_v1 = vmul.f32 %v6614_v27, %v6613_v6  ;;  %v10119_v5 = vld [vmem:[#allocation26_spill] sm:$0xff]  ;;  %v6621_v6 = vld [vmem:[%s6855_s24 + $0x28] sm:$0xff] }
 0x2bd   : > { %2265 = vrot.lane.b32.xlu1 %v1631_v62, %s6755_s30  ;;  %v1825_v3 = vsel %vm1383_vm5, %v1823_v25, %v1824_v9  ;;  %v2455_v8 = vsel %vm2433_vm10, %v2422_v48, %v1972_v30  ;;  %v1926_v36 = vsel %vm1554_vm6, %v1924_v43, %v1925_v56  ;;  %v10117_v9 = vmov 0.0   ;;  %v6622_v27 = vld [vmem:[%s6864_s27 + $0x28] sm:$0xff] }
 0x2be   : > { %1987 = vrot.lane.b32.xlu0 %v1631_v62, %s6753_s21  ;;  %v2357_v48 = vsel %vm581_vm0, %v2326_v46, %v8413_v17 }
 0x2bf   : > { %v8438_v34 = vpop.permute.xlu1 %1676 }
 0x2c0   : > { %v2159_v33 = vpop.permute.xlu0 %2158 }
 0x2c1   : > { %1690 = vrot.lane.b32.xlu1 %v1629_v12, %s6749_s16  ;;  %v2520_v49 = vsel %vm2499_vm13, %v2487_v38, %v2159_v33  ;;  %v6616_v33 = vld [vmem:[%s6864_s27 + $0x8] sm:$0xff] }
 0x2c2   : > { %1692 = vrot.lane.b32.xlu0 %v1631_v62, %s6749_s16  ;;  %v1927_v62 = vrot.slane %v1351_v24, 2  ;;  %v3871_v29 = vmul.f32 %v6616_v33, %v6615_v44  ;;  %v6617_v24 = vld [vmem:[%s6855_s24 + $0x10] sm:$0xff]  ;;  %v6623_v44 = vld [vmem:[%s6855_s24 + $0x20] sm:$0xff] }
 0x2c3   : > { %v2068_v60 = vpop.permute.xlu1 %2067  ;;  %v3872_v38 = vmul.f32 %v6618_v14, %v6617_v24  ;;  %v6624_v33 = vld [vmem:[%s6864_s27 + $0x20] sm:$0xff] }
 0x2c4   : > { %v8449_v37 = vpop.permute.xlu0 %1872  ;;  %v2488_v58 = vsel %vm2466_vm12, %v2455_v8, %v2068_v60  ;;  %v1928_v7 = vsel %vm1554_vm6, %v1925_v56, %v1927_v62  ;;  %v3934_v60 = vrot.slane %v3870_v1, 7  ;;  %v3935_v54 = vrot.slane %v3871_v29, 7 }
 0x2c5   : > { %2081 = vrot.lane.b32.xlu1 %v1335_v50, %s6752_s19  ;;  %v2390_v62 = vsel %vm2367_vm9, %v2357_v48, %v8429_v35  ;;  %v3875_v1 = vmul.f32 %v6622_v27, %v6621_v6  ;;  %v8544_v29 = vmul.f32 %v6624_v33, %v6623_v44  ;;  %v6625_v48 = vld [vmem:[%s6855_s24 + $0x38] sm:$0xff]  ;;  %v6627_v6 = vld [vmem:[%s6855_s24 + $0x30] sm:$0xff] }
 0x2c6   : > { %2083 = vrot.lane.b32.xlu0 %v1272_v10, %s6752_s19  ;;  %v8538_v0 = vsel %vm1224_vm4, 0.0, %v3934_v60  ;;  %v2423_v17 = vsel %vm2400_vm11, %v2390_v62, %v8449_v37  ;;  %v6628_v27 = vld [vmem:[%s6864_s27 + $0x30] sm:$0xff] }
 0x2c7   : > { %v8461_v42 = vpop.permute.xlu1 %1772  ;;  %v4094_v37 = vrot.slane %v8538_v0, 1  ;;  %v10121_v44 = vld [vmem:[#allocation45_spill] sm:$0xff] }
 0x2c8   : > { %v2252_v19 = vpop.permute.xlu0 %2251  ;;  %v8464_v4 = vpop.f32.mrb[6].mxu1  ;;  %v2327_v33 = vsel %vm2304_vm8, %v7481_v13, %v10121_v44 }
 0x2c9   : > { %v2553_v28 = vsel %vm2532_vm14, %v2520_v49, %v2252_v19  ;;  %1786 = vrot.lane.b32.xlu1 %v1335_v50, %s6750_s17  ;;  %v8468_v59 = vpop.f32.mrb[7].mxu1  ;;  %v6619_v49 = vld [vmem:[%s6855_s24 + $0x18] sm:$0xff] }
 0x2ca   : > { %1788 = vrot.lane.b32.xlu0 %v1272_v10, %s6750_s17  ;;  %6101 = vmatprep.mubr.msk.f32.mxu1 %vm2575_vm15, %v2553_v28  ;;  %v6620_v19 = vld [vmem:[%s6864_s27 + $0x18] sm:$0xff] }
 0x2cb   : > { %v2161_v12 = vpop.permute.xlu1 %2160  ;;  %v3873_v25 = vmul.f32 %v6620_v19, %v6619_v49  ;;  %v4273_v19 = vrot.slane %v8538_v0, 2 }
 0x2cc   : > { %v8471_v20 = vpop.permute.xlu0 %1973  ;;  %v2521_v51 = vsel %vm2499_vm13, %v2488_v58, %v2161_v12  ;;  %v8519_v12 = vsel %vm1224_vm4, %v3934_v60, %v3935_v54 }
 0x2cd   : > { %2174 = vrot.lane.b32.xlu1 %v1825_v3, %s6754_s28  ;;  %v3938_v40 = vrot.slane %v3873_v25, 7  ;;  %v4095_v43 = vrot.slane %v8519_v12, 1  ;;  %v2456_v35 = vsel %vm2433_vm10, %v2423_v17, %v8471_v20  ;;  %v3941_v25 = vrot.slane %v3875_v1, 7 }
 0x2ce   : > { %2176 = vrot.lane.b32.xlu0 %v1827_v16, %s6754_s28  ;;  %v3876_v1 = vmul.f32 %v6628_v27, %v6627_v6  ;;  %v6632_v27 = vld [vmem:[%s6864_s27 + $0x40] sm:$0xff] }
 0x2cf   : > { %v8484_v23 = vpop.permute.xlu1 %1874  ;;  %v4047_v20 = vsel %vm1224_vm4, %v3938_v40, 0.0  ;;  %v4048_v13 = vsel %vm1224_vm4, %v3941_v25, 0.0 }
 0x2d0   : > { %v8486_v2 = vpop.permute.xlu0 %1678  ;;  %v4102_v49 = vrot.slane %v4047_v20, 1  ;;  %v4281_v17 = vrot.slane %v4047_v20, 2  ;;  %v4286_v44 = vrot.slane %v4048_v13, 2 }
 0x2d1   : > { %1888 = vrot.lane.b32.xlu1 %v1825_v3, %s6751_s18  ;;  %v4046_v3 = vsel %vm1224_vm4, %v3935_v54, 0.0 }
 0x2d2   : > { %1890 = vrot.lane.b32.xlu0 %v1827_v16, %s6751_s18  ;;  %v3937_v16 = vrot.slane %v3872_v38, 7  ;;  %v4097_v56 = vrot.slane %v4046_v3, 1 }
 0x2d3   : > { %v2254_v41 = vpop.permute.xlu1 %2253 }
 0x2d4   : > { %v2070_v52 = vpop.permute.xlu0 %2069  ;;  %v2554_v30 = vsel %vm2532_vm14, %v2521_v51, %v2254_v41  ;;  %v10120_v51 = vld [vmem:[#allocation4_spill] sm:$0xff]  ;;  %v4274_v41 = vrot.slane %v8519_v12, 2  ;;  %v4098_v26 = vsel %vm1383_vm5, %v4095_v43, %v4097_v56  ;;  %v6626_v56 = vld [vmem:[%s6864_s27 + $0x38] sm:$0xff] }
 0x2d5   : > { %2267 = vrot.lane.b32.xlu1 %v1926_v36, %s6755_s30  ;;  %6102 = vmatmul.mubr.msk.f32.gmra.mrb[22].mxu1 %vm2575_vm15, %v2554_v30  ;;  %v4276_v30 = vrot.slane %v4046_v3, 2  ;;  %v3877_v62 = vmul.f32 %v6626_v56, %v6625_v48  ;;  %v6629_v48 = vld [vmem:[%s6855_s24 + $0x48] sm:$0xff] }
 0x2d6   : > { %2269 = vrot.lane.b32.xlu0 %v1928_v7, %s6755_s30  ;;  %v6630_v56 = vld [vmem:[%s6864_s27 + $0x48] sm:$0xff] }
 0x2d7   : > { %v8505_v50 = vpop.permute.xlu1 %1975  ;;  %v4277_v3 = vsel %vm1554_vm6, %v4274_v41, %v4276_v30 }
 0x2d8   : > { %v8507_v10 = vpop.permute.xlu0 %1774 }
 0x2d9   : > { %1989 = vrot.lane.b32.xlu1 %v1926_v36, %s6753_s21  ;;  %v8556_v36 = vsel %vm1224_vm4, %v3937_v16, %v3938_v40  ;;  %v4096_v40 = vsel %vm1383_vm5, %v4094_v37, %v4095_v43 }
 0x2da   : > { %2085 = vrot.lane.b32.xlu0 %v10117_v9, %s6752_s19  ;;  %v3940_v9 = vrot.slane %v8544_v29, 7  ;;  %v4275_v29 = vsel %vm1554_vm6, %v4273_v19, %v4274_v41  ;;  %v3944_v41 = vrot.slane %v3877_v62, 7  ;;  %v3879_v62 = vmul.f32 %v6630_v56, %v6629_v48  ;;  %v6636_v48 = vld [vmem:[%s6864_s27 + $0x50] sm:$0xff] }
 0x2db   : > { %v8516_v28 = vpop.permute.xlu1 %1680 }
 0x2dc   : > { %v2163_v55 = vpop.permute.xlu0 %2162  ;;  %v8600_v30 = vsel %vm1224_vm4, %v3940_v9, %v3941_v25 }
 0x2dd   : > { %1991 = vrot.lane.b32.xlu1 %v1928_v7, %s6753_s21  ;;  %v2489_v7 = vsel %vm2466_vm12, %v2456_v35, %v2070_v52  ;;  %v4100_v52 = vrot.slane %v8556_v36, 1  ;;  %v2358_v35 = vsel %vm581_vm0, %v2327_v33, %v8438_v34  ;;  %10122 = vst [vmem:[#allocation12_spill] sm:$0xff] %v8600_v30  ;;  %v3943_v34 = vrot.slane %v3876_v1, 7 }
 0x2de   : > { %2271 = vrot.lane.b32.xlu0 %v10119_v5, %s6755_s30  ;;  %v2522_v60 = vsel %vm2499_vm13, %v2489_v7, %v2163_v55  ;;  %v2391_v7 = vsel %vm2367_vm9, %v2358_v35, %v8461_v42  ;;  %v4105_v42 = vrot.slane %v8600_v30, 1 }
 0x2df   : > { %v8533_v8 = vpop.permute.xlu1 %2071  ;;  %v4103_v43 = vsel %vm1383_vm5, %v4100_v52, %v4102_v49  ;;  %v2424_v20 = vsel %vm2400_vm11, %v2391_v7, %v8484_v23  ;;  %v3947_v7 = vrot.slane %v3879_v62, 7 }
 0x2e0   : > { %v8535_v58 = vpop.permute.xlu0 %1876 }
 0x2e1   : > { %2178 = vrot.lane.b32.xlu1 %v10120_v51, %s6754_s28 }
 0x2e2   : > { %4353 = vrot.lane.b32.xlu0 %v10119_v5, %s6751_s18  ;;  %v8582_v5 = vsel %vm1224_vm4, 0.0, %v3937_v16  ;;  %v4279_v16 = vrot.slane %v8556_v36, 2 }
 0x2e3   : > { %v8563_v54 = vpop.permute.xlu1 %1776  ;;  %v4278_v19 = vrot.slane %v8582_v5, 2 }
 0x2e4   : > { %v2256_v24 = vpop.permute.xlu0 %2255  ;;  %v8566_v38 = vpop.f32.mrb[8].mxu1  ;;  %v4282_v49 = vsel %vm1554_vm6, %v4279_v16, %v4281_v17 }
 0x2e5   : > { %v2555_v14 = vsel %vm2532_vm14, %v2522_v60, %v2256_v24  ;;  %4174 = vrot.lane.b32.xlu1 %v10120_v51, %s6749_s16  ;;  %v8574_v55 = vpop.f32.mrb[9].mxu1  ;;  %v4099_v51 = vrot.slane %v8582_v5, 1  ;;  %v2457_v60 = vsel %vm2433_vm10, %v2424_v20, %v8505_v50  ;;  %v4107_v24 = vrot.slane %v4048_v13, 1 }
 0x2e6   : > { %4178 = vrot.lane.b32.xlu0 %v4098_v26, %s6749_s16  ;;  %6104 = vmatprep.mubr.msk.f32.mxu1 %vm2575_vm15, %v2555_v14  ;;  %v2490_v14 = vsel %vm2466_vm12, %v2457_v60, %v8533_v8  ;;  %v6631_v8 = vld [vmem:[%s6855_s24 + $0x40] sm:$0xff] }
 0x2e7   : > { %v2165_v32 = vpop.permute.xlu1 %2164  ;;  %v4101_v23 = vsel %vm1383_vm5, %v4099_v51, %v4100_v52  ;;  %v3878_v1 = vmul.f32 %v6632_v27, %v6631_v8  ;;  %v4108_v52 = vsel %vm1383_vm5, %v4105_v42, %v4107_v24 }
 0x2e8   : > { %v8579_v46 = vpop.permute.xlu0 %1977  ;;  %v2523_v50 = vsel %vm2499_vm13, %v2490_v14, %v2165_v32  ;;  %v4284_v32 = vrot.slane %v8600_v30, 2  ;;  %v10138_v30 = vld [vmem:[#allocation49_spill] sm:$0xff] }
 0x2e9   : > { %4176 = vrot.lane.b32.xlu1 %v4096_v40, %s6749_s16  ;;  %v8625_v40 = vsel %vm1224_vm4, 0.0, %v3940_v9  ;;  %v4280_v9 = vsel %vm1554_vm6, %v4278_v19, %v4279_v16  ;;  %v3946_v20 = vrot.slane %v3878_v1, 7  ;;  %v6634_v19 = vld [vmem:[%s6864_s27 + $0x58] sm:$0xff]  ;;  %v4050_v1 = vsel %vm1224_vm4, %v3947_v7, 0.0 }
 0x2ea   : > { %4357 = vrot.lane.b32.xlu0 %v4277_v3, %s6751_s18  ;;  %10123 = vst [vmem:[#allocation14_spill] sm:$0xff] %v8625_v40  ;;  %v4104_v33 = vrot.slane %v8625_v40, 1  ;;  %v4283_v13 = vrot.slane %v8625_v40, 2 }
 0x2eb   : > { %v8605_v26 = vpop.permute.xlu1 %1878  ;;  %v8669_v27 = vsel %vm1224_vm4, %v3946_v20, %v3947_v7 }
 0x2ec   : > { %v8607_v37 = vpop.permute.xlu0 %1513  ;;  %v4106_v60 = vsel %vm1383_vm5, %v4104_v33, %v4105_v42  ;;  %v4285_v42 = vsel %vm1554_vm6, %v4283_v13, %v4284_v32  ;;  %10126 = vst [vmem:[#allocation17_spill] sm:$0xff] %v8669_v27  ;;  %v4117_v33 = vrot.slane %v4050_v1, 1 }
 0x2ed   : > { %4355 = vrot.lane.b32.xlu1 %v4275_v29, %s6751_s18  ;;  %v4049_v29 = vsel %vm1224_vm4, %v3944_v41, 0.0 }
 0x2ee   : > { %4182 = vrot.lane.b32.xlu0 %v4103_v43, %s6749_s16  ;;  %v8640_v43 = vsel %vm1224_vm4, %v3943_v34, %v3944_v41  ;;  %v4112_v51 = vrot.slane %v4049_v29, 1  ;;  %v4287_v41 = vsel %vm1554_vm6, %v4284_v32, %v4286_v44  ;;  %v4291_v8 = vrot.slane %v4049_v29, 2 }
 0x2ef   : > { %v2258_v25 = vpop.permute.xlu1 %2257  ;;  %10124 = vst [vmem:[#allocation13_spill] sm:$0xff] %v8640_v43  ;;  %v4110_v16 = vrot.slane %v8640_v43, 1  ;;  %v4115_v32 = vrot.slane %v8669_v27, 1 }
 0x2f0   : > { %v8622_v3 = vpop.permute.xlu0 %1979  ;;  %v2556_v6 = vsel %vm2532_vm14, %v2523_v50, %v2258_v25  ;;  %v6635_v25 = vld [vmem:[%s6855_s24 + $0x50] sm:$0xff] }
 0x2f1   : > { %4180 = vrot.lane.b32.xlu1 %v4101_v23, %s6749_s16  ;;  %6105 = vmatmul.mubr.msk.f32.gmra.mrb[24].mxu1 %vm2575_vm15, %v2556_v6  ;;  %v6633_v23 = vld [vmem:[%s6855_s24 + $0x58] sm:$0xff]  ;;  %v3880_v56 = vmul.f32 %v6636_v48, %v6635_v25  ;;  %v4113_v62 = vsel %vm1383_vm5, %v4110_v16, %v4112_v51  ;;  %v4289_v6 = vrot.slane %v8640_v43, 2  ;;  %v4294_v48 = vrot.slane %v8669_v27, 2  ;;  %v6655_v43 = vld [vmem:[%s6855_s24 + $0xa0] sm:$0xff] }
 0x2f2   : > { %4361 = vrot.lane.b32.xlu0 %v4282_v49, %s6751_s18  ;;  %v8656_v49 = vsel %vm1224_vm4, 0.0, %v3943_v34  ;;  %v3881_v50 = vmul.f32 %v6634_v19, %v6633_v23  ;;  %v8685_v23 = vsel %vm1224_vm4, 0.0, %v3946_v20  ;;  %v10128_v19 = vld [vmem:[#allocation48_spill] sm:$0xff] }
 0x2f3   : > { %v8643_v17 = vpop.permute.xlu1 %1682  ;;  %10125 = vst [vmem:[#allocation15_spill] sm:$0xff] %v8656_v49  ;;  %v4109_v34 = vrot.slane %v8656_v49, 1  ;;  %v3949_v29 = vrot.slane %v3880_v56, 7  ;;  %v4292_v51 = vsel %vm1554_vm6, %v4289_v6, %v4291_v8  ;;  %10127 = vst [vmem:[#allocation16_spill] sm:$0xff] %v8685_v23  ;;  %v4296_v56 = vrot.slane %v4050_v1, 2 }
 0x2f4   : > { %v8645_v35 = vpop.permute.xlu0 %1684 }
 0x2f5   : > { %4359 = vrot.lane.b32.xlu1 %v4280_v9, %s6751_s18  ;;  %v3950_v9 = vrot.slane %v3881_v50, 7  ;;  %v4111_v13 = vsel %vm1383_vm5, %v4109_v34, %v4110_v16  ;;  %v2328_v50 = vsel %vm2304_vm8, %v7510_v45, %v10128_v19  ;;  %v4118_v16 = vsel %vm1383_vm5, %v4115_v32, %v4117_v33  ;;  %v6637_v34 = vld [vmem:[%s6855_s24 + $0x68] sm:$0xff]  ;;  %v6639_v19 = vld [vmem:[%s6855_s24 + $0x60] sm:$0xff] }
 0x2f6   : > { %4186 = vrot.lane.b32.xlu0 %v4108_v52, %s6749_s16  ;;  %v2359_v20 = vsel %vm581_vm0, %v2328_v50, %v8486_v2  ;;  %v4114_v45 = vrot.slane %v8685_v23, 1  ;;  %v6640_v33 = vld [vmem:[%s6864_s27 + $0x60] sm:$0xff] }
 0x2f7   : > { %v2074_v24 = vpop.permute.xlu1 %2073  ;;  %v8703_v8 = vsel %vm1224_vm4, %v3949_v29, %v3950_v9  ;;  %v2392_v1 = vsel %vm2367_vm9, %v2359_v20, %v8507_v10  ;;  %v4293_v20 = vrot.slane %v8685_v23, 2  ;;  %v6654_v23 = vld [vmem:[%s6864_s27 + $0xa8] sm:$0xff] }
 0x2f8   : > { %v8653_v14 = vpop.permute.xlu0 %2075  ;;  %10129 = vst [vmem:[#allocation18_spill] sm:$0xff] %v8703_v8  ;;  %v4120_v10 = vrot.slane %v8703_v8, 1 }
 0x2f9   : > { %4184 = vrot.lane.b32.xlu1 %v4106_v60, %s6749_s16 }
 0x2fa   : > { %4365 = vrot.lane.b32.xlu0 %v4287_v41, %s6751_s18  ;;  %v4288_v41 = vrot.slane %v8656_v49, 2  ;;  %v3882_v49 = vmul.f32 %v6640_v33, %v6639_v19  ;;  %v8728_v19 = vsel %vm1224_vm4, 0.0, %v3949_v29  ;;  %v4299_v29 = vrot.slane %v8703_v8, 2 }
 0x2fb   : > { %v8672_v52 = vpop.permute.xlu1 %1778  ;;  %10130 = vst [vmem:[#allocation20_spill] sm:$0xff] %v8728_v19 }
 0x2fc   : > { %v8674_v44 = vpop.permute.xlu0 %1780 }
 0x2fd   : > { %4363 = vrot.lane.b32.xlu1 %v4285_v42, %s6751_s18  ;;  %v4290_v42 = vsel %vm1554_vm6, %v4288_v41, %v4289_v6  ;;  %v4051_v6 = vsel %vm1224_vm4, %v3950_v9, 0.0  ;;  %v2425_v41 = vsel %vm2400_vm11, %v2392_v1, %v8535_v58  ;;  %v4116_v9 = vsel %vm1383_vm5, %v4114_v45, %v4115_v32  ;;  %v6641_v45 = vld [vmem:[%s6855_s24 + $0x78] sm:$0xff] }
 0x2fe   : > { %4190 = vrot.lane.b32.xlu0 %v4113_v62, %s6749_s16  ;;  %v2458_v50 = vsel %vm2433_vm10, %v2425_v41, %v8579_v46  ;;  %v4122_v58 = vrot.slane %v4051_v6, 1 }
 0x2ff   : > { %v2167_v7 = vpop.permute.xlu1 %2166 }
 0x300   : > { %v8682_v60 = vpop.permute.xlu0 %2168  ;;  %v8690_v25 = vpop.f32.mrb[10].mxu1 }
 0x301   : > { %4188 = vrot.lane.b32.xlu1 %v4111_v13, %s6749_s16  ;;  %v8698_v62 = vpop.f32.mrb[11].mxu1 }
 0x302   : > { %4369 = vrot.lane.b32.xlu0 %v4292_v51, %s6751_s18  ;;  %v6638_v51 = vld [vmem:[%s6864_s27 + $0x68] sm:$0xff] }
 0x303   : > { %v3883_v13 = vmul.f32 %v6638_v51, %v6637_v34  ;;  %v8711_v27 = vpop.permute.xlu1 %1880  ;;  %v4297_v34 = vsel %vm1554_vm6, %v4294_v48, %v4296_v56  ;;  %v2491_v51 = vsel %vm2466_vm12, %v2458_v50, %v2074_v24  ;;  %v10131_v24 = vld [vmem:[#allocation47_spill] sm:$0xff] }
 0x304   : > { %v8713_v2 = vpop.permute.xlu0 %1515  ;;  %v2329_v32 = vsel %vm2304_vm8, %v7507_v15, %v10131_v24  ;;  %v4295_v15 = vsel %vm1554_vm6, %v4293_v20, %v4294_v48 }
 0x305   : > { %4367 = vrot.lane.b32.xlu1 %v4290_v42, %s6751_s18  ;;  %v3953_v46 = vrot.slane %v3883_v13, 7  ;;  %v2524_v42 = vsel %vm2499_vm13, %v2491_v51, %v2167_v7  ;;  %v4119_v7 = vrot.slane %v8728_v19, 1  ;;  %v6642_v13 = vld [vmem:[%s6864_s27 + $0x78] sm:$0xff]  ;;  %v2360_v50 = vsel %vm581_vm0, %v2329_v32, %v8516_v28 }
 0x306   : > { %4194 = vrot.lane.b32.xlu0 %v4118_v16, %s6749_s16  ;;  %v3952_v16 = vrot.slane %v3882_v49, 7  ;;  %v4301_v49 = vrot.slane %v4051_v6, 2  ;;  %v3885_v41 = vmul.f32 %v6642_v13, %v6641_v45  ;;  %v4123_v51 = vsel %vm1383_vm5, %v4120_v10, %v4122_v58 }
 0x307   : > { %v2260_v33 = vpop.permute.xlu1 %2259  ;;  %v2393_v6 = vsel %vm2367_vm9, %v2360_v50, %v8563_v54  ;;  %v4052_v28 = vsel %vm1224_vm4, %v3953_v46, 0.0  ;;  %v4121_v20 = vsel %vm1383_vm5, %v4119_v7, %v4120_v10  ;;  %v4298_v13 = vrot.slane %v8728_v19, 2 }
 0x308   : > { %v8731_v56 = vpop.permute.xlu0 %1981  ;;  %v2557_v1 = vsel %vm2532_vm14, %v2524_v42, %v2260_v33  ;;  %v6644_v42 = vld [vmem:[%s6864_s27 + $0x70] sm:$0xff]  ;;  %v8757_v45 = vsel %vm1224_vm4, %v3952_v16, %v3953_v46  ;;  %v2426_v58 = vsel %vm2400_vm11, %v2393_v6, %v8605_v26  ;;  %v4302_v54 = vsel %vm1554_vm6, %v4299_v29, %v4301_v49  ;;  %v6647_v6 = vld [vmem:[%s6855_s24 + $0x80] sm:$0xff] }
 0x309   : > { %4192 = vrot.lane.b32.xlu1 %v4116_v9, %s6749_s16  ;;  %6107 = vmatprep.mubr.msk.f32.mxu1 %vm2575_vm15, %v2557_v1  ;;  %10132 = vst [vmem:[#allocation19_spill] sm:$0xff] %v8757_v45  ;;  %v2459_v48 = vsel %vm2433_vm10, %v2426_v58, %v8622_v3  ;;  %v4125_v32 = vrot.slane %v8757_v45, 1  ;;  %v4127_v46 = vrot.slane %v4052_v28, 1  ;;  %v3956_v26 = vrot.slane %v3885_v41, 7  ;;  %v6648_v58 = vld [vmem:[%s6864_s27 + $0x80] sm:$0xff] }
 0x30a   : > { %4373 = vrot.lane.b32.xlu0 %v4297_v34, %s6751_s18  ;;  %v6643_v34 = vld [vmem:[%s6855_s24 + $0x70] sm:$0xff]  ;;  %v2492_v1 = vsel %vm2466_vm12, %v2459_v48, %v8653_v14  ;;  %v8777_v10 = vsel %vm1224_vm4, 0.0, %v3952_v16  ;;  %v4304_v7 = vrot.slane %v8757_v45, 2  ;;  %v4306_v41 = vrot.slane %v4052_v28, 2  ;;  %v6646_v16 = vld [vmem:[%s6864_s27 + $0x88] sm:$0xff] }
 0x30b   : > { %v3884_v9 = vmul.f32 %v6644_v42, %v6643_v34  ;;  %v8752_v33 = vpop.permute.xlu1 %1882  ;;  %v2525_v50 = vsel %vm2499_vm13, %v2492_v1, %v8682_v60  ;;  %10133 = vst [vmem:[#allocation21_spill] sm:$0xff] %v8777_v10  ;;  %v4128_v60 = vsel %vm1383_vm5, %v4125_v32, %v4127_v46  ;;  %v4124_v34 = vrot.slane %v8777_v10, 1  ;;  %v6645_v42 = vld [vmem:[%s6855_s24 + $0x88] sm:$0xff]  ;;  %v6652_v45 = vld [vmem:[%s6864_s27 + $0x90] sm:$0xff] }
 0x30c   : > { %v8754_v24 = vpop.permute.xlu0 %1517  ;;  %v3886_v48 = vmul.f32 %v6648_v58, %v6647_v6  ;;  %v4053_v1 = vsel %vm1224_vm4, %v3956_v26, 0.0  ;;  %v6649_v6 = vld [vmem:[%s6855_s24 + $0x98] sm:$0xff] }
 0x30d   : > { %4371 = vrot.lane.b32.xlu1 %v4295_v15, %s6751_s18  ;;  %v3955_v3 = vrot.slane %v3884_v9, 7  ;;  %v4300_v15 = vsel %vm1554_vm6, %v4298_v13, %v4299_v29  ;;  %v3887_v9 = vmul.f32 %v6646_v16, %v6645_v42  ;;  %v4307_v29 = vsel %vm1554_vm6, %v4304_v7, %v4306_v41  ;;  %v6651_v41 = vld [vmem:[%s6855_s24 + $0x90] sm:$0xff] }
 0x30e   : > { %4198 = vrot.lane.b32.xlu0 %v4123_v51, %s6749_s16  ;;  %v4126_v46 = vsel %vm1383_vm5, %v4124_v34, %v4125_v32  ;;  %v3958_v42 = vrot.slane %v3886_v48, 7  ;;  %v3888_v32 = vmul.f32 %v6652_v45, %v6651_v41 }
 0x30f   : > { %v2262_v51 = vpop.permute.xlu1 %2261  ;;  %v8796_v28 = vsel %vm1224_vm4, %v3955_v3, %v3956_v26 }
 0x310   : > { %v8774_v49 = vpop.permute.xlu0 %1983  ;;  %v2558_v14 = vsel %vm2532_vm14, %v2525_v50, %v2262_v51  ;;  %10134 = vst [vmem:[#allocation11_spill] sm:$0xff] %v8796_v28  ;;  %v4130_v13 = vrot.slane %v8796_v28, 1  ;;  %v4132_v50 = vrot.slane %v4053_v1, 1  ;;  %v4303_v51 = vrot.slane %v8777_v10, 2 }
 0x311   : > { %4196 = vrot.lane.b32.xlu1 %v4121_v20, %s6749_s16  ;;  %6108 = vmatmul.mubr.msk.f32.gmra.mrb[26].mxu1 %vm2575_vm15, %v2558_v14  ;;  %v3959_v14 = vrot.slane %v3887_v9, 7  ;;  %v4309_v34 = vrot.slane %v8796_v28, 2  ;;  %v4311_v9 = vrot.slane %v4053_v1, 2  ;;  %v8843_v28 = vsel %vm1224_vm4, 0.0, %v3958_v42 }
 0x312   : > { %4377 = vrot.lane.b32.xlu0 %v4302_v54, %s6751_s18  ;;  %v4133_v48 = vsel %vm1383_vm5, %v4130_v13, %v4132_v50  ;;  %v4305_v10 = vsel %vm1554_vm6, %v4303_v51, %v4304_v7  ;;  %10137 = vst [vmem:[#allocation36_spill] sm:$0xff] %v8843_v28 }
 0x313   : > { %v8791_v54 = vpop.permute.xlu1 %1686  ;;  %v4054_v45 = vsel %vm1224_vm4, %v3959_v14, 0.0  ;;  %v4312_v7 = vsel %vm1554_vm6, %v4309_v34, %v4311_v9  ;;  %v6656_v9 = vld [vmem:[%s6864_s27 + $0xa0] sm:$0xff] }
 0x314   : > { %v8793_v20 = vpop.permute.xlu0 %1688  ;;  %v8849_v40 = vmul.f32 %v6656_v9, %v6655_v43 }
 0x315   : > { %4375 = vrot.lane.b32.xlu1 %v4300_v15, %s6751_s18  ;;  %v6650_v15 = vld [vmem:[%s6864_s27 + $0x98] sm:$0xff] }
 0x316   : > { %4202 = vrot.lane.b32.xlu0 %v4128_v60, %s6749_s16  ;;  %v8810_v60 = vsel %vm1224_vm4, 0.0, %v3955_v3  ;;  %v3889_v58 = vmul.f32 %v6650_v15, %v6649_v6  ;;  %v8827_v6 = vsel %vm1224_vm4, %v3958_v42, %v3959_v14  ;;  %v4137_v14 = vrot.slane %v4054_v45, 1 }
 0x317   : > { %v8805_v16 = vpop.permute.xlu1 %2077  ;;  %10135 = vst [vmem:[#allocation23_spill] sm:$0xff] %v8810_v60  ;;  %v4129_v3 = vrot.slane %v8810_v60, 1  ;;  %10136 = vst [vmem:[#allocation22_spill] sm:$0xff] %v8827_v6  ;;  %v4135_v15 = vrot.slane %v8827_v6, 1 }
 0x318   : > { %v8807_v26 = vpop.permute.xlu0 %2079 }
 0x319   : > { %4200 = vrot.lane.b32.xlu1 %v4126_v46, %s6749_s16  ;;  %v3961_v46 = vrot.slane %v3888_v32, 7  ;;  %v4131_v51 = vsel %vm1383_vm5, %v4129_v3, %v4130_v13  ;;  %v2330_v13 = vsel %vm2304_vm8, %v10091_v22, %v10138_v30  ;;  %v4314_v3 = vrot.slane %v8827_v6, 2 }
 0x31a   : > { %4381 = vrot.lane.b32.xlu0 %v4307_v29, %s6751_s18  ;;  %v3962_v29 = vrot.slane %v3889_v58, 7  ;;  %v4308_v58 = vrot.slane %v8810_v60, 2  ;;  %v4316_v60 = vrot.slane %v4054_v45, 2  ;;  %v2361_v43 = vsel %vm581_vm0, %v2330_v13, %v8643_v17 }
 0x31b   : > { %v8822_v19 = vpop.permute.xlu1 %1782  ;;  %v4134_v22 = vrot.slane %v8843_v28, 1  ;;  %v2394_v30 = vsel %vm2367_vm9, %v2361_v43, %v8672_v52  ;;  %v3964_v6 = vrot.slane %v8849_v40, 7  ;;  %v8889_v43 = vsel %vm1224_vm4, 0.0, %v3961_v46 }
 0x31c   : > { %v8824_v8 = vpop.permute.xlu0 %1784  ;;  %v8830_v1 = vpop.f32.mrb[12].mxu1  ;;  %v8858_v42 = vsel %vm1224_vm4, %v3961_v46, %v3962_v29  ;;  %v4310_v9 = vsel %vm1554_vm6, %v4308_v58, %v4309_v34  ;;  %v4317_v58 = vsel %vm1554_vm6, %v4314_v3, %v4316_v60  ;;  %10140 = vst [vmem:[#allocation27_spill] sm:$0xff] %v8889_v43 }
 0x31d   : > { %4379 = vrot.lane.b32.xlu1 %v4305_v10, %s6751_s18  ;;  %v8835_v50 = vpop.f32.mrb[13].mxu1  ;;  %10139 = vst [vmem:[#allocation25_spill] sm:$0xff] %v8858_v42  ;;  %v4140_v34 = vrot.slane %v8858_v42, 1 }
 0x31e   : > { %4206 = vrot.lane.b32.xlu0 %v4133_v48, %s6749_s16  ;;  %v6653_v48 = vld [vmem:[%s6855_s24 + $0xa8] sm:$0xff] }
 0x31f   : > { %v2171_v41 = vpop.permute.xlu1 %2170  ;;  %v3891_v10 = vmul.f32 %v6654_v23, %v6653_v48  ;;  %v4055_v23 = vsel %vm1224_vm4, %v3962_v29, 0.0  ;;  %v4138_v48 = vsel %vm1383_vm5, %v4135_v15, %v4137_v14  ;;  %v2427_v29 = vsel %vm2400_vm11, %v2394_v30, %v8711_v27  ;;  %v6658_v30 = vld [vmem:[%s6864_s27 + $0xb8] sm:$0xff] }
 0x320   : > { %v8840_v32 = vpop.permute.xlu0 %2172  ;;  %v2460_v17 = vsel %vm2433_vm10, %v2427_v29, %v8731_v56  ;;  %v4142_v52 = vrot.slane %v4055_v23, 1  ;;  %v4313_v27 = vrot.slane %v8843_v28, 2 }
 0x321   : > { %4204 = vrot.lane.b32.xlu1 %v4131_v51, %s6749_s16  ;;  %v3965_v51 = vrot.slane %v3891_v10, 7  ;;  %v2493_v14 = vsel %vm2466_vm12, %v2460_v17, %v8805_v16  ;;  %v4136_v10 = vsel %vm1383_vm5, %v4134_v22, %v4135_v15  ;;  %v2331_v16 = vsel %vm2304_vm8, %v10093_v57, %v8607_v37  ;;  %v6657_v37 = vld [vmem:[%s6855_s24 + $0xb8] sm:$0xff]  ;;  %v6659_v17 = vld [vmem:[%s6855_s24 + $0xb0] sm:$0xff] }
 0x322   : > { %4385 = vrot.lane.b32.xlu0 %v4312_v7, %s6751_s18  ;;  %v2526_v40 = vsel %vm2499_vm13, %v2493_v14, %v2171_v41  ;;  %v4143_v60 = vsel %vm1383_vm5, %v4140_v34, %v4142_v52  ;;  %v4319_v15 = vrot.slane %v8858_v42, 2  ;;  %v4321_v41 = vrot.slane %v4055_v23, 2  ;;  %v6660_v52 = vld [vmem:[%s6864_s27 + $0xb0] sm:$0xff]  ;;  %v6672_v42 = vld [vmem:[%s6864_s27 + $0xe0] sm:$0xff] }
 0x323   : > { %v8868_v7 = vpop.permute.xlu1 %1884  ;;  %v2362_v46 = vsel %vm581_vm0, %v2331_v16, %v8645_v35  ;;  %v4139_v22 = vrot.slane %v8889_v43, 1  ;;  %v8905_v57 = vsel %vm1224_vm4, %v3964_v6, %v3965_v51  ;;  %v3893_v29 = vmul.f32 %v6658_v30, %v6657_v37 }
 0x324   : > { %v8870_v45 = vpop.permute.xlu0 %1519  ;;  %10141 = vst [vmem:[#allocation24_spill] sm:$0xff] %v8905_v57  ;;  %v3892_v14 = vmul.f32 %v6660_v52, %v6659_v17  ;;  %v2395_v23 = vsel %vm2367_vm9, %v2362_v46, %v8674_v44  ;;  %v4145_v44 = vrot.slane %v8905_v57, 1  ;;  %v8937_v37 = vsel %vm1224_vm4, 0.0, %v3964_v6  ;;  %v6662_v6 = vld [vmem:[%s6864_s27 + $0xc8] sm:$0xff] }
 0x325   : > { %4383 = vrot.lane.b32.xlu1 %v4310_v9, %s6751_s18  ;;  %v4315_v9 = vsel %vm1554_vm6, %v4313_v27, %v4314_v3  ;;  %v4056_v3 = vsel %vm1224_vm4, %v3965_v51, 0.0  ;;  %v4141_v51 = vsel %vm1383_vm5, %v4139_v22, %v4140_v34  ;;  %v3968_v16 = vrot.slane %v3893_v29, 7  ;;  %10142 = vst [vmem:[#allocation38_spill] sm:$0xff] %v8937_v37  ;;  %v6661_v29 = vld [vmem:[%s6855_s24 + $0xc8] sm:$0xff] }
 0x326   : > { %4210 = vrot.lane.b32.xlu0 %v4138_v48, %s6749_s16  ;;  %v4326_v30 = vrot.slane %v4056_v3, 2  ;;  %v3895_v17 = vmul.f32 %v6662_v6, %v6661_v29 }
 0x327   : > { %v2264_v56 = vpop.permute.xlu1 %2263 }
 0x328   : > { %v8886_v13 = vpop.permute.xlu0 %1985  ;;  %v2559_v48 = vsel %vm2532_vm14, %v2526_v40, %v2264_v56  ;;  %v4322_v40 = vsel %vm1554_vm6, %v4319_v15, %v4321_v41  ;;  %v8926_v56 = vld [vmem:[#allocation2] ss:$0 sm:$0xff] }
 0x329   : > { %4208 = vrot.lane.b32.xlu1 %v4136_v10, %s6749_s16  ;;  %6110 = vmatprep.mubr.msk.f32.mxu1 %vm2575_vm15, %v2559_v48  ;;  %v2428_v10 = vsel %vm2400_vm11, %v2395_v23, %v8752_v33  ;;  %v4147_v33 = vrot.slane %v4056_v3, 1  ;;  %v2743_v22 = vadd.f32 %v8926_v56, %v8316_v39  ;;  %v4144_v23 = vrot.slane %v8937_v37, 1  ;;  %v6664_v39 = vld [vmem:[%s6864_s27 + $0xc0] sm:$0xff] }
 0x32a   : > { %4389 = vrot.lane.b32.xlu0 %v4317_v58, %s6751_s18  ;;  %v2461_v27 = vsel %vm2433_vm10, %v2428_v10, %v8774_v49  ;;  %v4318_v49 = vrot.slane %v8889_v43, 2  ;;  %v6663_v10 = vld [vmem:[%s6855_s24 + $0xc0] sm:$0xff]  ;;  %v6669_v43 = vld [vmem:[%s6855_s24 + $0xe8] sm:$0xff] }
 0x32b   : > { %v8913_v58 = vpop.permute.xlu1 %1886  ;;  %v2494_v48 = vsel %vm2466_vm12, %v2461_v27, %v8807_v26  ;;  %v735_v26 = vld [vmem:[%s9962_s5] sm:$0x1]  ;;  %v4148_v52 = vsel %vm1383_vm5, %v4145_v44, %v4147_v33  ;;  %v8956_v27 = vmul.f32 %v6664_v39, %v6663_v10  ;;  %v2901_v33 = vmul.f32 0.5, %v2743_v22 }
 0x32c   : > { %v8915_v35 = vpop.permute.xlu0 %1521  ;;  %v2527_v46 = vsel %vm2499_vm13, %v2494_v48, %v8840_v32  ;;  %v4324_v32 = vrot.slane %v8905_v57, 2 }
 0x32d   : > { %4387 = vrot.lane.b32.xlu1 %v4315_v9, %s6751_s18  ;;  %v3970_v29 = vrot.slane %v8956_v27, 7  ;;  %6547 = vtanh.f32 %v2901_v33  ;;  %v6667_v33 = vld [vmem:[%s6855_s24 + $0xd0] sm:$0xff] }
 0x32e   : > { %4214 = vrot.lane.b32.xlu0 %v4143_v60, %s6749_s16  ;;  %v3967_v60 = vrot.slane %v3892_v14, 7  ;;  %v4320_v14 = vsel %vm1554_vm6, %v4318_v49, %v4319_v15  ;;  %v2748_v15 = vadd.f32 %v8312_v63, %v8926_v56  ;;  %v4146_v49 = vsel %vm1383_vm5, %v4144_v23, %v4145_v44  ;;  %v6666_v44 = vld [vmem:[%s6864_s27 + $0xd8] sm:$0xff] }
 0x32f   : > { %v2266_v41 = vpop.permute.xlu1 %2265 }
 0x330   : > { %v8934_v9 = vpop.permute.xlu0 %1987  ;;  %v2560_v34 = vsel %vm2532_vm14, %v2527_v46, %v2266_v41  ;;  %v4057_v46 = vsel %vm1224_vm4, %v3968_v16, 0.0  ;;  %v2902_v23 = vmul.f32 0.5, %v2748_v15 }
 0x331   : > { %4212 = vrot.lane.b32.xlu1 %v4141_v51, %s6749_s16  ;;  %6111 = vmatmul.mubr.msk.f32.gmra.mrb[28].mxu1 %vm2575_vm15, %v2560_v34  ;;  %v8964_v51 = vsel %vm1224_vm4, %v3967_v60, %v3968_v16  ;;  %v4323_v34 = vrot.slane %v8937_v37, 2  ;;  %v3971_v16 = vrot.slane %v3895_v17, 7 }
 0x332   : > { %4393 = vrot.lane.b32.xlu0 %v4322_v40, %s6751_s18  ;;  %v809_v40 = vadd.f32 %v8012_v18, %v735_v26  ;;  %10143 = vst [vmem:[#allocation29_spill] sm:$0xff] %v8964_v51  ;;  %v4327_v18 = vsel %vm1554_vm6, %v4324_v32, %v4326_v30  ;;  %v4150_v41 = vrot.slane %v8964_v51, 1  ;;  %v4152_v26 = vrot.slane %v4057_v46, 1  ;;  %v6665_v30 = vld [vmem:[%s6855_s24 + $0xd8] sm:$0xff] }
 0x333   : > { %v8959_v48 = vpop.permute.xlu1 %1690  ;;  %v4329_v17 = vrot.slane %v8964_v51, 2  ;;  %v4325_v27 = vsel %vm1554_vm6, %v4323_v34, %v4324_v32  ;;  %v9007_v57 = vsel %vm1224_vm4, %v3970_v29, %v3971_v16  ;;  %v6670_v32 = vld [vmem:[%s6864_s27 + $0xe8] sm:$0xff]  ;;  %v6671_v34 = vld [vmem:[%s6855_s24 + $0xe0] sm:$0xff]  ;;  %6549 = vtanh.f32 %v2902_v23 }
 0x334   : > { %v8961_v3 = vpop.permute.xlu0 %1692  ;;  %v812_v6 = vmax.f32 %v809_v40, 0.0  ;;  %v4331_v40 = vrot.slane %v4057_v46, 2  ;;  %v9012_v46 = vmul.f32 %v6670_v32, %v6669_v43  ;;  %v9016_v28 = vmul.f32 %v6672_v42, %v6671_v34 }
 0x335   : > { %4391 = vrot.lane.b32.xlu1 %v4320_v14, %s6751_s18  ;;  %v8985_v14 = vmul.f32 %v6666_v44, %v6665_v30  ;;  %v6668_v30 = vld [vmem:[%s6864_s27 + $0xd0] sm:$0xff]  ;;  %v10144_v44 = vld [vmem:[#allocation3_spill] sm:$0xff]  ;;  %v4155_v32 = vrot.slane %v9007_v57, 1 }
 0x336   : > { %4218 = vrot.lane.b32.xlu0 %v4148_v52, %s6749_s16  ;;  %v8981_v52 = vsel %vm1224_vm4, 0.0, %v3967_v60  ;;  %v4153_v60 = vsel %vm1383_vm5, %v4150_v41, %v4152_v26  ;;  %v4058_v26 = vsel %vm1224_vm4, %v3971_v16, 0.0  ;;  %v4519_v16 = vld [vmem:[%s9969_s12 + $0x8] sm:$0xf] }
 0x337   : > { %v8976_v63 = vpop.permute.xlu1 %2081  ;;  %v4149_v15 = vrot.slane %v8981_v52, 1  ;;  %v4328_v42 = vrot.slane %v8981_v52, 2  ;;  %v4157_v34 = vrot.slane %v4058_v26, 1 }
 0x338   : > { %v8978_v22 = vpop.permute.xlu0 %2083  ;;  %v8987_v10 = vpop.f32.mrb[14].mxu1 }
 0x339   : > { %4216 = vrot.lane.b32.xlu1 %v4146_v49, %s6749_s16  ;;  %v8992_v39 = vpop.f32.mrb[15].mxu1  ;;  %v813_v49 = vadd.f32 %v812_v6, %v10144_v44  ;;  %v814_v6 = vld [vmem:[%s9963_s6] sm:$0xf]  ;;  %v4151_v44 = vsel %vm1383_vm5, %v4149_v15, %v4150_v41  ;;  %v9044_v15 = vsel %vm1224_vm4, 0.0, %v3970_v29  ;;  %v2332_v29 = vsel %vm2304_vm8, %v8271_v53, %v8713_v2  ;;  %v6548_v2 = vpop.eup %6547 }
 0x33a   : > { %4397 = vrot.lane.b32.xlu0 %v4327_v18, %s6751_s18  ;;  %v8999_v18 = vmul.f32 %v6668_v30, %v6667_v33  ;;  %v4518_v33 = vld [vmem:[%s9969_s12] sm:$0xff]  ;;  %v4332_v30 = vsel %vm1554_vm6, %v4329_v17, %v4331_v40  ;;  %6061 = vmatpush3.msk.msra.mxu0 %vm658_vm1, %v814_v6  ;;  %v2758_v40 = vadd.f32 %v8393_v31, %v8926_v56  ;;  %v3976_v31 = vrot.slane %v9016_v28, 7 }
 0x33b   : > { %v9002_v37 = vpop.permute.xlu1 %1786  ;;  %v6379_v43 = vpack.c.bf16 %v4519_v16, %v4518_v33  ;;  %6063 = vmatmul.mubr.msk.f32.vlgmr.msra.gmra.mrb[2].mxu0 %vm581_vm0, %v813_v49  ;;  %v4336_v16 = vrot.slane %v4058_v26, 2  ;;  %v2333_v49 = vsel %vm2304_vm8, %v8274_v11, %v8754_v24  ;;  %v2363_v26 = vsel %vm581_vm0, %v2332_v29, %v8791_v54 }
 0x33c   : > { %v9004_v51 = vpop.permute.xlu0 %1788  ;;  %v2364_v28 = vsel %vm581_vm0, %v2333_v49, %v8793_v20  ;;  %v4154_v53 = vrot.slane %v9044_v15, 1  ;;  %v2904_v6 = vmul.f32 0.5, %v2758_v40  ;;  %v2763_v11 = vadd.f32 %v8926_v56, %v8468_v59 }
 0x33d   : > { %4395 = vrot.lane.b32.xlu1 %v4325_v27, %s6751_s18  ;;  %v3973_v27 = vrot.slane %v8999_v18, 7  ;;  %6381 = vmatprep.subr.msk.bf16.mxu0 %vm9035_vm3, %v6379_v43  ;;  %v4334_v18 = vrot.slane %v9007_v57, 2  ;;  %v2396_v24 = vsel %vm2367_vm9, %v2363_v26, %v8822_v19 }
 0x33e   : > { %4222 = vrot.lane.b32.xlu0 %v4153_v60, %s6749_s16  ;;  %v3974_v60 = vrot.slane %v8985_v14, 7  ;;  %v2753_v14 = vadd.f32 %v8926_v56, %v8397_v61  ;;  %6384 = vmatpush3.bf16.msk.msra.mxu0 %vm9035_vm3, %v6379_v43  ;;  %v4330_v61 = vsel %vm1554_vm6, %v4328_v42, %v4329_v17  ;;  %v4158_v43 = vsel %vm1383_vm5, %v4155_v32, %v4157_v34 }
 0x33f   : > { %v2175_v33 = vpop.permute.xlu1 %2174  ;;  %v2397_v17 = vsel %vm2367_vm9, %v2364_v28, %v8824_v8  ;;  %v2429_v20 = vsel %vm2400_vm11, %v2396_v24, %v8868_v7  ;;  %v4337_v34 = vsel %vm1554_vm6, %v4334_v18, %v4336_v16  ;;  %v9092_v7 = vsel %vm1224_vm4, 0.0, %v3973_v27 }
 0x340   : > { %v2177_v41 = vpop.permute.xlu0 %2176  ;;  %v2462_v59 = vsel %vm2433_vm10, %v2429_v20, %v8886_v13  ;;  %v9089_v8 = vsel %vm1224_vm4, %v3973_v27, %v3974_v60  ;;  %v4156_v13 = vsel %vm1383_vm5, %v4154_v53, %v4155_v32  ;;  %v2965_v16 = vmul.f32 0.5, %v6548_v2 }
 0x341   : > { %4220 = vrot.lane.b32.xlu1 %v4151_v44, %s6749_s16  ;;  %v2430_v44 = vsel %vm2400_vm11, %v2397_v17, %v8913_v58  ;;  %v2495_v58 = vsel %vm2466_vm12, %v2462_v59, %v8976_v63  ;;  %v2905_v29 = vmul.f32 0.5, %v2763_v11  ;;  %6551 = vtanh.f32 %v2904_v6 }
 0x342   : > { %4401 = vrot.lane.b32.xlu0 %v4332_v30, %s6751_s18  ;;  %v2903_v30 = vmul.f32 0.5, %v2753_v14  ;;  %v2463_v19 = vsel %vm2433_vm10, %v2430_v44, %v8934_v9  ;;  %v4333_v9 = vrot.slane %v9044_v15, 2  ;;  %v6550_v14 = vpop.eup %6549  ;;  %v2528_v49 = vsel %vm2499_vm13, %v2495_v58, %v2175_v33 }
 0x343   : > { %v1889_v42 = vpop.permute.xlu1 %1888  ;;  %v2496_v40 = vsel %vm2466_vm12, %v2463_v19, %v8978_v22  ;;  %v4160_v22 = vrot.slane %v9089_v8, 1  ;;  %v2773_v32 = vadd.f32 %v8926_v56, %v8574_v55  ;;  %v9111_v33 = vsel %vm1224_vm4, %v3974_v60, 0.0 }
 0x344   : > { %v1891_v54 = vpop.permute.xlu0 %1890  ;;  %6553 = vtanh.f32 %v2903_v30  ;;  %v9116_v53 = vsel %vm1224_vm4, 0.0, %v3976_v31  ;;  %v2966_v2 = vmul.f32 0.5, %v6550_v14  ;;  %v2997_v6 = vadd.f32 0.5, %v2965_v16 }
 0x345   : > { %4399 = vrot.lane.b32.xlu1 %v4330_v61, %s6751_s18  ;;  %v2529_v61 = vsel %vm2499_vm13, %v2496_v40, %v2177_v41  ;;  %v4335_v41 = vsel %vm1554_vm6, %v4333_v9, %v4334_v18  ;;  %6555 = vtanh.f32 %v2905_v29  ;;  %v10147_v24 = vrot.slane %v9012_v46, 7 }
 0x346   : > { %4226 = vrot.lane.b32.xlu0 %v4158_v43, %s6749_s16  ;;  %v4159_v43 = vrot.slane %v9092_v7, 1  ;;  %v2334_v17 = vsel %vm2304_vm8, %v8358_v21, %v8870_v45  ;;  %v2335_v18 = vsel %vm2304_vm8, %v8361_v47, %v8915_v35  ;;  %v4162_v20 = vrot.slane %v9111_v33, 1 }
 0x347   : > { %v2268_v26 = vpop.permute.xlu1 %2267  ;;  %v9122_v60 = vsel %vm1224_vm4, %v3976_v31, %v10147_v24  ;;  %v2907_v44 = vmul.f32 0.5, %v2773_v32  ;;  %v2366_v31 = vsel %vm581_vm0, %v2335_v18, %v8961_v3  ;;  %v4164_v21 = vrot.slane %v9116_v53, 1 }
 0x348   : > { %v2270_v27 = vpop.permute.xlu0 %2269  ;;  %v2561_v28 = vsel %vm2532_vm14, %v2528_v49, %v2268_v26  ;;  %v4161_v30 = vsel %vm1383_vm5, %v4159_v43, %v4160_v22  ;;  %v2783_v45 = vadd.f32 %v8926_v56, %v8698_v62  ;;  %v2399_v35 = vsel %vm2367_vm9, %v2366_v31, %v9004_v51 }
 0x349   : > { %v2562_v63 = vsel %vm2532_vm14, %v2529_v61, %v2270_v27  ;;  %4224 = vrot.lane.b32.xlu1 %v4156_v13, %s6749_s16  ;;  %6113 = vmatprep.mubr.msk.f32.mxu1 %vm2575_vm15, %v2561_v28  ;;  %v4165_v59 = vrot.slane %v9122_v60, 1  ;;  %v2432_v3 = vsel %vm2400_vm11, %v2399_v35, %v1891_v54  ;;  %v10148_v13 = vmov %v10147_v24 }
 0x34a   : > { %4405 = vrot.lane.b32.xlu0 %v4337_v34, %s6751_s18  ;;  %6114 = vmatmul.mubr.msk.f32.gmra.mrb[30].mxu1 %vm2575_vm15, %v2562_v63  ;;  %v2365_v34 = vsel %vm581_vm0, %v2334_v17, %v8959_v48  ;;  %v2998_v48 = vadd.f32 0.5, %v2966_v2  ;;  %v9150_v9 = vsel %vm1224_vm4, %v10148_v13, 0.0  ;;  %v2768_v62 = vadd.f32 %v8464_v4, %v8926_v56 }
 0x34b   : > { %v1990_v55 = vpop.permute.xlu1 %1989  ;;  %v2398_v47 = vsel %vm2367_vm9, %v2365_v34, %v9002_v37  ;;  %6557 = vtanh.f32 %v2907_v44  ;;  %v4338_v54 = vrot.slane %v9092_v7, 2  ;;  %v4339_v46 = vrot.slane %v9089_v8, 2  ;;  %v6552_v49 = vpop.eup %6551 }
 0x34c   : > { %v2086_v11 = vpop.permute.xlu0 %2085  ;;  %v2431_v19 = vsel %vm2400_vm11, %v2398_v47, %v1889_v42  ;;  %v4163_v42 = vsel %vm1383_vm5, %v4160_v22, %v4162_v20  ;;  %v2909_v14 = vmul.f32 0.5, %v2783_v45  ;;  %v2793_v16 = vadd.f32 %v8926_v56, %v8835_v50 }
 0x34d   : > { %4403 = vrot.lane.b32.xlu1 %v4335_v41, %s6751_s18  ;;  %v2464_v37 = vsel %vm2433_vm10, %v2431_v19, %v1990_v55  ;;  %v4166_v4 = vsel %vm1383_vm5, %v4164_v21, %v4165_v59  ;;  %v4167_v29 = vrot.slane %v9150_v9, 1  ;;  %v2906_v43 = vmul.f32 0.5, %v2768_v62 }
 0x34e   : > { %3031 = vperm.xlu0 %6545, %v2997_v6   ;;  %v2497_v61 = vsel %vm2466_vm12, %v2464_v37, %v2086_v11  ;;  %v6554_v63 = vpop.eup %6553  ;;  %v2778_v22 = vadd.f32 %v8566_v38, %v8926_v56  ;;  %v4341_v24 = vrot.slane %v9111_v33, 2  ;;  %6559 = vtanh.f32 %v2909_v14  ;;  %v3221_v33 = vld [vmem:[%s9968_s11] sm:$0xf] }
 0x34f   : > { %v1992_v58 = vpop.permute.xlu1 %1991  ;;  %v6556_v41 = vpop.eup %6555  ;;  %v2911_v38 = vmul.f32 0.5, %v2793_v16  ;;  %v2803_v17 = vadd.f32 %v8926_v56, %v8992_v39  ;;  %v2968_v20 = vmul.f32 0.5, %v6552_v49  ;;  %6561 = vtanh.f32 %v2906_v43  ;;  %6119 = vmatprep.subr.msk.mxu1 %vm658_vm1, %v3221_v33 }
 0x350   : > { %v2272_v40 = vpop.permute.xlu0 %2271  ;;  %v2465_v51 = vsel %vm2433_vm10, %v2432_v3, %v1992_v58  ;;  %v2908_v31 = vmul.f32 0.5, %v2778_v22  ;;  %v2788_v39 = vadd.f32 %v8690_v25, %v8926_v56  ;;  %v2967_v19 = vmul.f32 0.5, %v6554_v63  ;;  %6120 = vmatpush3.msk.msra.mxu1 %vm658_vm1, %v3221_v33 }
 0x351   : > { %4228 = vrot.lane.b32.xlu1 %v4161_v30, %s6749_s16  ;;  %v2498_v26 = vsel %vm2466_vm12, %v2465_v51, %v2086_v11  ;;  %v4340_v11 = vsel %vm1554_vm6, %v4338_v54, %v4339_v46  ;;  %v4168_v30 = vsel %vm1383_vm5, %v4165_v59, %v4167_v29  ;;  %6563 = vtanh.f32 %v2911_v38 }
 0x352   : > { %3036 = vperm.xlu0 %6545, %v2998_v48   ;;  %v2913_v47 = vmul.f32 0.5, %v2803_v17  ;;  %v4342_v59 = vsel %vm1554_vm6, %v4339_v46, %v4341_v24  ;;  %v3000_v25 = vadd.f32 0.5, %v2968_v20  ;;  %v2969_v3 = vmul.f32 0.5, %v6556_v41 }
 0x353   : > { %v2179_v27 = vpop.permute.xlu1 %2178  ;;  %6565 = vtanh.f32 %v2908_v31  ;;  %v2910_v13 = vmul.f32 0.5, %v2788_v39  ;;  %v4343_v37 = vrot.slane %v9116_v53, 2  ;;  %v4344_v46 = vrot.slane %v9122_v60, 2 }
 0x354   : > { %v4354_v28 = vpop.permute.xlu0 %4353  ;;  %v2530_v32 = vsel %vm2499_vm13, %v2497_v61, %v2179_v27  ;;  %v2531_v50 = vsel %vm2499_vm13, %v2498_v26, %v2179_v27  ;;  %v9172_v55 = vpop.f32.mrb[16].mxu1  ;;  %6567 = vtanh.f32 %v2913_v47  ;;  %v2999_v14 = vadd.f32 0.5, %v2967_v19  ;;  %v10150_v19 = vld [vmem:[#allocation14_spill] sm:$0xff] }
 0x355   : > { %v2563_v2 = vsel %vm2532_vm14, %v2530_v32, %v2272_v40  ;;  %v2564_v6 = vsel %vm2532_vm14, %v2531_v50, %v2272_v40  ;;  %4230 = vrot.lane.b32.xlu1 %v4163_v42, %s6749_s16  ;;  %v2812_v18 = vpop.f32.mrb[17].mxu1  ;;  %v6558_v48 = vpop.eup %6557  ;;  %v2798_v42 = vadd.f32 %v8830_v1, %v8926_v56  ;;  %v3001_v16 = vadd.f32 0.5, %v2969_v3 }
 0x356   : > { %4232 = vrot.lane.b32.xlu0 %v4166_v4, %s6749_s16  ;;  %6116 = vmatprep.mubr.msk.f32.mxu1 %vm2575_vm15, %v2563_v2  ;;  %v2813_v35 = vadd.f32 %v8926_v56, %v2812_v18  ;;  %v2971_v4 = vmul.f32 0.5, %v6558_v48  ;;  %6569 = vtanh.f32 %v2910_v13  ;;  %v2808_v27 = vadd.f32 %v8987_v10, %v8926_v56  ;;  %v10149_v48 = vld [vmem:[#allocation12_spill] sm:$0xff] }
 0x357   : > { %6117 = vmatmul.mubr.msk.f32.gmra.mrb[32].mxu1 %vm2575_vm15, %v2564_v6  ;;  %v4175_v44 = vpop.permute.xlu1 %4174  ;;  %v2912_v1 = vmul.f32 0.5, %v2798_v42 }
 0x358   : > { %v4179_v34 = vpop.permute.xlu0 %4178  ;;  %v4452_v21 = vsel %vm581_vm0, 0.0, %v4175_v44  ;;  %v2915_v54 = vmul.f32 0.5, %v2813_v35  ;;  %v6560_v61 = vpop.eup %6559  ;;  %v3003_v43 = vadd.f32 0.5, %v2971_v4  ;;  %v2914_v6 = vmul.f32 0.5, %v2808_v27 }
 0x359   : > { %4407 = vrot.lane.b32.xlu1 %v4340_v11, %s6751_s18  ;;  %v9192_v45 = vsel %vm2400_vm11, %v4452_v21, %v4354_v28  ;;  %v4454_v62 = vsel %vm581_vm0, %v8519_v12, %v4179_v34  ;;  %v4345_v28 = vsel %vm1554_vm6, %v4343_v37, %v4344_v46  ;;  %v6562_v63 = vpop.eup %6561  ;;  %v2973_v22 = vmul.f32 0.5, %v6560_v61 }
 0x35a   : > { %4234 = vrot.lane.b32.xlu0 %v4168_v30, %s6749_s16  ;;  %6223 = vmatprep.mubr.msk.f32.mxu0 %vm2466_vm12, %v9192_v45  ;;  %6571 = vtanh.f32 %v2915_v54  ;;  %v2818_v11 = vadd.f32 %v9172_v55, %v8926_v56  ;;  %v2970_v38 = vmul.f32 0.5, %v6562_v63 }
 0x35b   : > { %v4177_v40 = vpop.permute.xlu1 %4176  ;;  %6224 = vmatmul.mubr.msk.f32.vlgmr.msra.gmra.mrb[4].mxu0 %vm2466_vm12, %v9192_v45  ;;  %v6564_v41 = vpop.eup %6563  ;;  %6573 = vtanh.f32 %v2912_v1  ;;  %v3005_v17 = vadd.f32 0.5, %v2973_v22 }
 0x35c   : > { %v4358_v58 = vpop.permute.xlu0 %4357  ;;  %v4453_v51 = vsel %vm581_vm0, %v8538_v0, %v4177_v40  ;;  %v4346_v0 = vrot.slane %v9150_v9, 2  ;;  %v2975_v18 = vmul.f32 0.5, %v6564_v41  ;;  %6575 = vtanh.f32 %v2914_v6 }
 0x35d   : > { %4409 = vrot.lane.b32.xlu1 %v4342_v59, %s6751_s18  ;;  %v9212_v12 = vsel %vm2400_vm11, %v4454_v62, %v4358_v58  ;;  %v6566_v2 = vpop.eup %6565  ;;  %v3002_v31 = vadd.f32 0.5, %v2970_v38 }
 0x35e   : > { %3046 = vperm.xlu0 %6545, %v3000_v25   ;;  %v4347_v24 = vsel %vm1554_vm6, %v4344_v46, %v4346_v0  ;;  %v6568_v44 = vpop.eup %6567  ;;  %v2972_v21 = vmul.f32 0.5, %v6566_v2  ;;  %v3007_v33 = vadd.f32 0.5, %v2975_v18 }
 0x35f   : > { %v4356_v49 = vpop.permute.xlu1 %4355  ;;  %v2977_v39 = vmul.f32 0.5, %v6568_v44  ;;  %v10153_v44 = vld [vmem:[#allocation17_spill] sm:$0xff] }
 0x360   : > { %v4183_v29 = vpop.permute.xlu0 %4182  ;;  %v9215_v26 = vsel %vm2400_vm11, %v4453_v51, %v4356_v49  ;;  %v6570_v55 = vpop.eup %6569  ;;  %v3004_v58 = vadd.f32 0.5, %v2972_v21 }
 0x361   : > { %3041 = vperm.xlu1 %6546, %v2999_v14   ;;  %6226 = vmatprep.mubr.msk.f32.mxu0 %vm2466_vm12, %v9215_v26  ;;  %v4456_v10 = vsel %vm581_vm0, %v8556_v36, %v4183_v29  ;;  %v2974_v40 = vmul.f32 0.5, %v6570_v55  ;;  %v3009_v13 = vadd.f32 0.5, %v2977_v39  ;;  %v10154_v55 = vld [vmem:[#allocation16_spill] sm:$0xff] }
 0x362   : > { %3051 = vperm.xlu0 %6545, %v3001_v16   ;;  %6227 = vmatmul.mubr.msk.f32.gmra.mrb[6].mxu0 %vm2466_vm12, %v9212_v12 }
 0x363   : > { %v4181_v50 = vpop.permute.xlu1 %4180  ;;  %v3006_v29 = vadd.f32 0.5, %v2974_v40 }
 0x364   : > { %v4362_v32 = vpop.permute.xlu0 %4361  ;;  %v4455_v9 = vsel %vm581_vm0, %v8582_v5, %v4181_v50  ;;  %v2916_v5 = vmul.f32 0.5, %v2818_v11  ;;  %v6572_v59 = vpop.eup %6571  ;;  %v10152_v50 = vld [vmem:[#allocation15_spill] sm:$0xff] }
 0x365   : > { %4411 = vrot.lane.b32.xlu1 %v4345_v28, %s6751_s18  ;;  %v9234_v34 = vsel %vm2400_vm11, %v4456_v10, %v4362_v32  ;;  %v2979_v62 = vmul.f32 0.5, %v6572_v59  ;;  %v6574_v42 = vpop.eup %6573  ;;  %v5765_v59 = vld [vmem:[%s9969_s12 + $0x18] sm:$0xf] }
 0x366   : > { %3061 = vperm.xlu0 %6545, %v3003_v43   ;;  %6577 = vtanh.f32 %v2916_v5  ;;  %v2976_v49 = vmul.f32 0.5, %v6574_v42  ;;  %v6576_v28 = vpop.eup %6575  ;;  %v10151_v43 = vld [vmem:[#allocation13_spill] sm:$0xff]  ;;  %v10155_v42 = vld [vmem:[#allocation18_spill] sm:$0xff] }
 0x367   : > { %v4360_v20 = vpop.permute.xlu1 %4359  ;;  %v3011_v61 = vadd.f32 0.5, %v2979_v62 }
 0x368   : > { %v4187_v30 = vpop.permute.xlu0 %4186  ;;  %v9237_v36 = vsel %vm2400_vm11, %v4455_v9, %v4360_v20  ;;  %v3008_v10 = vadd.f32 0.5, %v2976_v49  ;;  %v2978_v9 = vmul.f32 0.5, %v6576_v28  ;;  %v10157_v28 = vld [vmem:[#allocation19_spill] sm:$0xff] }
 0x369   : > { %4413 = vrot.lane.b32.xlu1 %v4347_v24, %s6751_s18  ;;  %6229 = vmatprep.mubr.msk.f32.mxu0 %vm2466_vm12, %v9237_v36  ;;  %v4458_v25 = vsel %vm581_vm0, %v10149_v48, %v4187_v30 }
 0x36a   : > { %3071 = vperm.xlu0 %6545, %v3005_v17   ;;  %6230 = vmatmul.mubr.msk.f32.gmra.mrb[8].mxu0 %vm2466_vm12, %v9234_v34  ;;  %v3010_v17 = vadd.f32 0.5, %v2978_v9 }
 0x36b   : > { %v4185_v35 = vpop.permute.xlu1 %4184 }
 0x36c   : > { %v4366_v47 = vpop.permute.xlu0 %4365  ;;  %v4457_v3 = vsel %vm581_vm0, %v10150_v19, %v4185_v35  ;;  %v5764_v35 = vld [vmem:[%s9969_s12 + $0x10] sm:$0xff] }
 0x36d   : > { %3056 = vperm.xlu1 %6546, %v3002_v31   ;;  %v9249_v54 = vsel %vm2400_vm11, %v4458_v25, %v4366_v47  ;;  %v6385_v19 = vpack.c.bf16 %v5765_v59, %v5764_v35 }
 0x36e   : > { %3081 = vperm.xlu0 %6545, %v3007_v33  }
 0x36f   : > { %v4364_v51 = vpop.permute.xlu1 %4363  ;;  %6387 = vmatprep.subr.msk.bf16.mxu0 %vm9035_vm3, %v6385_v19 }
 0x370   : > { %v4191_v37 = vpop.permute.xlu0 %4190  ;;  %v9252_v46 = vsel %vm2400_vm11, %v4457_v3, %v4364_v51  ;;  %v6097_v14 = vpop.f32.mrb[18].mxu1  ;;  %6390 = vmatpush3.bf16.msk.msra.mxu0 %vm9035_vm3, %v6385_v19 }
 0x371   : > { %3066 = vperm.xlu1 %6546, %v3004_v58   ;;  %v2828_v16 = vadd.f32 %v6097_v14, %v8926_v56  ;;  %v2822_v4 = vpop.f32.mrb[19].mxu1  ;;  %6232 = vmatprep.mubr.msk.f32.mxu0 %vm2466_vm12, %v9252_v46  ;;  %v4460_v22 = vsel %vm581_vm0, %v10151_v43, %v4191_v37  ;;  %v6578_v24 = vpop.eup %6577 }
 0x372   : > { %3091 = vperm.xlu0 %6545, %v3009_v13   ;;  %v2823_v0 = vadd.f32 %v8926_v56, %v2822_v4  ;;  %6233 = vmatmul.mubr.msk.f32.gmra.mrb[10].mxu0 %vm2466_vm12, %v9249_v54  ;;  %v2980_v18 = vmul.f32 0.5, %v6578_v24 }
 0x373   : > { %v4189_v27 = vpop.permute.xlu1 %4188  ;;  %v2918_v63 = vmul.f32 0.5, %v2828_v16  ;;  %v10156_v16 = vld [vmem:[#allocation20_spill] sm:$0xff] }
 0x374   : > { %v4370_v1 = vpop.permute.xlu0 %4369  ;;  %v2917_v32 = vmul.f32 0.5, %v2823_v0  ;;  %v4459_v41 = vsel %vm581_vm0, %v10152_v50, %v4189_v27  ;;  %v3012_v21 = vadd.f32 0.5, %v2980_v18 }
 0x375   : > { %3076 = vperm.xlu1 %6546, %v3006_v29   ;;  %6579 = vtanh.f32 %v2918_v63  ;;  %v9265_v2 = vsel %vm2400_vm11, %v4460_v22, %v4370_v1  ;;  %v10158_v22 = vld [vmem:[#allocation21_spill] sm:$0xff] }
 0x376   : > { %3101 = vperm.xlu0 %6545, %v3011_v61   ;;  %6581 = vtanh.f32 %v2917_v32 }
 0x377   : > { %v4368_v11 = vpop.permute.xlu1 %4367 }
 0x378   : > { %v4195_v6 = vpop.permute.xlu0 %4194  ;;  %v9268_v38 = vsel %vm2400_vm11, %v4459_v41, %v4368_v11 }
 0x379   : > { %3086 = vperm.xlu1 %6546, %v3008_v10   ;;  %6235 = vmatprep.mubr.msk.f32.mxu0 %vm2466_vm12, %v9268_v38  ;;  %v4462_v5 = vsel %vm581_vm0, %v10153_v44, %v4195_v6  ;;  %v10159_v44 = vld [vmem:[#allocation11_spill] sm:$0xff] }
 0x37a   : > { %6236 = vmatmul.mubr.msk.f32.gmra.mrb[12].mxu0 %vm2466_vm12, %v9265_v2 }
 0x37b   : > { %v4193_v20 = vpop.permute.xlu1 %4192 }
 0x37c   : > { %v4374_v30 = vpop.permute.xlu0 %4373  ;;  %v4461_v31 = vsel %vm581_vm0, %v10154_v55, %v4193_v20  ;;  %v10160_v55 = vld [vmem:[#allocation23_spill] sm:$0xff] }
 0x37d   : > { %3096 = vperm.xlu1 %6546, %v3010_v17   ;;  %v9279_v33 = vsel %vm2400_vm11, %v4462_v5, %v4374_v30 }
 0x37f   : > { %v4372_v47 = vpop.permute.xlu1 %4371  ;;  %v6580_v48 = vpop.eup %6579 }
 0x380   : > { %v4199_v39 = vpop.permute.xlu0 %4198  ;;  %v9288_v25 = vsel %vm2400_vm11, %v4461_v31, %v4372_v47  ;;  %v6582_v3 = vpop.eup %6581  ;;  %v2982_v58 = vmul.f32 0.5, %v6580_v48 }
 0x381   : > { %3106 = vperm.xlu1 %6546, %v3012_v21   ;;  %6238 = vmatprep.mubr.msk.f32.mxu0 %vm2466_vm12, %v9288_v25  ;;  %v2981_v40 = vmul.f32 0.5, %v6582_v3  ;;  %v4464_v14 = vsel %vm581_vm0, %v10155_v42, %v4199_v39  ;;  %v10161_v3 = vld [vmem:[#allocation22_spill] sm:$0xff] }
 0x382   : > { %6239 = vmatmul.mubr.msk.f32.gmra.mrb[14].mxu0 %vm2466_vm12, %v9279_v33  ;;  %v3014_v13 = vadd.f32 0.5, %v2982_v58 }
 0x383   : > { %v4197_v37 = vpop.permute.xlu1 %4196  ;;  %v3013_v51 = vadd.f32 0.5, %v2981_v40 }
 0x384   : > { %v4378_v62 = vpop.permute.xlu0 %4377  ;;  %v4463_v4 = vsel %vm581_vm0, %v10156_v16, %v4197_v37 }
 0x385   : > { %3116 = vperm.xlu1 %6546, %v3014_v13   ;;  %3111 = vperm.xlu0 %6545, %v3013_v51   ;;  %v9303_v29 = vsel %vm2400_vm11, %v4464_v14, %v4378_v62  ;;  %v10162_v62 = vld [vmem:[#allocation36_spill] sm:$0xff] }
 0x387   : > { %v4376_v61 = vpop.permute.xlu1 %4375 }
 0x388   : > { %v4203_v49 = vpop.permute.xlu0 %4202  ;;  %v9306_v0 = vsel %vm2400_vm11, %v4463_v4, %v4376_v61 }
 0x389   : > { %6241 = vmatprep.mubr.msk.f32.mxu0 %vm2466_vm12, %v9306_v0  ;;  %v4466_v63 = vsel %vm581_vm0, %v10157_v28, %v4203_v49  ;;  %v10163_v28 = vld [vmem:[#allocation25_spill] sm:$0xff] }
 0x38a   : > { %6242 = vmatmul.mubr.msk.f32.gmra.mrb[16].mxu0 %vm2466_vm12, %v9303_v29 }
 0x38b   : > { %v4201_v27 = vpop.permute.xlu1 %4200 }
 0x38c   : > { %v4382_v1 = vpop.permute.xlu0 %4381  ;;  %v6100_v43 = vpop.f32.mrb[20].mxu1  ;;  %v4465_v32 = vsel %vm581_vm0, %v10158_v22, %v4201_v27 }
 0x38d   : > { %v2838_v50 = vadd.f32 %v6100_v43, %v8926_v56  ;;  %v2832_v41 = vpop.f32.mrb[21].mxu1  ;;  %v9319_v9 = vsel %vm2400_vm11, %v4466_v63, %v4382_v1  ;;  %v10164_v43 = vld [vmem:[#allocation27_spill] sm:$0xff] }
 0x38e   : > { %v2833_v10 = vadd.f32 %v8926_v56, %v2832_v41 }
 0x38f   : > { %v4380_v11 = vpop.permute.xlu1 %4379  ;;  %v2920_v24 = vmul.f32 0.5, %v2838_v50 }
 0x390   : > { %v4207_v6 = vpop.permute.xlu0 %4206  ;;  %v9322_v17 = vsel %vm2400_vm11, %v4465_v32, %v4380_v11  ;;  %v2919_v18 = vmul.f32 0.5, %v2833_v10 }
 0x391   : > { %6244 = vmatprep.mubr.msk.f32.mxu0 %vm2466_vm12, %v9322_v17  ;;  %6583 = vtanh.f32 %v2920_v24  ;;  %v4468_v5 = vsel %vm581_vm0, %v10159_v44, %v4207_v6 }
 0x392   : > { %6245 = vmatmul.mubr.msk.f32.gmra.mrb[18].mxu0 %vm2466_vm12, %v9319_v9  ;;  %6585 = vtanh.f32 %v2919_v18 }
 0x393   : > { %v4205_v20 = vpop.permute.xlu1 %4204 }
 0x394   : > { %v4386_v30 = vpop.permute.xlu0 %4385  ;;  %v4467_v31 = vsel %vm581_vm0, %v10160_v55, %v4205_v20 }
 0x395   : > { %v9333_v21 = vsel %vm2400_vm11, %v4468_v5, %v4386_v30  ;;  %v10165_v5 = vld [vmem:[#allocation24_spill] sm:$0xff] }
 0x397   : > { %v4384_v47 = vpop.permute.xlu1 %4383 }
 0x398   : > { %v4211_v39 = vpop.permute.xlu0 %4210  ;;  %v9336_v35 = vsel %vm2400_vm11, %v4467_v31, %v4384_v47 }
 0x399   : > { %6247 = vmatprep.mubr.msk.f32.mxu0 %vm2466_vm12, %v9336_v35  ;;  %v4470_v58 = vsel %vm581_vm0, %v10161_v3, %v4211_v39  ;;  %v10166_v39 = vld [vmem:[#allocation38_spill] sm:$0xff] }
 0x39a   : > { %6248 = vmatmul.mubr.msk.f32.gmra.mrb[20].mxu0 %vm2466_vm12, %v9333_v21 }
 0x39b   : > { %v4209_v48 = vpop.permute.xlu1 %4208  ;;  %v6584_v19 = vpop.eup %6583 }
 0x39c   : > { %v4390_v59 = vpop.permute.xlu0 %4389  ;;  %v6586_v40 = vpop.eup %6585  ;;  %v2984_v13 = vmul.f32 0.5, %v6584_v19  ;;  %v4469_v37 = vsel %vm581_vm0, %v10162_v62, %v4209_v48 }
 0x39d   : > { %v2983_v51 = vmul.f32 0.5, %v6586_v40  ;;  %v9347_v14 = vsel %vm2400_vm11, %v4470_v58, %v4390_v59 }
 0x39e   : > { %v3016_v42 = vadd.f32 0.5, %v2984_v13  ;;  %v10167_v13 = vld [vmem:[#allocation29_spill] sm:$0xff] }
 0x39f   : > { %v4388_v4 = vpop.permute.xlu1 %4387  ;;  %v3015_v49 = vadd.f32 0.5, %v2983_v51 }
 0x3a0   : > { %v4215_v16 = vpop.permute.xlu0 %4214  ;;  %v9350_v61 = vsel %vm2400_vm11, %v4469_v37, %v4388_v4  ;;  %3126 = vperm.xlu1 %6546, %v3016_v42  }
 0x3a1   : > { %6250 = vmatprep.mubr.msk.f32.mxu0 %vm2466_vm12, %v9350_v61  ;;  %3121 = vperm.xlu0 %6545, %v3015_v49   ;;  %v4472_v63 = vsel %vm581_vm0, %v10163_v28, %v4215_v16 }
 0x3a2   : > { %6251 = vmatmul.mubr.msk.f32.gmra.mrb[22].mxu0 %vm2466_vm12, %v9347_v14 }
 0x3a3   : > { %v4213_v27 = vpop.permute.xlu1 %4212 }
 0x3a4   : > { %v4394_v1 = vpop.permute.xlu0 %4393  ;;  %v4471_v22 = vsel %vm581_vm0, %v10164_v43, %v4213_v27 }
 0x3a5   : > { %v9361_v32 = vsel %vm2400_vm11, %v4472_v63, %v4394_v1 }
 0x3a7   : > { %v4392_v41 = vpop.permute.xlu1 %4391 }
 0x3a8   : > { %v4219_v50 = vpop.permute.xlu0 %4218  ;;  %v9364_v10 = vsel %vm2400_vm11, %v4471_v22, %v4392_v41  ;;  %v6103_v6 = vpop.f32.mrb[22].mxu1 }
 0x3a9   : > { %6253 = vmatprep.mubr.msk.f32.mxu0 %vm2466_vm12, %v9364_v10  ;;  %v2848_v11 = vadd.f32 %v6103_v6, %v8926_v56  ;;  %v2842_v24 = vpop.f32.mrb[23].mxu1  ;;  %v4474_v55 = vsel %vm581_vm0, %v10165_v5, %v4219_v50 }
 0x3aa   : > { %6254 = vmatmul.mubr.msk.f32.gmra.mrb[24].mxu0 %vm2466_vm12, %v9361_v32  ;;  %v2843_v18 = vadd.f32 %v8926_v56, %v2842_v24 }
 0x3ab   : > { %v4217_v20 = vpop.permute.xlu1 %4216  ;;  %v2922_v44 = vmul.f32 0.5, %v2848_v11 }
 0x3ac   : > { %v4398_v30 = vpop.permute.xlu0 %4397  ;;  %v2921_v31 = vmul.f32 0.5, %v2843_v18  ;;  %v4473_v47 = vsel %vm581_vm0, %v10166_v39, %v4217_v20 }
 0x3ad   : > { %6587 = vtanh.f32 %v2922_v44  ;;  %v9377_v59 = vsel %vm2400_vm11, %v4474_v55, %v4398_v30 }
 0x3ae   : > { %6589 = vtanh.f32 %v2921_v31 }
 0x3af   : > { %v4396_v19 = vpop.permute.xlu1 %4395 }
 0x3b0   : > { %v4223_v48 = vpop.permute.xlu0 %4222  ;;  %v9380_v3 = vsel %vm2400_vm11, %v4473_v47, %v4396_v19  ;;  %v6673_v19 = vld [vmem:[%s6855_s24] sm:$0xff] }
 0x3b1   : > { %6256 = vmatprep.mubr.msk.f32.mxu0 %vm2466_vm12, %v9380_v3  ;;  %v4476_v62 = vsel %vm581_vm0, %v10167_v13, %v4223_v48 }
 0x3b2   : > { %6257 = vmatmul.mubr.msk.f32.gmra.mrb[26].mxu0 %vm2466_vm12, %v9377_v59 }
 0x3b3   : > { %v4221_v40 = vpop.permute.xlu1 %4220 }
 0x3b4   : > { %v4402_v58 = vpop.permute.xlu0 %4401  ;;  %v4475_v37 = vsel %vm581_vm0, %v8981_v52, %v4221_v40 }
 0x3b5   : > { %v9391_v51 = vsel %vm2400_vm11, %v4476_v62, %v4402_v58  ;;  %v6674_v62 = vld [vmem:[%s6855_s24 + $0x8] sm:$0xff] }
 0x3b7   : > { %v4400_v42 = vpop.permute.xlu1 %4399  ;;  %v6588_v16 = vpop.eup %6587 }
 0x3b8   : > { %v4227_v4 = vpop.permute.xlu0 %4226  ;;  %v9394_v49 = vsel %vm2400_vm11, %v4475_v37, %v4400_v42  ;;  %v6590_v1 = vpop.eup %6589  ;;  %v2986_v27 = vmul.f32 0.5, %v6588_v16 }
 0x3b9   : > { %6259 = vmatprep.mubr.msk.f32.mxu0 %vm2466_vm12, %v9394_v49  ;;  %v2985_v28 = vmul.f32 0.5, %v6590_v1  ;;  %v4478_v22 = vsel %vm581_vm0, %v9007_v57, %v4227_v4 }
 0x3ba   : > { %6260 = vmatmul.mubr.msk.f32.gmra.mrb[28].mxu0 %vm2466_vm12, %v9391_v51  ;;  %v3018_v63 = vadd.f32 0.5, %v2986_v27 }
 0x3bb   : > { %v4225_v52 = vpop.permute.xlu1 %4224  ;;  %v3017_v43 = vadd.f32 0.5, %v2985_v28 }
 0x3bc   : > { %3136 = vperm.xlu1 %6546, %v3018_v63   ;;  %v4477_v50 = vsel %vm581_vm0, %v9044_v15, %v4225_v52  ;;  %v4406_v41 = vpop.permute.xlu0 %4405 }
 0x3bd   : > { %3131 = vperm.xlu0 %6545, %v3017_v43   ;;  %v9405_v6 = vsel %vm2400_vm11, %v4478_v22, %v4406_v41 }
 0x3bf   : > { %v4404_v11 = vpop.permute.xlu1 %4403 }
 0x3c0   : > { %v9408_v24 = vsel %vm2400_vm11, %v4477_v50, %v4404_v11  ;;  %v6675_v50 = vld [vmem:[%s6855_s24 + $0x10] sm:$0xff] }
 0x3c1   : > { %6262 = vmatprep.mubr.msk.f32.mxu0 %vm2466_vm12, %v9408_v24 }
 0x3c2   : > { %6263 = vmatmul.mubr.msk.f32.gmra.mrb[30].mxu0 %vm2466_vm12, %v9405_v6 }
 0x3c3   : > { %v4229_v57 = vpop.permute.xlu1 %4228 }
 0x3c4   : > { %v6106_v18 = vpop.f32.mrb[24].mxu1  ;;  %v4479_v31 = vsel %vm581_vm0, %v9092_v7, %v4229_v57  ;;  %v6676_v57 = vld [vmem:[%s6855_s24 + $0x18] sm:$0xff] }
 0x3c5   : > { %v2858_v15 = vadd.f32 %v6106_v18, %v8926_v56  ;;  %v2852_v30 = vpop.f32.mrb[25].mxu1 }
 0x3c6   : > { %v2853_v20 = vadd.f32 %v8926_v56, %v2852_v30 }
 0x3c7   : > { %v4231_v44 = vpop.permute.xlu1 %4230  ;;  %v2924_v5 = vmul.f32 0.5, %v2858_v15  ;;  %v6677_v15 = vld [vmem:[%s6855_s24 + $0x20] sm:$0xff] }
 0x3c8   : > { %v2923_v55 = vmul.f32 0.5, %v2853_v20  ;;  %v4480_v40 = vsel %vm581_vm0, %v9089_v8, %v4231_v44 }
 0x3c9   : > { %6591 = vtanh.f32 %v2924_v5 }
 0x3ca   : > { %6593 = vtanh.f32 %v2923_v55 }
 0x3cb   : > { %v4408_v39 = vpop.permute.xlu1 %4407 }
 0x3cc   : > { %v9419_v48 = vsel %vm2400_vm11, %v4479_v31, %v4408_v39 }
 0x3cd   : > { %v3032_v47 = vpop.permute.xlu0 %3031  ;;  %6265 = vmatprep.mubr.msk.f32.mxu0 %vm2466_vm12, %v9419_v48 }
 0x3ce   : > { %v3189_v58 = vmul.f32 %v6673_v19, %v3032_v47 }
 0x3cf   : > { %v4410_v56 = vpop.permute.xlu1 %4409 }
 0x3d0   : > { %6121 = vmatprep.mubr.msk.f32.mxu1 %vm581_vm0, %v3189_v58  ;;  %v9428_v7 = vsel %vm2400_vm11, %v4480_v40, %v4410_v56 }
 0x3d1   : > { %v3037_v13 = vpop.permute.xlu0 %3036  ;;  %6266 = vmatmul.mubr.msk.f32.gmra.mrb[32].mxu0 %vm2466_vm12, %v9428_v7 }
 0x3d2   : > { %v3190_v37 = vmul.f32 %v6674_v62, %v3037_v13 }
 0x3d3   : > { %v6592_v42 = vpop.eup %6591 }
 0x3d4   : > { %6122 = vmatmul.mubr.msk.f32.vlgmr.msra.gmra.mrb[34].mxu1 %vm581_vm0, %v3190_v37  ;;  %v6594_v16 = vpop.eup %6593  ;;  %v2988_v4 = vmul.f32 0.5, %v6592_v42  ;;  %v6679_v37 = vld [vmem:[%s6855_s24 + $0x28] sm:$0xff] }
 0x3d5   : > { %v4233_v8 = vpop.permute.xlu0 %4232  ;;  %v2987_v1 = vmul.f32 0.5, %v6594_v16 }
 0x3d6   : > { %v3020_v27 = vadd.f32 0.5, %v2988_v4  ;;  %v4481_v11 = vsel %vm581_vm0, %v9116_v53, %v4233_v8  ;;  %v9447_v53 = vld [vmem:[#allocation2] ss:$0 sm:$0xff]  ;;  %v6680_v8 = vld [vmem:[%s6855_s24 + $0x30] sm:$0xff] }
 0x3d7   : > { %v3019_v28 = vadd.f32 0.5, %v2987_v1 }
 0x3d8   : > { %3146 = vperm.xlu1 %6546, %v3020_v27   ;;  %v6681_v27 = vld [vmem:[%s6855_s24 + $0x38] sm:$0xff] }
 0x3d9   : > { %v4235_v63 = vpop.permute.xlu0 %4234  ;;  %3141 = vperm.xlu0 %6545, %v3019_v28   ;;  %v6682_v28 = vld [vmem:[%s6855_s24 + $0x40] sm:$0xff] }
 0x3da   : > { %v4482_v31 = vsel %vm581_vm0, %v9122_v60, %v4235_v63 }
 0x3dd   : > { %v3047_v52 = vpop.permute.xlu0 %3046 }
 0x3de   : > { %v3192_v18 = vmul.f32 %v6676_v57, %v3047_v52 }
 0x3e0   : > { %v3042_v43 = vpop.permute.xlu1 %3041 }
 0x3e1   : > { %v3052_v22 = vpop.permute.xlu0 %3051  ;;  %v3191_v41 = vmul.f32 %v6675_v50, %v3042_v43 }
 0x3e2   : > { %v3193_v30 = vmul.f32 %v6677_v15, %v3052_v22 }
 0x3e3   : > { %6124 = vmatprep.mubr.msk.f32.mxu1 %vm581_vm0, %v3191_v41  ;;  %v6683_v41 = vld [vmem:[%s6855_s24 + $0x48] sm:$0xff] }
 0x3e4   : > { %v4412_v20 = vpop.permute.xlu1 %4411  ;;  %6125 = vmatmul.mubr.msk.f32.gmra.mrb[36].mxu1 %vm581_vm0, %v3192_v18  ;;  %v6109_v5 = vpop.f32.mrb[26].mxu1  ;;  %v6684_v18 = vld [vmem:[%s6855_s24 + $0x50] sm:$0xff] }
 0x3e5   : > { %v3062_v44 = vpop.permute.xlu0 %3061  ;;  %v9442_v55 = vsel %vm2400_vm11, %v4481_v11, %v4412_v20  ;;  %6127 = vmatprep.mubr.msk.f32.mxu1 %vm581_vm0, %v3193_v30  ;;  %v2868_v39 = vadd.f32 %v9447_v53, %v6109_v5  ;;  %v2862_v47 = vpop.f32.mrb[27].mxu1  ;;  %v6685_v5 = vld [vmem:[%s6855_s24 + $0x58] sm:$0xff] }
 0x3e6   : > { %6268 = vmatprep.mubr.msk.f32.mxu0 %vm2466_vm12, %v9442_v55  ;;  %v2863_v19 = vadd.f32 %v9447_v53, %v2862_v47  ;;  %v3195_v16 = vmul.f32 %v6680_v8, %v3062_v44 }
 0x3e7   : > { %v2926_v58 = vmul.f32 0.5, %v2868_v39  ;;  %v6686_v39 = vld [vmem:[%s6855_s24 + $0x60] sm:$0xff] }
 0x3e8   : > { %v4414_v40 = vpop.permute.xlu1 %4413  ;;  %v2925_v56 = vmul.f32 0.5, %v2863_v19 }
 0x3e9   : > { %v9454_v13 = vsel %vm2400_vm11, %v4482_v31, %v4414_v40  ;;  %v3072_v62 = vpop.permute.xlu0 %3071  ;;  %6595 = vtanh.f32 %v2926_v58  ;;  %v6687_v40 = vld [vmem:[%s6855_s24 + $0x68] sm:$0xff] }
 0x3ea   : > { %6269 = vmatmul.mubr.msk.f32.gmra.mrb[34].mxu0 %vm2466_vm12, %v9454_v13  ;;  %6597 = vtanh.f32 %v2925_v56  ;;  %v3197_v63 = vmul.f32 %v6682_v28, %v3072_v62  ;;  %v933_v62 = vld [vmem:[%s9967_s10] sm:$0xf] }
 0x3eb   : > { %6275 = vmatprep.mubr.msk.f32.mxu0 %vm2466_vm12, %v9215_v26  ;;  %6169 = vmatprep.subr.msk.mxu1 %vm658_vm1, %v933_v62 }
 0x3ec   : > { %v3057_v60 = vpop.permute.xlu1 %3056  ;;  %6170 = vmatpush3.msk.msra.mxu1 %vm658_vm1, %v933_v62 }
 0x3ed   : > { %v3194_v42 = vmul.f32 %v6679_v37, %v3057_v60  ;;  %v3082_v4 = vpop.permute.xlu0 %3081  ;;  %v5799_v60 = vld [vmem:[%s9969_s12 + $0x20] sm:$0xff]  ;;  %v5800_v37 = vld [vmem:[%s9969_s12 + $0x28] sm:$0xf] }
 0x3ee   : > { %6276 = vmatmul.mubr.msk.f32.vlgmr.msra.gmra.mrb[4].mxu0 %vm2466_vm12, %v9212_v12  ;;  %v3199_v15 = vmul.f32 %v6684_v18, %v3082_v4 }
 0x3ef   : > { %6128 = vmatmul.mubr.msk.f32.gmra.mrb[38].mxu1 %vm581_vm0, %v3194_v42  ;;  %6278 = vmatprep.mubr.msk.f32.mxu0 %vm2466_vm12, %v9237_v36  ;;  %v6688_v42 = vld [vmem:[%s6855_s24 + $0x70] sm:$0xff] }
 0x3f0   : > { %v3067_v1 = vpop.permute.xlu1 %3066  ;;  %6130 = vmatprep.mubr.msk.f32.mxu1 %vm581_vm0, %v3195_v16  ;;  %v6391_v16 = vpack.c.bf16 %v5800_v37, %v5799_v60 }
 0x3f1   : > { %v3196_v26 = vmul.f32 %v6681_v27, %v3067_v1  ;;  %v3092_v50 = vpop.permute.xlu0 %3091  ;;  %v6689_v1 = vld [vmem:[%s6855_s24 + $0x78] sm:$0xff] }
 0x3f2   : > { %6279 = vmatmul.mubr.msk.f32.gmra.mrb[6].mxu0 %vm2466_vm12, %v9234_v34  ;;  %v3201_v47 = vmul.f32 %v6686_v39, %v3092_v50  ;;  %6393 = vmatprep.subr.msk.bf16.mxu0 %vm9035_vm3, %v6391_v16 }
 0x3f3   : > { %6131 = vmatmul.mubr.msk.f32.gmra.mrb[40].mxu1 %vm581_vm0, %v3196_v26  ;;  %6281 = vmatprep.mubr.msk.f32.mxu0 %vm2466_vm12, %v9252_v46  ;;  %v6596_v12 = vpop.eup %6595 }
 0x3f4   : > { %v3077_v52 = vpop.permute.xlu1 %3076  ;;  %6133 = vmatprep.mubr.msk.f32.mxu1 %vm581_vm0, %v3197_v63  ;;  %v6598_v43 = vpop.eup %6597  ;;  %v2990_v22 = vmul.f32 0.5, %v6596_v12  ;;  %6396 = vmatpush3.bf16.msk.msra.mxu0 %vm9035_vm3, %v6391_v16  ;;  %v6690_v63 = vld [vmem:[%s6855_s24 + $0x88] sm:$0xff]  ;;  %v6693_v16 = vld [vmem:[%s6855_s24 + $0x98] sm:$0xff] }
 0x3f5   : > { %v3198_v11 = vmul.f32 %v6683_v41, %v3077_v52  ;;  %v2989_v57 = vmul.f32 0.5, %v6598_v43  ;;  %v3102_v19 = vpop.permute.xlu0 %3101 }
 0x3f6   : > { %6282 = vmatmul.mubr.msk.f32.gmra.mrb[8].mxu0 %vm2466_vm12, %v9249_v54  ;;  %v3022_v30 = vadd.f32 0.5, %v2990_v22  ;;  %v3203_v8 = vmul.f32 %v6688_v42, %v3102_v19  ;;  %v6691_v22 = vld [vmem:[%s6855_s24 + $0x80] sm:$0xff]  ;;  %v6692_v42 = vld [vmem:[%s6855_s24 + $0x90] sm:$0xff] }
 0x3f7   : > { %6134 = vmatmul.mubr.msk.f32.gmra.mrb[42].mxu1 %vm581_vm0, %v3198_v11  ;;  %6284 = vmatprep.mubr.msk.f32.mxu0 %vm2466_vm12, %v9268_v38  ;;  %v3021_v20 = vadd.f32 0.5, %v2989_v57 }
 0x3f8   : > { %v3087_v44 = vpop.permute.xlu1 %3086  ;;  %6136 = vmatprep.mubr.msk.f32.mxu1 %vm581_vm0, %v3199_v15  ;;  %3156 = vperm.xlu1 %6546, %v3022_v30  }
 0x3f9   : > { %v3200_v31 = vmul.f32 %v6685_v5, %v3087_v44  ;;  %3151 = vperm.xlu0 %6545, %v3021_v20  }
 0x3fa   : > { %6285 = vmatmul.mubr.msk.f32.gmra.mrb[10].mxu0 %vm2466_vm12, %v9265_v2 }
 0x3fb   : > { %6137 = vmatmul.mubr.msk.f32.gmra.mrb[44].mxu1 %vm581_vm0, %v3200_v31  ;;  %6287 = vmatprep.mubr.msk.f32.mxu0 %vm2466_vm12, %v9288_v25 }
 0x3fc   : > { %v3097_v58 = vpop.permute.xlu1 %3096  ;;  %6139 = vmatprep.mubr.msk.f32.mxu1 %vm581_vm0, %v3201_v47 }
 0x3fd   : > { %v3202_v56 = vmul.f32 %v6687_v40, %v3097_v58 }
 0x3fe   : > { %6288 = vmatmul.mubr.msk.f32.gmra.mrb[12].mxu0 %vm2466_vm12, %v9279_v33 }
 0x3ff   : > { %6140 = vmatmul.mubr.msk.f32.gmra.mrb[46].mxu1 %vm581_vm0, %v3202_v56  ;;  %6290 = vmatprep.mubr.msk.f32.mxu0 %vm2466_vm12, %v9306_v0 }
 0x400   : > { %v3107_v4 = vpop.permute.xlu1 %3106  ;;  %6142 = vmatprep.mubr.msk.f32.mxu1 %vm581_vm0, %v3203_v8 }
 0x401   : > { %v3204_v27 = vmul.f32 %v6689_v1, %v3107_v4 }
 0x402   : > { %6291 = vmatmul.mubr.msk.f32.gmra.mrb[14].mxu0 %vm2466_vm12, %v9303_v29 }
 0x403   : > { %6143 = vmatmul.mubr.msk.f32.gmra.mrb[48].mxu1 %vm581_vm0, %v3204_v27  ;;  %6293 = vmatprep.mubr.msk.f32.mxu0 %vm2466_vm12, %v9322_v17 }
 0x404   : > { %v3117_v26 = vpop.permute.xlu1 %3116  ;;  %v6112_v28 = vpop.f32.mrb[28].mxu1 }
 0x405   : > { %v3206_v12 = vmul.f32 %v6690_v63, %v3117_v26  ;;  %v3112_v52 = vpop.permute.xlu0 %3111  ;;  %v2878_v43 = vadd.f32 %v9447_v53, %v6112_v28  ;;  %v2872_v41 = vpop.f32.mrb[29].mxu1 }
 0x406   : > { %v3205_v50 = vmul.f32 %v6691_v22, %v3112_v52  ;;  %6294 = vmatmul.mubr.msk.f32.gmra.mrb[16].mxu0 %vm2466_vm12, %v9319_v9  ;;  %v2873_v23 = vadd.f32 %v9447_v53, %v2872_v41  ;;  %v9572_v41 = vld [vmem:[%s6855_s24 + $0xf8] sm:$0xff] }
 0x407   : > { %6296 = vmatprep.mubr.msk.f32.mxu0 %vm2466_vm12, %v9336_v35  ;;  %v2928_v11 = vmul.f32 0.5, %v2878_v43 }
 0x408   : > { %6145 = vmatprep.mubr.msk.f32.mxu1 %vm581_vm0, %v3205_v50  ;;  %v2927_v57 = vmul.f32 0.5, %v2873_v23  ;;  %v9575_v23 = vld [vmem:[%s6864_s27 + $0xf8] sm:$0xff] }
 0x409   : > { %6146 = vmatmul.mubr.msk.f32.gmra.mrb[50].mxu1 %vm581_vm0, %v3206_v12  ;;  %6599 = vtanh.f32 %v2928_v11  ;;  %v3901_v11 = vmul.f32 %v9575_v23, %v9572_v41 }
 0x40a   : > { %6297 = vmatmul.mubr.msk.f32.gmra.mrb[18].mxu0 %vm2466_vm12, %v9333_v21  ;;  %6601 = vtanh.f32 %v2927_v57  ;;  %v9580_v57 = vld [vmem:[%s6855_s24 + $0xf0] sm:$0xff] }
 0x40b   : > { %6299 = vmatprep.mubr.msk.f32.mxu0 %vm2466_vm12, %v9350_v61 }
 0x40e   : > { %6300 = vmatmul.mubr.msk.f32.gmra.mrb[20].mxu0 %vm2466_vm12, %v9347_v14  ;;  %v9551_v31 = vpop.f32.mrb[2].mxu0 }
 0x40f   : > { %6302 = vmatprep.mubr.msk.f32.mxu0 %vm2466_vm12, %v9364_v10  ;;  %v6064_v47 = vpop.f32.mrb[3].mxu0 }
 0x412   : > { %6303 = vmatmul.mubr.msk.f32.gmra.mrb[22].mxu0 %vm2466_vm12, %v9361_v32 }
 0x413   : > { %6305 = vmatprep.mubr.msk.f32.mxu0 %vm2466_vm12, %v9380_v3  ;;  %v6600_v18 = vpop.eup %6599 }
 0x414   : > { %v6602_v15 = vpop.eup %6601  ;;  %v2992_v30 = vmul.f32 0.5, %v6600_v18  ;;  %v9583_v18 = vld [vmem:[%s6864_s27 + $0xf0] sm:$0xff] }
 0x415   : > { %v2991_v20 = vmul.f32 0.5, %v6602_v15 }
 0x416   : > { %6306 = vmatmul.mubr.msk.f32.gmra.mrb[24].mxu0 %vm2466_vm12, %v9377_v59  ;;  %v3024_v44 = vadd.f32 0.5, %v2992_v30 }
 0x417   : > { %6308 = vmatprep.mubr.msk.f32.mxu0 %vm2466_vm12, %v9394_v49  ;;  %v3023_v5 = vadd.f32 0.5, %v2991_v20  ;;  %v3980_v20 = vrot.slane %v3901_v11, 7 }
 0x418   : > { %3166 = vperm.xlu1 %6546, %v3024_v44  }
 0x419   : > { %3161 = vperm.xlu0 %6545, %v3023_v5  }
 0x41a   : > { %6309 = vmatmul.mubr.msk.f32.gmra.mrb[26].mxu0 %vm2466_vm12, %v9391_v51 }
 0x41b   : > { %6311 = vmatprep.mubr.msk.f32.mxu0 %vm2466_vm12, %v9408_v24 }
 0x41d   : > { %v6115_v39 = vpop.f32.mrb[30].mxu1 }
 0x41e   : > { %6312 = vmatmul.mubr.msk.f32.gmra.mrb[28].mxu0 %vm2466_vm12, %v9405_v6  ;;  %v2888_v19 = vadd.f32 %v9447_v53, %v6115_v39  ;;  %v2882_v58 = vpop.f32.mrb[31].mxu1  ;;  %v4061_v39 = vsel %vm1224_vm4, %v3980_v20, 0.0 }
 0x41f   : > { %6314 = vmatprep.mubr.msk.f32.mxu0 %vm2466_vm12, %v9419_v48  ;;  %v2883_v40 = vadd.f32 %v9447_v53, %v2882_v58  ;;  %v3127_v56 = vpop.permute.xlu1 %3126 }
 0x420   : > { %v2930_v62 = vmul.f32 0.5, %v2888_v19  ;;  %v3122_v60 = vpop.permute.xlu0 %3121  ;;  %v3208_v4 = vmul.f32 %v6693_v16, %v3127_v56 }
 0x421   : > { %v2929_v37 = vmul.f32 0.5, %v2883_v40  ;;  %v3207_v8 = vmul.f32 %v6692_v42, %v3122_v60  ;;  %v4172_v60 = vrot.slane %v4061_v39, 1 }
 0x422   : > { %6315 = vmatmul.mubr.msk.f32.gmra.mrb[30].mxu0 %vm2466_vm12, %v9428_v7  ;;  %6603 = vtanh.f32 %v2930_v62 }
 0x423   : > { %6317 = vmatprep.mubr.msk.f32.mxu0 %vm2466_vm12, %v9442_v55  ;;  %6605 = vtanh.f32 %v2929_v37  ;;  %6148 = vmatprep.mubr.msk.f32.mxu1 %vm581_vm0, %v3207_v8 }
 0x424   : > { %6149 = vmatmul.mubr.msk.f32.gmra.mrb[52].mxu1 %vm581_vm0, %v3208_v4 }
 0x426   : > { %6318 = vmatmul.mubr.msk.f32.gmra.mrb[32].mxu0 %vm2466_vm12, %v9454_v13 }
 0x42a   : > { %v6118_v1 = vpop.f32.mrb[32].mxu1 }
 0x42b   : > { %v2898_v27 = vadd.f32 %v9447_v53, %v6118_v1  ;;  %v2892_v26 = vpop.f32.mrb[33].mxu1  ;;  %v6698_v1 = vld [vmem:[%s6855_s24 + $0xa0] sm:$0xff] }
 0x42c   : > { %v2893_v28 = vadd.f32 %v9447_v53, %v2892_v26  ;;  %v6604_v63 = vpop.eup %6603  ;;  %v3900_v53 = vmul.f32 %v9583_v18, %v9580_v57  ;;  %v6699_v26 = vld [vmem:[%s6855_s24 + $0xa8] sm:$0xff] }
 0x42d   : > { %v2932_v12 = vmul.f32 0.5, %v2898_v27  ;;  %v6606_v52 = vpop.eup %6605  ;;  %v2994_v43 = vmul.f32 0.5, %v6604_v63 }
 0x42e   : > { %v2931_v22 = vmul.f32 0.5, %v2893_v28  ;;  %v2993_v50 = vmul.f32 0.5, %v6606_v52  ;;  %v3979_v44 = vrot.slane %v3900_v53, 7  ;;  %v4351_v52 = vrot.slane %v4061_v39, 2 }
 0x42f   : > { %6607 = vtanh.f32 %v2932_v12  ;;  %v3026_v15 = vadd.f32 0.5, %v2994_v43 }
 0x430   : > { %6609 = vtanh.f32 %v2931_v22  ;;  %v3025_v30 = vadd.f32 0.5, %v2993_v50  ;;  %v9588_v5 = vsel %vm1224_vm4, %v3979_v44, %v3980_v20  ;;  %v9592_v19 = vsel %vm1224_vm4, 0.0, %v3979_v44  ;;  %v6701_v44 = vld [vmem:[%s6855_s24 + $0xb8] sm:$0xff] }
 0x431   : > { %3176 = vperm.xlu1 %6546, %v3026_v15   ;;  %v4170_v62 = vrot.slane %v9588_v5, 1  ;;  %v4169_v8 = vrot.slane %v9592_v19, 1  ;;  %v4349_v12 = vrot.slane %v9588_v5, 2  ;;  %v4348_v22 = vrot.slane %v9592_v19, 2 }
 0x432   : > { %3171 = vperm.xlu0 %6545, %v3025_v30   ;;  %v6700_v30 = vld [vmem:[%s6855_s24 + $0xb0] sm:$0xff] }
 0x433   : > { %v4173_v63 = vsel %vm1383_vm5, %v4170_v62, %v4172_v60  ;;  %v4171_v43 = vsel %vm1383_vm5, %v4169_v8, %v4170_v62  ;;  %v4352_v50 = vsel %vm1554_vm6, %v4349_v12, %v4351_v52  ;;  %v4350_v11 = vsel %vm1554_vm6, %v4348_v22, %v4349_v12  ;;  %v6703_v62 = vld [vmem:[%s6855_s24 + $0xc8] sm:$0xff] }
 0x434   : > { %v897_v12 = vlaneseq }
 0x439   : > { %v6608_v47 = vpop.eup %6607 }
 0x43a   : > { %v6610_v58 = vpop.eup %6609  ;;  %v2996_v40 = vmul.f32 0.5, %v6608_v47 }
 0x43b   : > { %v2995_v56 = vmul.f32 0.5, %v6610_v58  ;;  %v3137_v42 = vpop.permute.xlu1 %3136 }
 0x43c   : > { %v3028_v37 = vadd.f32 0.5, %v2996_v40  ;;  %v3132_v4 = vpop.permute.xlu0 %3131  ;;  %v3210_v28 = vmul.f32 %v6699_v26, %v3137_v42  ;;  %v6702_v40 = vld [vmem:[%s6855_s24 + $0xc0] sm:$0xff] }
 0x43d   : > { %v3027_v16 = vadd.f32 0.5, %v2995_v56  ;;  %v3209_v27 = vmul.f32 %v6698_v1, %v3132_v4 }
 0x43e   : > { %3186 = vperm.xlu1 %6546, %v3028_v37   ;;  %v815_v37 = vld [vmem:[%s9964_s7] sm:$0x1] }
 0x43f   : > { %3181 = vperm.xlu0 %6545, %v3027_v16   ;;  %6151 = vmatprep.mubr.msk.f32.mxu1 %vm581_vm0, %v3209_v27  ;;  %v6704_v16 = vld [vmem:[%s6855_s24 + $0xd0] sm:$0xff]  ;;  %v889_v1 = vadd.f32 %v9551_v31, %v815_v37  ;;  %v6705_v27 = vld [vmem:[%s6855_s24 + $0xd8] sm:$0xff]  ;;  %v6707_v31 = vld [vmem:[%s6855_s24 + $0xe8] sm:$0xff] }
 0x440   : > { %6152 = vmatmul.mubr.msk.f32.gmra.mrb[54].mxu1 %vm581_vm0, %v3210_v28 }
 0x441   : > { %v892_v28 = vmax.f32 %v889_v1, 0.0 }
 0x442   : > { %4238 = vrot.lane.b32.xlu1 %v4173_v63, %s6749_s16 }
 0x443   : > { %4236 = vrot.lane.b32.xlu0 %v4171_v43, %s6749_s16  ;;  %v893_v63 = vmul.f32 0.5, %v892_v28  ;;  %v6711_v28 = vld [vmem:[%s6864_s27 + $0x18] sm:$0xff] }
 0x445   : > { %6611 = vtanh.f32 %v893_v63 }
 0x446   : > { %4417 = vrot.lane.b32.xlu1 %v4352_v50, %s6751_s18 }
 0x447   : > { %4415 = vrot.lane.b32.xlu0 %v4350_v11, %s6751_s18  ;;  %v898_v11 = vshrl.u32 %v897_v12, 7 }
 0x44f   : > { %v6612_v52 = vpop.eup %6611 }
 0x450   : > { %v895_v50 = vmul.f32 0.5, %v6612_v52  ;;  %v6712_v52 = vld [vmem:[%s6864_s27 + $0x20] sm:$0xff] }
 0x457   : > { %v3147_v53 = vpop.permute.xlu1 %3146 }
 0x458   : > { %v3142_v15 = vpop.permute.xlu0 %3141  ;;  %v3212_v39 = vmul.f32 %v6701_v44, %v3147_v53  ;;  %v6706_v53 = vld [vmem:[%s6855_s24 + $0xe0] sm:$0xff]  ;;  %v899_v44 = vsub.s32 0, %v898_v11 }
 0x459   : > { %v3211_v20 = vmul.f32 %v6700_v30, %v3142_v15 }
 0x45b   : > { %6154 = vmatprep.mubr.msk.f32.mxu1 %vm581_vm0, %v3211_v20  ;;  %v896_v20 = vadd.f32 0.5, %v895_v50  ;;  %v6714_v50 = vld [vmem:[%s6864_s27 + $0x30] sm:$0xff] }
 0x45c   : > { %6155 = vmatmul.mubr.msk.f32.gmra.mrb[56].mxu1 %vm581_vm0, %v3212_v39 }
 0x45d   : > { %v9630_v39 = vrot.slane %v896_v20, %v899_v44  ;;  %v6720_v44 = vld [vmem:[%s6864_s27 + $0x60] sm:$0xff] }
 0x45f   : > { %v904_v63 = vmul.f32 %v6711_v28, %v9630_v39  ;;  %v907_v11 = vmul.f32 %v6714_v50, %v9630_v39 }
 0x477   : > { %v3157_v47 = vpop.permute.xlu1 %3156 }
 0x478   : > { %v3152_v58 = vpop.permute.xlu0 %3151  ;;  %v3214_v60 = vmul.f32 %v6703_v62, %v3157_v47 }
 0x479   : > { %v3213_v56 = vmul.f32 %v6702_v40, %v3152_v58 }
 0x47b   : > { %6157 = vmatprep.mubr.msk.f32.mxu1 %vm581_vm0, %v3213_v56  ;;  %v6708_v56 = vld [vmem:[%s6864_s27] sm:$0xff] }
 0x47c   : > { %6158 = vmatmul.mubr.msk.f32.gmra.mrb[58].mxu1 %vm581_vm0, %v3214_v60  ;;  %v901_v62 = vmul.f32 %v6708_v56, %v9630_v39  ;;  %v6724_v56 = vld [vmem:[%s6864_s27 + $0x80] sm:$0xff] }
 0x497   : > { %v3167_v42 = vpop.permute.xlu1 %3166 }
 0x498   : > { %v3162_v8 = vpop.permute.xlu0 %3161  ;;  %v3216_v26 = vmul.f32 %v6705_v27, %v3167_v42  ;;  %v6709_v42 = vld [vmem:[%s6864_s27 + $0x8] sm:$0xff] }
 0x499   : > { %v3215_v4 = vmul.f32 %v6704_v16, %v3162_v8  ;;  %v902_v8 = vmul.f32 %v6709_v42, %v9630_v39  ;;  %v6728_v42 = vld [vmem:[%s6864_s27 + $0xa0] sm:$0xff] }
 0x49b   : > { %6160 = vmatprep.mubr.msk.f32.mxu1 %vm581_vm0, %v3215_v4  ;;  %v6710_v4 = vld [vmem:[%s6864_s27 + $0x10] sm:$0xff] }
 0x49c   : > { %6161 = vmatmul.mubr.msk.f32.gmra.mrb[60].mxu1 %vm581_vm0, %v3216_v26 }
 0x4b0   : > { %v3177_v43 = vpop.permute.xlu1 %3176 }
 0x4b1   : > { %v3172_v22 = vpop.permute.xlu0 %3171  ;;  %v3218_v30 = vmul.f32 %v6707_v31, %v3177_v43 }
 0x4b2   : > { %v3217_v15 = vmul.f32 %v6706_v53, %v3172_v22 }
 0x4b4   : > { %6163 = vmatprep.mubr.msk.f32.mxu1 %vm581_vm0, %v3217_v15  ;;  %v6716_v15 = vld [vmem:[%s6864_s27 + $0x40] sm:$0xff] }
 0x4b5   : > { %6164 = vmatmul.mubr.msk.f32.gmra.mrb[62].mxu1 %vm581_vm0, %v3218_v30  ;;  %v6718_v30 = vld [vmem:[%s6864_s27 + $0x50] sm:$0xff] }
 0x4bd   : > { %v3187_v47 = vpop.permute.xlu1 %3186 }
 0x4be   : > { %v3182_v58 = vpop.permute.xlu0 %3181  ;;  %v3220_v60 = vmul.f32 %v9572_v41, %v3187_v47 }
 0x4bf   : > { %v3219_v40 = vmul.f32 %v9580_v57, %v3182_v58  ;;  %v903_v57 = vmul.f32 %v6710_v4, %v9630_v39  ;;  %v6722_v58 = vld [vmem:[%s6864_s27 + $0x70] sm:$0xff] }
 0x4c1   : > { %v4239_v37 = vpop.permute.xlu1 %4238  ;;  %6166 = vmatprep.mubr.msk.f32.mxu1 %vm581_vm0, %v3219_v40 }
 0x4c2   : > { %6167 = vmatmul.mubr.msk.f32.gmra.mrb[64].mxu1 %vm581_vm0, %v3220_v60  ;;  %v4237_v16 = vpop.permute.xlu0 %4236  ;;  %v4484_v1 = vsel %vm581_vm0, %v9588_v5, %v4239_v37  ;;  %v905_v5 = vmul.f32 %v6712_v52, %v9630_v39  ;;  %v6726_v60 = vld [vmem:[%s6864_s27 + $0x90] sm:$0xff] }
 0x4c3   : > { %6171 = vmatprep.mubr.msk.f32.mxu1 %vm581_vm0, %v901_v62  ;;  %v4483_v41 = vsel %vm581_vm0, %v9592_v19, %v4237_v16  ;;  %v6713_v19 = vld [vmem:[%s6864_s27 + $0x28] sm:$0xff]  ;;  %v6730_v16 = vld [vmem:[%s6864_s27 + $0xb0] sm:$0xff] }
 0x4c4   : > { %v906_v22 = vmul.f32 %v6713_v19, %v9630_v39 }
 0x4c5   : > { %v4418_v27 = vpop.permute.xlu1 %4417 }
 0x4c6   : > { %v4416_v26 = vpop.permute.xlu0 %4415  ;;  %6172 = vmatmul.mubr.msk.f32.vlgmr.msra.gmra.mrb[34].mxu1 %vm581_vm0, %v902_v8  ;;  %v9657_v43 = vsel %vm2400_vm11, %v4484_v1, %v4418_v27  ;;  %v6734_v27 = vld [vmem:[%s6864_s27 + $0xd0] sm:$0xff] }
 0x4c7   : > { %v9651_v12 = vsel %vm2400_vm11, %v4483_v41, %v4416_v26  ;;  %6174 = vmatprep.mubr.msk.f32.mxu1 %vm581_vm0, %v903_v57  ;;  %v6732_v57 = vld [vmem:[%s6864_s27 + $0xc0] sm:$0xff] }
 0x4c8   : > { %6320 = vmatprep.mubr.msk.f32.mxu0 %vm2466_vm12, %v9651_v12  ;;  %v6736_v26 = vld [vmem:[%s6864_s27 + $0xe0] sm:$0xff] }
 0x4c9   : > { %6321 = vmatmul.mubr.msk.f32.gmra.mrb[34].mxu0 %vm2466_vm12, %v9657_v43  ;;  %v929_v28 = vmul.f32 %v6736_v26, %v9630_v39 }
 0x4ca   : > { %6175 = vmatmul.mubr.msk.f32.gmra.mrb[36].mxu1 %vm581_vm0, %v904_v63  ;;  %6327 = vmatprep.mubr.msk.f32.mxu0 %vm2466_vm12, %v9237_v36  ;;  %v6715_v36 = vld [vmem:[%s6864_s27 + $0x38] sm:$0xff]  ;;  %v931_v63 = vmul.f32 %v9583_v18, %v9630_v39  ;;  %v9813_v18 = vld [vmem:[%s9970_s13] ss:$0 sm:$0xff] }
 0x4cb   : > { %6177 = vmatprep.mubr.msk.f32.mxu1 %vm581_vm0, %v905_v5  ;;  %v908_v53 = vmul.f32 %v6715_v36, %v9630_v39  ;;  %v9818_v5 = vld [vmem:[%s9971_s14] ss:$0 sm:$0xff] }
 0x4cd   : > { %6328 = vmatmul.mubr.msk.f32.vlgmr.msra.gmra.mrb[4].mxu0 %vm2466_vm12, %v9234_v34  ;;  %v909_v34 = vmul.f32 %v6716_v15, %v9630_v39 }
 0x4ce   : > { %6178 = vmatmul.mubr.msk.f32.gmra.mrb[38].mxu1 %vm581_vm0, %v906_v22  ;;  %6330 = vmatprep.mubr.msk.f32.mxu0 %vm2466_vm12, %v9252_v46  ;;  %v6717_v46 = vld [vmem:[%s6864_s27 + $0x48] sm:$0xff] }
 0x4cf   : > { %6180 = vmatprep.mubr.msk.f32.mxu1 %vm581_vm0, %v907_v11  ;;  %v910_v31 = vmul.f32 %v6717_v46, %v9630_v39 }
 0x4d1   : > { %6331 = vmatmul.mubr.msk.f32.gmra.mrb[6].mxu0 %vm2466_vm12, %v9249_v54  ;;  %v911_v54 = vmul.f32 %v6718_v30, %v9630_v39 }
 0x4d2   : > { %6181 = vmatmul.mubr.msk.f32.gmra.mrb[40].mxu1 %vm581_vm0, %v908_v53  ;;  %6333 = vmatprep.mubr.msk.f32.mxu0 %vm2466_vm12, %v9268_v38  ;;  %v6719_v38 = vld [vmem:[%s6864_s27 + $0x58] sm:$0xff] }
 0x4d3   : > { %6183 = vmatprep.mubr.msk.f32.mxu1 %vm581_vm0, %v909_v34  ;;  %v912_v20 = vmul.f32 %v6719_v38, %v9630_v39 }
 0x4d5   : > { %6334 = vmatmul.mubr.msk.f32.gmra.mrb[8].mxu0 %vm2466_vm12, %v9265_v2  ;;  %v913_v2 = vmul.f32 %v6720_v44, %v9630_v39 }
 0x4d6   : > { %6184 = vmatmul.mubr.msk.f32.gmra.mrb[42].mxu1 %vm581_vm0, %v910_v31  ;;  %6336 = vmatprep.mubr.msk.f32.mxu0 %vm2466_vm12, %v9288_v25  ;;  %v6721_v25 = vld [vmem:[%s6864_s27 + $0x68] sm:$0xff] }
 0x4d7   : > { %6186 = vmatprep.mubr.msk.f32.mxu1 %vm581_vm0, %v911_v54  ;;  %v914_v47 = vmul.f32 %v6721_v25, %v9630_v39 }
 0x4d9   : > { %6337 = vmatmul.mubr.msk.f32.gmra.mrb[10].mxu0 %vm2466_vm12, %v9279_v33  ;;  %v915_v33 = vmul.f32 %v6722_v58, %v9630_v39 }
 0x4da   : > { %6187 = vmatmul.mubr.msk.f32.gmra.mrb[44].mxu1 %vm581_vm0, %v912_v20  ;;  %6339 = vmatprep.mubr.msk.f32.mxu0 %vm2466_vm12, %v9306_v0  ;;  %v6723_v0 = vld [vmem:[%s6864_s27 + $0x78] sm:$0xff] }
 0x4db   : > { %6189 = vmatprep.mubr.msk.f32.mxu1 %vm581_vm0, %v913_v2  ;;  %v916_v40 = vmul.f32 %v6723_v0, %v9630_v39 }
 0x4dd   : > { %6340 = vmatmul.mubr.msk.f32.gmra.mrb[12].mxu0 %vm2466_vm12, %v9303_v29  ;;  %v917_v29 = vmul.f32 %v6724_v56, %v9630_v39 }
 0x4de   : > { %6190 = vmatmul.mubr.msk.f32.gmra.mrb[46].mxu1 %vm581_vm0, %v914_v47  ;;  %6342 = vmatprep.mubr.msk.f32.mxu0 %vm2466_vm12, %v9322_v17  ;;  %v6725_v17 = vld [vmem:[%s6864_s27 + $0x88] sm:$0xff] }
 0x4df   : > { %6192 = vmatprep.mubr.msk.f32.mxu1 %vm581_vm0, %v915_v33  ;;  %v918_v62 = vmul.f32 %v6725_v17, %v9630_v39 }
 0x4e1   : > { %6343 = vmatmul.mubr.msk.f32.gmra.mrb[14].mxu0 %vm2466_vm12, %v9319_v9  ;;  %v919_v9 = vmul.f32 %v6726_v60, %v9630_v39 }
 0x4e2   : > { %6193 = vmatmul.mubr.msk.f32.gmra.mrb[48].mxu1 %vm581_vm0, %v916_v40  ;;  %6345 = vmatprep.mubr.msk.f32.mxu0 %vm2466_vm12, %v9336_v35  ;;  %v6727_v35 = vld [vmem:[%s6864_s27 + $0x98] sm:$0xff] }
 0x4e3   : > { %6195 = vmatprep.mubr.msk.f32.mxu1 %vm581_vm0, %v917_v29  ;;  %v920_v37 = vmul.f32 %v6727_v35, %v9630_v39 }
 0x4e5   : > { %6346 = vmatmul.mubr.msk.f32.gmra.mrb[16].mxu0 %vm2466_vm12, %v9333_v21  ;;  %v921_v21 = vmul.f32 %v6728_v42, %v9630_v39 }
 0x4e6   : > { %6196 = vmatmul.mubr.msk.f32.gmra.mrb[50].mxu1 %vm581_vm0, %v918_v62  ;;  %6348 = vmatprep.mubr.msk.f32.mxu0 %vm2466_vm12, %v9350_v61  ;;  %v6729_v61 = vld [vmem:[%s6864_s27 + $0xa8] sm:$0xff] }
 0x4e7   : > { %6198 = vmatprep.mubr.msk.f32.mxu1 %vm581_vm0, %v919_v9  ;;  %v922_v8 = vmul.f32 %v6729_v61, %v9630_v39 }
 0x4e9   : > { %6349 = vmatmul.mubr.msk.f32.gmra.mrb[18].mxu0 %vm2466_vm12, %v9347_v14  ;;  %v923_v14 = vmul.f32 %v6730_v16, %v9630_v39 }
 0x4ea   : > { %6199 = vmatmul.mubr.msk.f32.gmra.mrb[52].mxu1 %vm581_vm0, %v920_v37  ;;  %6351 = vmatprep.mubr.msk.f32.mxu0 %vm2466_vm12, %v9364_v10  ;;  %v6731_v10 = vld [vmem:[%s6864_s27 + $0xb8] sm:$0xff] }
 0x4eb   : > { %6201 = vmatprep.mubr.msk.f32.mxu1 %vm581_vm0, %v921_v21  ;;  %v924_v4 = vmul.f32 %v6731_v10, %v9630_v39 }
 0x4ed   : > { %6352 = vmatmul.mubr.msk.f32.gmra.mrb[20].mxu0 %vm2466_vm12, %v9361_v32  ;;  %v925_v32 = vmul.f32 %v6732_v57, %v9630_v39 }
 0x4ee   : > { %6202 = vmatmul.mubr.msk.f32.gmra.mrb[54].mxu1 %vm581_vm0, %v922_v8  ;;  %6354 = vmatprep.mubr.msk.f32.mxu0 %vm2466_vm12, %v9380_v3  ;;  %v6733_v3 = vld [vmem:[%s6864_s27 + $0xc8] sm:$0xff] }
 0x4ef   : > { %6204 = vmatprep.mubr.msk.f32.mxu1 %vm581_vm0, %v923_v14  ;;  %v926_v1 = vmul.f32 %v6733_v3, %v9630_v39 }
 0x4f1   : > { %6355 = vmatmul.mubr.msk.f32.gmra.mrb[22].mxu0 %vm2466_vm12, %v9377_v59  ;;  %v927_v59 = vmul.f32 %v6734_v27, %v9630_v39 }
 0x4f2   : > { %6205 = vmatmul.mubr.msk.f32.gmra.mrb[56].mxu1 %vm581_vm0, %v924_v4  ;;  %6357 = vmatprep.mubr.msk.f32.mxu0 %vm2466_vm12, %v9394_v49  ;;  %v6735_v49 = vld [vmem:[%s6864_s27 + $0xd8] sm:$0xff] }
 0x4f3   : > { %6207 = vmatprep.mubr.msk.f32.mxu1 %vm581_vm0, %v925_v32  ;;  %v928_v41 = vmul.f32 %v6735_v49, %v9630_v39 }
 0x4f5   : > { %6358 = vmatmul.mubr.msk.f32.gmra.mrb[24].mxu0 %vm2466_vm12, %v9391_v51  ;;  %v6737_v51 = vld [vmem:[%s6864_s27 + $0xe8] sm:$0xff] }
 0x4f6   : > { %6208 = vmatmul.mubr.msk.f32.gmra.mrb[58].mxu1 %vm581_vm0, %v926_v1  ;;  %6360 = vmatprep.mubr.msk.f32.mxu0 %vm2466_vm12, %v9408_v24  ;;  %v930_v24 = vmul.f32 %v6737_v51, %v9630_v39 }
 0x4f7   : > { %6210 = vmatprep.mubr.msk.f32.mxu1 %vm581_vm0, %v927_v59 }
 0x4f9   : > { %6361 = vmatmul.mubr.msk.f32.gmra.mrb[26].mxu0 %vm2466_vm12, %v9405_v6  ;;  %v932_v6 = vmul.f32 %v9575_v23, %v9630_v39 }
 0x4fa   : > { %6211 = vmatmul.mubr.msk.f32.gmra.mrb[60].mxu1 %vm581_vm0, %v928_v41  ;;  %6363 = vmatprep.mubr.msk.f32.mxu0 %vm2466_vm12, %v9419_v48 }
 0x4fb   : > { %6213 = vmatprep.mubr.msk.f32.mxu1 %vm581_vm0, %v929_v28 }
 0x4fd   : > { %6364 = vmatmul.mubr.msk.f32.gmra.mrb[28].mxu0 %vm2466_vm12, %v9428_v7 }
 0x4fe   : > { %6214 = vmatmul.mubr.msk.f32.gmra.mrb[62].mxu1 %vm581_vm0, %v930_v24  ;;  %6366 = vmatprep.mubr.msk.f32.mxu0 %vm2466_vm12, %v9442_v55 }
 0x4ff   : > { %6216 = vmatprep.mubr.msk.f32.mxu1 %vm581_vm0, %v931_v63 }
 0x501   : > { %6367 = vmatmul.mubr.msk.f32.gmra.mrb[30].mxu0 %vm2466_vm12, %v9454_v13 }
 0x502   : > { %6217 = vmatmul.mubr.msk.f32.gmra.mrb[64].mxu1 %vm581_vm0, %v932_v6  ;;  %6369 = vmatprep.mubr.msk.f32.mxu0 %vm2466_vm12, %v9651_v12 }
 0x505   : > { %6370 = vmatmul.mubr.msk.f32.gmra.mrb[32].mxu0 %vm2466_vm12, %v9657_v43 }
 0x506   : > { %6372 = vmatprep.mubr.msk.f32.mxu0 %vm2466_vm12, %v9192_v45 }
 0x509   : > { %6373 = vmatmul.mubr.msk.f32.gmra.mrb[34].mxu0 %vm2466_vm12, %v9192_v45 }
 0x599   : > { %v6173_v48 = vpop.f32.mrb[34].mxu1 }
 0x59a   : > { %v3711_v7 = vpop.f32.mrb[35].mxu1 }
 0x59d   : > { %v6176_v55 = vpop.f32.mrb[36].mxu1 }
 0x59e   : > { %v3721_v23 = vpop.f32.mrb[37].mxu1 }
 0x5a0   : > { %v6329_v13 = vpop.f32.mrb[4].mxu0 }
 0x5a1   : > { %v6397_v39 = vadd.f32 %v6329_v13, %v6173_v48  ;;  %v6179_v12 = vpop.f32.mrb[38].mxu1  ;;  %v5214_v52 = vpop.f32.mrb[5].mxu0 }
 0x5a2   : > { %v6398_v45 = vadd.f32 %v5214_v52, %v3711_v7  ;;  %v3731_v43 = vpop.f32.mrb[39].mxu1 }
 0x5a3   : > { %v5413_v19 = vmul.f32 %v6397_v39, %v9813_v18 }
 0x5a4   : > { %v5412_v22 = vmul.f32 %v6398_v45, %v9813_v18  ;;  %v6332_v50 = vpop.f32.mrb[6].mxu0 }
 0x5a5   : > { %v5452_v11 = vadd.f32 %v9818_v5, %v5413_v19  ;;  %v6399_v36 = vadd.f32 %v6332_v50, %v6176_v55  ;;  %v6182_v53 = vpop.f32.mrb[40].mxu1  ;;  %v5224_v15 = vpop.f32.mrb[7].mxu0 }
 0x5a6   : > { %v5451_v34 = vadd.f32 %v9818_v5, %v5412_v22  ;;  %v6400_v46 = vadd.f32 %v5224_v15, %v3721_v23  ;;  %v3741_v31 = vpop.f32.mrb[41].mxu1 }
 0x5a7   : > { %v5484_v30 = vmax.f32 %v5452_v11, 0.0  ;;  %v5415_v54 = vmul.f32 %v6399_v36, %v9813_v18 }
 0x5a8   : > { %v5483_v38 = vmax.f32 %v5451_v34, 0.0  ;;  %v5414_v20 = vmul.f32 %v6400_v46, %v9813_v18  ;;  %v6335_v44 = vpop.f32.mrb[8].mxu0 }
 0x5a9   : > { %5516 = vst.msk [vmem:[%s9827_s9 + $0x8] sm:$0xff] %vm581_vm0, %v5484_v30  ;;  %v5454_v2 = vadd.f32 %v9818_v5, %v5415_v54  ;;  %v6401_v25 = vadd.f32 %v6335_v44, %v6179_v12  ;;  %v6185_v47 = vpop.f32.mrb[42].mxu1  ;;  %v5234_v58 = vpop.f32.mrb[9].mxu0 }
 0x5aa   : > { %5515 = vst.msk [vmem:[%s9827_s9] sm:$0xff] %vm581_vm0, %v5483_v38  ;;  %v5453_v33 = vadd.f32 %v9818_v5, %v5414_v20  ;;  %v6402_v0 = vadd.f32 %v5234_v58, %v3731_v43  ;;  %v3751_v40 = vpop.f32.mrb[43].mxu1 }
 0x5ab   : > { %v5486_v56 = vmax.f32 %v5454_v2, 0.0  ;;  %v5417_v29 = vmul.f32 %v6401_v25, %v9813_v18 }
 0x5ac   : > { %v5485_v17 = vmax.f32 %v5453_v33, 0.0  ;;  %v5416_v62 = vmul.f32 %v6402_v0, %v9813_v18  ;;  %v6338_v60 = vpop.f32.mrb[10].mxu0 }
 0x5ad   : > { %5518 = vst.msk [vmem:[%s9827_s9 + $0x18] sm:$0xff] %vm581_vm0, %v5486_v56  ;;  %v5456_v9 = vadd.f32 %v9818_v5, %v5417_v29  ;;  %v6403_v35 = vadd.f32 %v6338_v60, %v6182_v53  ;;  %v6188_v37 = vpop.f32.mrb[44].mxu1  ;;  %v5244_v42 = vpop.f32.mrb[11].mxu0 }
 0x5ae   : > { %5517 = vst.msk [vmem:[%s9827_s9 + $0x10] sm:$0xff] %vm581_vm0, %v5485_v17  ;;  %v5455_v21 = vadd.f32 %v9818_v5, %v5416_v62  ;;  %v6404_v61 = vadd.f32 %v5244_v42, %v3741_v31  ;;  %v3761_v8 = vpop.f32.mrb[45].mxu1 }
 0x5af   : > { %v5488_v16 = vmax.f32 %v5456_v9, 0.0  ;;  %v5419_v14 = vmul.f32 %v6403_v35, %v9813_v18 }
 0x5b0   : > { %v5487_v10 = vmax.f32 %v5455_v21, 0.0  ;;  %v5418_v4 = vmul.f32 %v6404_v61, %v9813_v18  ;;  %v6341_v57 = vpop.f32.mrb[12].mxu0 }
 0x5b1   : > { %5520 = vst.msk [vmem:[%s9827_s9 + $0x28] sm:$0xff] %vm581_vm0, %v5488_v16  ;;  %v5458_v32 = vadd.f32 %v9818_v5, %v5419_v14  ;;  %v6405_v3 = vadd.f32 %v6341_v57, %v6185_v47  ;;  %v6191_v1 = vpop.f32.mrb[46].mxu1  ;;  %v5254_v27 = vpop.f32.mrb[13].mxu0 }
 0x5b2   : > { %5519 = vst.msk [vmem:[%s9827_s9 + $0x20] sm:$0xff] %vm581_vm0, %v5487_v10  ;;  %v5457_v59 = vadd.f32 %v9818_v5, %v5418_v4  ;;  %v6406_v49 = vadd.f32 %v5254_v27, %v3751_v40  ;;  %v3771_v41 = vpop.f32.mrb[47].mxu1 }
 0x5b3   : > { %v5490_v26 = vmax.f32 %v5458_v32, 0.0  ;;  %v5421_v28 = vmul.f32 %v6405_v3, %v9813_v18 }
 0x5b4   : > { %v5489_v51 = vmax.f32 %v5457_v59, 0.0  ;;  %v5420_v24 = vmul.f32 %v6406_v49, %v9813_v18  ;;  %v6344_v63 = vpop.f32.mrb[14].mxu0 }
 0x5b5   : > { %5522 = vst.msk [vmem:[%s9827_s9 + $0x38] sm:$0xff] %vm581_vm0, %v5490_v26  ;;  %v5460_v6 = vadd.f32 %v9818_v5, %v5421_v28  ;;  %v6407_v48 = vadd.f32 %v6344_v63, %v6188_v37  ;;  %v6194_v7 = vpop.f32.mrb[48].mxu1  ;;  %v5264_v55 = vpop.f32.mrb[15].mxu0 }
 0x5b6   : > { %5521 = vst.msk [vmem:[%s9827_s9 + $0x30] sm:$0xff] %vm581_vm0, %v5489_v51  ;;  %v5459_v23 = vadd.f32 %v9818_v5, %v5420_v24  ;;  %v6408_v13 = vadd.f32 %v5264_v55, %v3761_v8  ;;  %v3781_v39 = vpop.f32.mrb[49].mxu1 }
 0x5b7   : > { %v5492_v12 = vmax.f32 %v5460_v6, 0.0  ;;  %v5423_v52 = vmul.f32 %v6407_v48, %v9813_v18 }
 0x5b8   : > { %v5491_v45 = vmax.f32 %v5459_v23, 0.0  ;;  %v5422_v43 = vmul.f32 %v6408_v13, %v9813_v18  ;;  %v6347_v19 = vpop.f32.mrb[16].mxu0 }
 0x5b9   : > { %5524 = vst.msk [vmem:[%s9827_s9 + $0x48] sm:$0xff] %vm581_vm0, %v5492_v12  ;;  %v5462_v22 = vadd.f32 %v9818_v5, %v5423_v52  ;;  %v6409_v50 = vadd.f32 %v6347_v19, %v6191_v1  ;;  %v6197_v11 = vpop.f32.mrb[50].mxu1  ;;  %v5274_v36 = vpop.f32.mrb[17].mxu0 }
 0x5ba   : > { %5523 = vst.msk [vmem:[%s9827_s9 + $0x40] sm:$0xff] %vm581_vm0, %v5491_v45  ;;  %v5461_v53 = vadd.f32 %v9818_v5, %v5422_v43  ;;  %v6410_v15 = vadd.f32 %v5274_v36, %v3771_v41  ;;  %v3791_v34 = vpop.f32.mrb[51].mxu1 }
 0x5bb   : > { %v5494_v46 = vmax.f32 %v5462_v22, 0.0  ;;  %v5425_v31 = vmul.f32 %v6409_v50, %v9813_v18 }
 0x5bc   : > { %v5493_v30 = vmax.f32 %v5461_v53, 0.0  ;;  %v5424_v54 = vmul.f32 %v6410_v15, %v9813_v18  ;;  %v6350_v38 = vpop.f32.mrb[18].mxu0 }
 0x5bd   : > { %5526 = vst.msk [vmem:[%s9827_s9 + $0x58] sm:$0xff] %vm581_vm0, %v5494_v46  ;;  %v5464_v20 = vadd.f32 %v9818_v5, %v5425_v31  ;;  %v6411_v44 = vadd.f32 %v6350_v38, %v6194_v7  ;;  %v6200_v2 = vpop.f32.mrb[52].mxu1  ;;  %v5284_v25 = vpop.f32.mrb[19].mxu0 }
 0x5be   : > { %5525 = vst.msk [vmem:[%s9827_s9 + $0x50] sm:$0xff] %vm581_vm0, %v5493_v30  ;;  %v5463_v47 = vadd.f32 %v9818_v5, %v5424_v54  ;;  %v6412_v58 = vadd.f32 %v5284_v25, %v3781_v39  ;;  %v3801_v33 = vpop.f32.mrb[53].mxu1 }
 0x5bf   : > { %v5496_v0 = vmax.f32 %v5464_v20, 0.0  ;;  %v5427_v40 = vmul.f32 %v6411_v44, %v9813_v18 }
 0x5c0   : > { %v5495_v56 = vmax.f32 %v5463_v47, 0.0  ;;  %v5426_v29 = vmul.f32 %v6412_v58, %v9813_v18  ;;  %v6353_v17 = vpop.f32.mrb[20].mxu0 }
 0x5c1   : > { %5528 = vst.msk [vmem:[%s9827_s9 + $0x68] sm:$0xff] %vm581_vm0, %v5496_v0  ;;  %v5466_v62 = vadd.f32 %v9818_v5, %v5427_v40  ;;  %v6413_v60 = vadd.f32 %v6353_v17, %v6197_v11  ;;  %v6203_v9 = vpop.f32.mrb[54].mxu1  ;;  %v5294_v35 = vpop.f32.mrb[21].mxu0 }
 0x5c2   : > { %5527 = vst.msk [vmem:[%s9827_s9 + $0x60] sm:$0xff] %vm581_vm0, %v5495_v56  ;;  %v5465_v37 = vadd.f32 %v9818_v5, %v5426_v29  ;;  %v6414_v42 = vadd.f32 %v5294_v35, %v3791_v34  ;;  %v3811_v21 = vpop.f32.mrb[55].mxu1 }
 0x5c3   : > { %v5498_v61 = vmax.f32 %v5466_v62, 0.0  ;;  %v5429_v8 = vmul.f32 %v6413_v60, %v9813_v18 }
 0x5c4   : > { %v5497_v16 = vmax.f32 %v5465_v37, 0.0  ;;  %v5428_v14 = vmul.f32 %v6414_v42, %v9813_v18  ;;  %v6356_v10 = vpop.f32.mrb[22].mxu0 }
 0x5c5   : > { %5530 = vst.msk [vmem:[%s9827_s9 + $0x78] sm:$0xff] %vm581_vm0, %v5498_v61  ;;  %v5468_v4 = vadd.f32 %v9818_v5, %v5429_v8  ;;  %v6415_v57 = vadd.f32 %v6356_v10, %v6200_v2  ;;  %v6206_v32 = vpop.f32.mrb[56].mxu1  ;;  %v5304_v3 = vpop.f32.mrb[23].mxu0 }
 0x5c6   : > { %5529 = vst.msk [vmem:[%s9827_s9 + $0x70] sm:$0xff] %vm581_vm0, %v5497_v16  ;;  %v5467_v1 = vadd.f32 %v9818_v5, %v5428_v14  ;;  %v6416_v27 = vadd.f32 %v5304_v3, %v3801_v33  ;;  %v3821_v59 = vpop.f32.mrb[57].mxu1 }
 0x5c7   : > { %v5500_v49 = vmax.f32 %v5468_v4, 0.0  ;;  %v5431_v41 = vmul.f32 %v6415_v57, %v9813_v18 }
 0x5c8   : > { %v5499_v26 = vmax.f32 %v5467_v1, 0.0  ;;  %v5430_v28 = vmul.f32 %v6416_v27, %v9813_v18  ;;  %v6359_v51 = vpop.f32.mrb[24].mxu0 }
 0x5c9   : > { %5532 = vst.msk [vmem:[%s9827_s9 + $0x88] sm:$0xff] %vm581_vm0, %v5500_v49  ;;  %v5470_v24 = vadd.f32 %v9818_v5, %v5431_v41  ;;  %v6417_v63 = vadd.f32 %v6359_v51, %v6203_v9  ;;  %v6209_v6 = vpop.f32.mrb[58].mxu1  ;;  %v5314_v48 = vpop.f32.mrb[25].mxu0 }
 0x5ca   : > { %5531 = vst.msk [vmem:[%s9827_s9 + $0x80] sm:$0xff] %vm581_vm0, %v5499_v26  ;;  %v5469_v7 = vadd.f32 %v9818_v5, %v5430_v28  ;;  %v6418_v55 = vadd.f32 %v5314_v48, %v3811_v21  ;;  %v3831_v23 = vpop.f32.mrb[59].mxu1 }
 0x5cb   : > { %v5502_v13 = vmax.f32 %v5470_v24, 0.0  ;;  %v5433_v39 = vmul.f32 %v6417_v63, %v9813_v18 }
 0x5cc   : > { %v5501_v12 = vmax.f32 %v5469_v7, 0.0  ;;  %v5432_v52 = vmul.f32 %v6418_v55, %v9813_v18  ;;  %v6362_v45 = vpop.f32.mrb[26].mxu0 }
 0x5cd   : > { %5534 = vst.msk [vmem:[%s9827_s9 + $0x98] sm:$0xff] %vm581_vm0, %v5502_v13  ;;  %v5472_v43 = vadd.f32 %v9818_v5, %v5433_v39  ;;  %v6419_v19 = vadd.f32 %v6362_v45, %v6206_v32  ;;  %v6212_v22 = vpop.f32.mrb[60].mxu1  ;;  %v5324_v50 = vpop.f32.mrb[27].mxu0 }
 0x5ce   : > { %5533 = vst.msk [vmem:[%s9827_s9 + $0x90] sm:$0xff] %vm581_vm0, %v5501_v12  ;;  %v5471_v11 = vadd.f32 %v9818_v5, %v5432_v52  ;;  %v6420_v36 = vadd.f32 %v5324_v50, %v3821_v59  ;;  %v3841_v53 = vpop.f32.mrb[61].mxu1 }
 0x5cf   : > { %v5504_v15 = vmax.f32 %v5472_v43, 0.0  ;;  %v5435_v34 = vmul.f32 %v6419_v19, %v9813_v18 }
 0x5d0   : > { %v5503_v46 = vmax.f32 %v5471_v11, 0.0  ;;  %v5434_v31 = vmul.f32 %v6420_v36, %v9813_v18  ;;  %v6365_v30 = vpop.f32.mrb[28].mxu0 }
 0x5d1   : > { %5536 = vst.msk [vmem:[%s9827_s9 + $0xa8] sm:$0xff] %vm581_vm0, %v5504_v15  ;;  %v5474_v54 = vadd.f32 %v9818_v5, %v5435_v34  ;;  %v6421_v38 = vadd.f32 %v6365_v30, %v6209_v6  ;;  %v6215_v20 = vpop.f32.mrb[62].mxu1  ;;  %v5334_v44 = vpop.f32.mrb[29].mxu0 }
 0x5d2   : > { %5535 = vst.msk [vmem:[%s9827_s9 + $0xa0] sm:$0xff] %vm581_vm0, %v5503_v46  ;;  %v5473_v2 = vadd.f32 %v9818_v5, %v5434_v31  ;;  %v6422_v25 = vadd.f32 %v5334_v44, %v3831_v23  ;;  %v3851_v47 = vpop.f32.mrb[63].mxu1 }
 0x5d3   : > { %v5506_v58 = vmax.f32 %v5474_v54, 0.0  ;;  %v5437_v33 = vmul.f32 %v6421_v38, %v9813_v18 }
 0x5d4   : > { %v5505_v0 = vmax.f32 %v5473_v2, 0.0  ;;  %v5436_v40 = vmul.f32 %v6422_v25, %v9813_v18  ;;  %v6368_v56 = vpop.f32.mrb[30].mxu0 }
 0x5d5   : > { %5538 = vst.msk [vmem:[%s9827_s9 + $0xb8] sm:$0xff] %vm581_vm0, %v5506_v58  ;;  %v5476_v29 = vadd.f32 %v9818_v5, %v5437_v33  ;;  %v6423_v17 = vadd.f32 %v6368_v56, %v6212_v22  ;;  %v6218_v62 = vpop.f32.mrb[64].mxu1  ;;  %v5344_v60 = vpop.f32.mrb[31].mxu0 }
 0x5d6   : > { %5537 = vst.msk [vmem:[%s9827_s9 + $0xb0] sm:$0xff] %vm581_vm0, %v5505_v0  ;;  %v5475_v9 = vadd.f32 %v9818_v5, %v5436_v40  ;;  %v6424_v35 = vadd.f32 %v5344_v60, %v3841_v53  ;;  %v3861_v37 = vpop.f32.mrb[65].mxu1 }
 0x5d7   : > { %v5508_v42 = vmax.f32 %v5476_v29, 0.0  ;;  %v5439_v21 = vmul.f32 %v6423_v17, %v9813_v18 }
 0x5d8   : > { %v5507_v61 = vmax.f32 %v5475_v9, 0.0  ;;  %v5438_v8 = vmul.f32 %v6424_v35, %v9813_v18  ;;  %v6371_v16 = vpop.f32.mrb[32].mxu0 }
 0x5d9   : > { %5540 = vst.msk [vmem:[%s9827_s9 + $0xc8] sm:$0xff] %vm581_vm0, %v5508_v42  ;;  %v5478_v14 = vadd.f32 %v9818_v5, %v5439_v21  ;;  %v6425_v10 = vadd.f32 %v6371_v16, %v6215_v20  ;;  %v5354_v4 = vpop.f32.mrb[33].mxu0 }
 0x5da   : > { %5539 = vst.msk [vmem:[%s9827_s9 + $0xc0] sm:$0xff] %vm581_vm0, %v5507_v61  ;;  %v5477_v57 = vadd.f32 %v9818_v5, %v5438_v8  ;;  %v6426_v32 = vadd.f32 %v5354_v4, %v3851_v47 }
 0x5db   : > { %v5510_v3 = vmax.f32 %v5478_v14, 0.0  ;;  %v5441_v1 = vmul.f32 %v6425_v10, %v9813_v18 }
 0x5dc   : > { %v5509_v27 = vmax.f32 %v5477_v57, 0.0  ;;  %v5440_v59 = vmul.f32 %v6426_v32, %v9813_v18  ;;  %v6374_v49 = vpop.f32.mrb[34].mxu0 }
 0x5dd   : > { %5542 = vst.msk [vmem:[%s9827_s9 + $0xd8] sm:$0xff] %vm581_vm0, %v5510_v3  ;;  %v5480_v41 = vadd.f32 %v9818_v5, %v5441_v1  ;;  %v6427_v26 = vadd.f32 %v6374_v49, %v6218_v62  ;;  %v5364_v28 = vpop.f32.mrb[35].mxu0 }
 0x5de   : > { %5541 = vst.msk [vmem:[%s9827_s9 + $0xd0] sm:$0xff] %vm581_vm0, %v5509_v27  ;;  %v5479_v51 = vadd.f32 %v9818_v5, %v5440_v59  ;;  %v6428_v24 = vadd.f32 %v5364_v28, %v3861_v37 }
 0x5df   : > { %v5512_v63 = vmax.f32 %v5480_v41, 0.0  ;;  %v5443_v6 = vmul.f32 %v6427_v26, %v9813_v18 }
 0x5e0   : > { %v5511_v48 = vmax.f32 %v5479_v51, 0.0  ;;  %v5442_v7 = vmul.f32 %v6428_v24, %v9813_v18 }
 0x5e1   : > { %5544 = vst.msk [vmem:[%s9827_s9 + $0xe8] sm:$0xff] %vm581_vm0, %v5512_v63  ;;  %v5482_v55 = vadd.f32 %v9818_v5, %v5443_v6 }
 0x5e2   : > { %5543 = vst.msk [vmem:[%s9827_s9 + $0xe0] sm:$0xff] %vm581_vm0, %v5511_v48  ;;  %v5481_v23 = vadd.f32 %v9818_v5, %v5442_v7 }
 0x5e3   : > { %v5514_v13 = vmax.f32 %v5482_v55, 0.0 }
 0x5e4   : > { %v5513_v39 = vmax.f32 %v5481_v23, 0.0 }
 0x5e5   : > { %5546 = vst.msk [vmem:[%s9827_s9 + $0xf8] sm:$0xff] %vm581_vm0, %v5514_v13 }
 0x5e6   : > { %5545 = vst.msk [vmem:[%s9827_s9 + $0xf0] sm:$0xff] %vm581_vm0, %v5513_v39 }
 0x5e7 PF: > { %s27_s20 = sadd.s32 1, %s6744_s20  }
 0x5e8   : > { %p24_p4 = scmp.ge.s32.totalorder %s27_s20, 4  }
 0x5ea   :  { %26 = sbr.rel (!%p24_p4) target bundleno = 3 (0x3), region = 115 }

</bundles_post_ra>
